<compile_context>
chip_gen: v7x
topology: tpu7x:2x2x1
jax: 0.10.0
libtpu: 0.0.40
codegen_flags: <defaults>
</compile_context>

<pallas_src>
import numpy as np
import jax
import jax.numpy as jnp
from jax.experimental import pallas as pl
from jax.experimental.pallas import tpu as pltpu


_VMEM = pl.BlockSpec(memory_space=pltpu.MemorySpace.VMEM)

# ---- packed f32 parameter-vector layout (all offsets 128-aligned) ----------
_OFF_C1B   = 0      # conv1 bias, broadcast over spatial positions (1024)
_OFF_C2B   = 1024   # conv2 bias, broadcast over spatial positions (512)
_OFF_FCB   = 1536   # BasicCNN fc bias (64, in a 128 slot)
_OFF_SLB   = 1664   # state_linear bias  (256)
_OFF_SLG   = 1920   # state_linear LN gamma (256)
_OFF_SLBT  = 2176   # state_linear LN beta  (256)
_OFF_ALW0  = 2432   # action_linear weight row 0 (256) -- f32 VPU path
_OFF_ALW1  = 2688   # action_linear weight row 1 (256)
_OFF_ALB   = 2944   # action_linear bias (256)
_OFF_ALG   = 3200   # action_linear LN gamma (256)
_OFF_ALBT  = 3456   # action_linear LN beta  (256)
_OFF_C1LB  = 3712   # concat_linear[0] bias (64, slot 128)
_OFF_C1LG  = 3840   # concat_linear[1] LN gamma (64, slot 128)
_OFF_C1LBT = 3968   # concat_linear[1] LN beta  (64, slot 128)
_OFF_C2LB  = 4096   # concat_linear[3] bias (64, slot 128)
_OFF_C2LG  = 4224   # concat_linear[4] LN gamma (64, slot 128)
_OFF_C2LBT = 4352   # concat_linear[4] LN beta  (64, slot 128)
_OFF_C3B   = 4480   # concat_linear[6] bias, lane-padded (128)
_PV_LEN    = 4608


# ------------------------------ Pallas kernel -------------------------------

def _ln_elu(y, g, b):
    # LayerNorm(eps=1e-5, affine) followed by ELU(alpha=1), all in f32.
    mean = jnp.mean(y, axis=-1, keepdims=True)
    var = jnp.mean(jnp.square(y - mean), axis=-1, keepdims=True)
    yn = (y - mean) * jax.lax.rsqrt(var + 1e-5)
    yn = yn * g + b
    return jnp.where(yn > 0.0, yn, jnp.exp(jnp.minimum(yn, 0.0)) - 1.0)


def _fused_critic_kernel(x_ref, act_ref, w1_ref, w2_ref, fcw_ref, slw_ref,
                         c1w_ref, c2w_ref, c3w_ref, pv_ref, o_ref):
    f32, bf16 = jnp.float32, jnp.bfloat16

    def seg(off, width):                    # static 128-aligned lane slice
        return pv_ref[:, off:off + width]   # (1, width) f32

    # conv1 (3x3, s2, pad1) as a Toeplitz matmul + ReLU: (N,1024)@(1024,1024).
    # /255 normalization is folded into w1; output is NCHW-flattened.
    h = jnp.dot(x_ref[...], w1_ref[...], preferred_element_type=f32)
    h = jnp.maximum(h + seg(_OFF_C1B, 1024), 0.0)

    # conv2 (3x3, s2, pad1) as a Toeplitz matmul + ReLU: (N,1024)@(1024,512).
    h = jnp.dot(h.astype(bf16), w2_ref[...], preferred_element_type=f32)
    h = jnp.maximum(h + seg(_OFF_C2B, 512), 0.0)

    # BasicCNN fc: Linear(512, 64) + ReLU (rows in NCHW-flatten order).
    feat = jnp.dot(h.astype(bf16), fcw_ref[...], preferred_element_type=f32)
    feat = jnp.maximum(feat + seg(_OFF_FCB, 64), 0.0)

    # state_linear: Linear(64, 256) + LayerNorm + ELU.
    sh = _ln_elu(jnp.dot(feat.astype(bf16), slw_ref[...],
                         preferred_element_type=f32) + seg(_OFF_SLB, 256),
                 seg(_OFF_SLG, 256), seg(_OFF_SLBT, 256))

    # action_linear: Linear(2, 256) on the VPU in f32 (K=2 -> two FMAs),
    # then LayerNorm + ELU.  No bf16 cast of the action.
    a = act_ref[...]                                           # (N, 2) f32
    ah = (a[:, 0:1] * seg(_OFF_ALW0, 256)
          + a[:, 1:2] * seg(_OFF_ALW1, 256)
          + seg(_OFF_ALB, 256))
    ah = _ln_elu(ah, seg(_OFF_ALG, 256), seg(_OFF_ALBT, 256))

    # concat_linear[0]: Linear(512, 64) with the (N,512) concat eliminated
    # (two MXU dots on the two halves of the weight, one f32 accumulator).
    h = (jnp.dot(sh.astype(bf16), c1w_ref[0:256, :], preferred_element_type=f32)
         + jnp.dot(ah.astype(bf16), c1w_ref[256:512, :], preferred_element_type=f32)
         + seg(_OFF_C1LB, 64))
    h = _ln_elu(h, seg(_OFF_C1LG, 64), seg(_OFF_C1LBT, 64))

    # concat_linear[3]: Linear(64, 64) + LayerNorm + ELU.
    h = _ln_elu(jnp.dot(h.astype(bf16), c2w_ref[...],
                        preferred_element_type=f32) + seg(_OFF_C2LB, 64),
                seg(_OFF_C2LG, 64), seg(_OFF_C2LBT, 64))

    # concat_linear[6]: Linear(64, 1), lane-padded to 128 (column 0 is real).
    o_ref[...] = (jnp.dot(h.astype(bf16), c3w_ref[...],
                          preferred_element_type=f32) + seg(_OFF_C3B, 128))


# ------------------------------- op wrapper ---------------------------------

def fused_forward(x_bf16, action_f32, p):
    n = x_bf16.shape[0]
    args = (x_bf16, action_f32,
            p["w1_full"], p["w2_full"], p["fc_w"], p["sl_w"],
            p["c1_w"], p["c2_w"], p["c3_w"], p["pvec"])
    matmul_flops = 2 * n * (1024 * 1024 + 1024 * 512 + 512 * 64 + 64 * 256
                            + 512 * 64 + 64 * 64 + 64 * 128)
    cost = pl.CostEstimate(
        flops=int(matmul_flops + n * 4 * 256),
        transcendentals=int(n * (2 * 256 + 2 * 64 + 5)),
        bytes_accessed=int(sum(int(a.size) * a.dtype.itemsize for a in args)
                           + n * 128 * 4))
    return pl.pallas_call(
        _fused_critic_kernel,
        out_shape=jax.ShapeDtypeStruct((n, 128), jnp.float32),
        in_specs=[_VMEM] * len(args),
        out_specs=_VMEM,
        cost_estimate=cost,
    )(*args)


def critic_forward(params, state, action):
    # state: (N, C, H, W) NCHW (PyTorch convention).  NCHW flatten matches
    # torch.flatten exactly; /255 is folded into the conv1 Toeplitz weights.
    n = state.shape[0]
    x = state.reshape(n, -1).astype(jnp.bfloat16)     # pixels 0..255 exact
    out = fused_forward(x, action.astype(jnp.float32), params)
    return out[:, :1]                                  # (N, 1)


# --------------------------- parameter construction -------------------------

def _conv_toeplitz(w_oihw, bias, in_hw, stride, pad):
    """Dense (Cin*H*W, Cout*Ho*Wo) matrix implementing Conv2d on an
    NCHW-flattened input, producing an NCHW-flattened output (exact)."""
    w = np.asarray(w_oihw, np.float32)
    o_ch, c_ch, kh, kw = w.shape
    h, wdt = in_hw
    ho = (h + 2 * pad - kh) // stride + 1
    wo = (wdt + 2 * pad - kw) // stride + 1
    mat = np.zeros((c_ch * h * wdt, o_ch * ho * wo), np.float32)
    rows_c = np.arange(c_ch) * (h * wdt)
    cols_o = np.arange(o_ch) * (ho * wo)
    for oy in range(ho):
        for ox in range(wo):
            out_pos = oy * wo + ox
            for i in range(kh):
                iy = stride * oy + i - pad
                if iy < 0 or iy >= h:
                    continue
                for j in range(kw):
                    ix = stride * ox + j - pad
                    if ix < 0 or ix >= wdt:
                        continue
                    mat[np.ix_(rows_c + iy * wdt + ix, cols_o + out_pos)] = \
                        w[:, :, i, j].T
    bias_full = np.repeat(np.asarray(bias, np.float32), ho * wo)
    return mat, bias_full


def init_params(key, channel_dim=4, state_dim=64, action_dim=2, spatial=16):
    # Packed-vector offsets above are laid out for this configuration.
    assert spatial == 16 and state_dim == 64 and action_dim == 2
    keys = iter(jax.random.split(key, 16))

    def uni(shape, fan_in):
        s = float(fan_in) ** -0.5
        return jax.random.uniform(next(keys), shape, jnp.float32, -s, s)

    p = {}
    # --- synthetic BasicCNN (see TODO at top) ---
    w1 = np.asarray(uni((16, channel_dim, 3, 3), channel_dim * 9))
    b1 = np.asarray(uni((16,), channel_dim * 9))
    w2 = np.asarray(uni((32, 16, 3, 3), 16 * 9))
    b2 = np.asarray(uni((32,), 16 * 9))
    h1 = spatial // 2
    h2 = spatial // 4
    # Fold `state / 255.0` into conv1's Toeplitz weights (exact up to bf16).
    w1_full, b1_full = _conv_toeplitz(w1 / 255.0, b1, (spatial, spatial), 2, 1)
    w2_full, b2_full = _conv_toeplitz(w2, b2, (h1, h1), 2, 1)
    p["w1_full"] = jnp.asarray(w1_full, jnp.bfloat16)       # (1024, 1024)
    p["w2_full"] = jnp.asarray(w2_full, jnp.bfloat16)       # (1024, 512)
    flat = 32 * h2 * h2                                      # 512
    fc_w = uni((flat, state_dim), flat)       # rows in NCHW-flatten order,
    fc_b = uni((state_dim,), flat)            # matches torch Flatten directly
    p["fc_w"] = fc_w.astype(jnp.bfloat16)
    feature_dim = state_dim
    # state_linear: Linear(feature_dim, 256) + LayerNorm(256) + ELU
    sl_w = uni((feature_dim, 256), feature_dim)
    sl_b = uni((256,), feature_dim)
    p["sl_w"] = sl_w.astype(jnp.bfloat16)
    # action_linear: Linear(action_dim, 256) — kept f32, runs on the VPU
    al_w = np.asarray(uni((action_dim, 256), action_dim))
    al_b = np.asarray(uni((256,), action_dim))
    # concat_linear[0]: Linear(512, 64); halves sliced in-kernel so the
    # (N, 512) concat is never materialized.
    c1_w = uni((512, 64), 512)
    c1_b = np.asarray(uni((64,), 512))
    p["c1_w"] = c1_w.astype(jnp.bfloat16)
    # concat_linear[3]: Linear(64, 64)
    c2_w = uni((64, 64), 64)
    c2_b = np.asarray(uni((64,), 64))
    p["c2_w"] = c2_w.astype(jnp.bfloat16)
    # concat_linear[6]: Linear(64, 1), lane-padded to 128 for unmasked stores.
    c3_w = uni((64, 1), 64)
    c3_b = np.asarray(uni((1,), 64))
    p["c3_w"] = jnp.pad(c3_w, ((0, 0), (0, 127))).astype(jnp.bfloat16)

    # --- single packed f32 parameter vector (one entry DMA) ---
    pv = np.zeros((_PV_LEN,), np.float32)

    def put(off, v):
        v = np.asarray(v, np.float32).reshape(-1)
        pv[off:off + v.size] = v

    put(_OFF_C1B, b1_full)
    put(_OFF_C2B, b2_full)
    put(_OFF_FCB, np.asarray(fc_b))
    put(_OFF_SLB, np.asarray(sl_b))
    put(_OFF_SLG, np.ones(256))
    put(_OFF_SLBT, np.zeros(256))
    put(_OFF_ALW0, al_w[0])
    put(_OFF_ALW1, al_w[1])
    put(_OFF_ALB, al_b)
    put(_OFF_ALG, np.ones(256))
    put(_OFF_ALBT, np.zeros(256))
    put(_OFF_C1LB, c1_b)
    put(_OFF_C1LG, np.ones(64))
    put(_OFF_C1LBT, np.zeros(64))
    put(_OFF_C2LB, c2_b)
    put(_OFF_C2LG, np.ones(64))
    put(_OFF_C2LBT, np.zeros(64))
    put(_OFF_C3B, c3_b)
    p["pvec"] = jnp.asarray(pv).reshape(1, _PV_LEN)
    return p


if __name__ == "__main__":
    key = jax.random.PRNGKey(0)
    kp, ks, ka = jax.random.split(key, 3)
    params = init_params(kp, channel_dim=4, state_dim=64, action_dim=2, spatial=16)
    state = jax.random.uniform(ks, (2, 4, 16, 16), jnp.float32, 0.0, 255.0)
    action = jax.random.uniform(ka, (2, 2), jnp.float32, -1.0, 1.0)

    out = jax.block_until_ready(jax.jit(critic_forward)(params, state, action))
    assert out.shape == (2, 1) and out.dtype == jnp.float32
    assert bool(jnp.isfinite(out).all())
    print("KERNEL_OK")
</pallas_src>

<mosaic_0001>
module attributes {stable_mosaic.version = 11 : i64} {
  func.func @_fused_critic_kernel(%arg0: memref<2x1024xbf16, #tpu.memory_space<vmem>>, %arg1: memref<2x2xf32, #tpu.memory_space<vmem>>, %arg2: memref<1024x1024xbf16, #tpu.memory_space<vmem>>, %arg3: memref<1024x512xbf16, #tpu.memory_space<vmem>>, %arg4: memref<512x64xbf16, #tpu.memory_space<vmem>>, %arg5: memref<64x256xbf16, #tpu.memory_space<vmem>>, %arg6: memref<512x64xbf16, #tpu.memory_space<vmem>>, %arg7: memref<64x64xbf16, #tpu.memory_space<vmem>>, %arg8: memref<64x128xbf16, #tpu.memory_space<vmem>>, %arg9: memref<1x4608xf32, #tpu.memory_space<vmem>>, %arg10: memref<2x128xf32, #tpu.memory_space<vmem>>) attributes {dimension_semantics = [], scalar_prefetch = 0 : i64, scratch_operands = 0 : i64, tpu.core_type = #tpu.core_type<tc>} {
    %c0 = arith.constant 0 : index
    %c0_0 = arith.constant 0 : index
    %0 = vector.load %arg0[%c0, %c0_0] : memref<2x1024xbf16, #tpu.memory_space<vmem>>, vector<2x1024xbf16>
    %c0_1 = arith.constant 0 : index
    %c0_2 = arith.constant 0 : index
    %1 = vector.load %arg2[%c0_1, %c0_2] : memref<1024x1024xbf16, #tpu.memory_space<vmem>>, vector<1024x1024xbf16>
    %cst = arith.constant dense<0.000000e+00> : vector<2x1024xf32>
    %2 = tpu.matmul %0, %1, %cst {dimension_numbers = #tpu.dot_dimension_numbers<[1], [0], [0], [1], [0, 0, 1, 1], [], []>} : vector<2x1024xbf16>, vector<1024x1024xbf16>, vector<2x1024xf32> -> vector<2x1024xf32>
    %c0_3 = arith.constant 0 : index
    %c0_4 = arith.constant 0 : index
    %3 = vector.load %arg9[%c0_3, %c0_4] : memref<1x4608xf32, #tpu.memory_space<vmem>>, vector<1x1024xf32>
    %4 = vector.broadcast %3 : vector<1x1024xf32> to vector<2x1024xf32>
    %5 = arith.addf %2, %4 : vector<2x1024xf32>
    %cst_5 = arith.constant 0.000000e+00 : f32
    %6 = vector.broadcast %cst_5 : f32 to vector<2x1024xf32>
    %7 = arith.maximumf %5, %6 : vector<2x1024xf32>
    %8 = arith.truncf %7 : vector<2x1024xf32> to vector<2x1024xbf16>
    %c0_6 = arith.constant 0 : index
    %c0_7 = arith.constant 0 : index
    %9 = vector.load %arg3[%c0_6, %c0_7] : memref<1024x512xbf16, #tpu.memory_space<vmem>>, vector<1024x512xbf16>
    %cst_8 = arith.constant dense<0.000000e+00> : vector<2x512xf32>
    %10 = tpu.matmul %8, %9, %cst_8 {dimension_numbers = #tpu.dot_dimension_numbers<[1], [0], [0], [1], [0, 0, 1, 1], [], []>} : vector<2x1024xbf16>, vector<1024x512xbf16>, vector<2x512xf32> -> vector<2x512xf32>
    %c0_9 = arith.constant 0 : index
    %c1024 = arith.constant 1024 : index
    %11 = vector.load %arg9[%c0_9, %c1024] : memref<1x4608xf32, #tpu.memory_space<vmem>>, vector<1x512xf32>
    %12 = vector.broadcast %11 : vector<1x512xf32> to vector<2x512xf32>
    %13 = arith.addf %10, %12 : vector<2x512xf32>
    %cst_10 = arith.constant 0.000000e+00 : f32
    %14 = vector.broadcast %cst_10 : f32 to vector<2x512xf32>
    %15 = arith.maximumf %13, %14 : vector<2x512xf32>
    %16 = arith.truncf %15 : vector<2x512xf32> to vector<2x512xbf16>
    %c0_11 = arith.constant 0 : index
    %c0_12 = arith.constant 0 : index
    %17 = vector.load %arg4[%c0_11, %c0_12] : memref<512x64xbf16, #tpu.memory_space<vmem>>, vector<512x64xbf16>
    %cst_13 = arith.constant dense<0.000000e+00> : vector<2x64xf32>
    %18 = tpu.matmul %16, %17, %cst_13 {dimension_numbers = #tpu.dot_dimension_numbers<[1], [0], [0], [1], [0, 0, 1, 1], [], []>} : vector<2x512xbf16>, vector<512x64xbf16>, vector<2x64xf32> -> vector<2x64xf32>
    %c0_14 = arith.constant 0 : index
    %c1536 = arith.constant 1536 : index
    %19 = vector.load %arg9[%c0_14, %c1536] : memref<1x4608xf32, #tpu.memory_space<vmem>>, vector<1x64xf32>
    %20 = vector.broadcast %19 : vector<1x64xf32> to vector<2x64xf32>
    %21 = arith.addf %18, %20 : vector<2x64xf32>
    %cst_15 = arith.constant 0.000000e+00 : f32
    %22 = vector.broadcast %cst_15 : f32 to vector<2x64xf32>
    %23 = arith.maximumf %21, %22 : vector<2x64xf32>
    %24 = arith.truncf %23 : vector<2x64xf32> to vector<2x64xbf16>
    %c0_16 = arith.constant 0 : index
    %c0_17 = arith.constant 0 : index
    %25 = vector.load %arg5[%c0_16, %c0_17] : memref<64x256xbf16, #tpu.memory_space<vmem>>, vector<64x256xbf16>
    %cst_18 = arith.constant dense<0.000000e+00> : vector<2x256xf32>
    %26 = tpu.matmul %24, %25, %cst_18 {dimension_numbers = #tpu.dot_dimension_numbers<[1], [0], [0], [1], [0, 0, 1, 1], [], []>} : vector<2x64xbf16>, vector<64x256xbf16>, vector<2x256xf32> -> vector<2x256xf32>
    %c0_19 = arith.constant 0 : index
    %c1664 = arith.constant 1664 : index
    %27 = vector.load %arg9[%c0_19, %c1664] : memref<1x4608xf32, #tpu.memory_space<vmem>>, vector<1x256xf32>
    %28 = vector.broadcast %27 : vector<1x256xf32> to vector<2x256xf32>
    %29 = arith.addf %26, %28 : vector<2x256xf32>
    %c0_20 = arith.constant 0 : index
    %c1920 = arith.constant 1920 : index
    %30 = vector.load %arg9[%c0_20, %c1920] : memref<1x4608xf32, #tpu.memory_space<vmem>>, vector<1x256xf32>
    %c0_21 = arith.constant 0 : index
    %c2176 = arith.constant 2176 : index
    %31 = vector.load %arg9[%c0_21, %c2176] : memref<1x4608xf32, #tpu.memory_space<vmem>>, vector<1x256xf32>
    %cst_22 = arith.constant dense<0.000000e+00> : vector<2xf32>
    %32 = vector.multi_reduction <add>, %29, %cst_22 [1] : vector<2x256xf32> to vector<2xf32>
    %33 = vector.shape_cast %32 : vector<2xf32> to vector<2x1xf32>
    %cst_23 = arith.constant 2.560000e+02 : f32
    %34 = vector.broadcast %cst_23 : f32 to vector<2x1xf32>
    %35 = arith.divf %33, %34 : vector<2x1xf32>
    %36 = vector.broadcast %35 : vector<2x1xf32> to vector<2x256xf32>
    %37 = arith.subf %29, %36 : vector<2x256xf32>
    %38 = arith.mulf %37, %37 : vector<2x256xf32>
    %cst_24 = arith.constant dense<0.000000e+00> : vector<2xf32>
    %39 = vector.multi_reduction <add>, %38, %cst_24 [1] : vector<2x256xf32> to vector<2xf32>
    %40 = vector.shape_cast %39 : vector<2xf32> to vector<2x1xf32>
    %cst_25 = arith.constant 2.560000e+02 : f32
    %41 = vector.broadcast %cst_25 : f32 to vector<2x1xf32>
    %42 = arith.divf %40, %41 : vector<2x1xf32>
    %43 = vector.broadcast %35 : vector<2x1xf32> to vector<2x256xf32>
    %44 = arith.subf %29, %43 : vector<2x256xf32>
    %cst_26 = arith.constant 9.99999974E-6 : f32
    %45 = vector.broadcast %cst_26 : f32 to vector<2x1xf32>
    %46 = arith.addf %42, %45 : vector<2x1xf32>
    %47 = math.rsqrt %46 : vector<2x1xf32>
    %48 = vector.broadcast %47 : vector<2x1xf32> to vector<2x256xf32>
    %49 = arith.mulf %44, %48 : vector<2x256xf32>
    %50 = vector.broadcast %30 : vector<1x256xf32> to vector<2x256xf32>
    %51 = arith.mulf %49, %50 : vector<2x256xf32>
    %52 = vector.broadcast %31 : vector<1x256xf32> to vector<2x256xf32>
    %53 = arith.addf %51, %52 : vector<2x256xf32>
    %cst_27 = arith.constant 0.000000e+00 : f32
    %54 = vector.broadcast %cst_27 : f32 to vector<2x256xf32>
    %55 = arith.cmpf ogt, %53, %54 : vector<2x256xf32>
    %cst_28 = arith.constant 0.000000e+00 : f32
    %56 = vector.broadcast %cst_28 : f32 to vector<2x256xf32>
    %57 = arith.minimumf %53, %56 : vector<2x256xf32>
    %58 = math.exp %57 : vector<2x256xf32>
    %cst_29 = arith.constant 1.000000e+00 : f32
    %59 = vector.broadcast %cst_29 : f32 to vector<2x256xf32>
    %60 = arith.subf %58, %59 : vector<2x256xf32>
    %61 = arith.select %55, %53, %60 : vector<2x256xi1>, vector<2x256xf32>
    %c0_30 = arith.constant 0 : index
    %c0_31 = arith.constant 0 : index
    %62 = vector.load %arg1[%c0_30, %c0_31] : memref<2x2xf32, #tpu.memory_space<vmem>>, vector<2x2xf32>
    %63 = vector.extract_strided_slice %62 {offsets = [0, 0], sizes = [2, 1], strides = [1, 1]} : vector<2x2xf32> to vector<2x1xf32>
    %c0_32 = arith.constant 0 : index
    %c2432 = arith.constant 2432 : index
    %64 = vector.load %arg9[%c0_32, %c2432] : memref<1x4608xf32, #tpu.memory_space<vmem>>, vector<1x256xf32>
    %65 = vector.broadcast %63 : vector<2x1xf32> to vector<2x256xf32>
    %66 = vector.broadcast %64 : vector<1x256xf32> to vector<2x256xf32>
    %67 = arith.mulf %65, %66 : vector<2x256xf32>
    %68 = vector.extract_strided_slice %62 {offsets = [0, 1], sizes = [2, 1], strides = [1, 1]} : vector<2x2xf32> to vector<2x1xf32>
    %c0_33 = arith.constant 0 : index
    %c2688 = arith.constant 2688 : index
    %69 = vector.load %arg9[%c0_33, %c2688] : memref<1x4608xf32, #tpu.memory_space<vmem>>, vector<1x256xf32>
    %70 = vector.broadcast %68 : vector<2x1xf32> to vector<2x256xf32>
    %71 = vector.broadcast %69 : vector<1x256xf32> to vector<2x256xf32>
    %72 = arith.mulf %70, %71 : vector<2x256xf32>
    %73 = arith.addf %67, %72 : vector<2x256xf32>
    %c0_34 = arith.constant 0 : index
    %c2944 = arith.constant 2944 : index
    %74 = vector.load %arg9[%c0_34, %c2944] : memref<1x4608xf32, #tpu.memory_space<vmem>>, vector<1x256xf32>
    %75 = vector.broadcast %74 : vector<1x256xf32> to vector<2x256xf32>
    %76 = arith.addf %73, %75 : vector<2x256xf32>
    %c0_35 = arith.constant 0 : index
    %c3200 = arith.constant 3200 : index
    %77 = vector.load %arg9[%c0_35, %c3200] : memref<1x4608xf32, #tpu.memory_space<vmem>>, vector<1x256xf32>
    %c0_36 = arith.constant 0 : index
    %c3456 = arith.constant 3456 : index
    %78 = vector.load %arg9[%c0_36, %c3456] : memref<1x4608xf32, #tpu.memory_space<vmem>>, vector<1x256xf32>
    %cst_37 = arith.constant dense<0.000000e+00> : vector<2xf32>
    %79 = vector.multi_reduction <add>, %76, %cst_37 [1] : vector<2x256xf32> to vector<2xf32>
    %80 = vector.shape_cast %79 : vector<2xf32> to vector<2x1xf32>
    %cst_38 = arith.constant 2.560000e+02 : f32
    %81 = vector.broadcast %cst_38 : f32 to vector<2x1xf32>
    %82 = arith.divf %80, %81 : vector<2x1xf32>
    %83 = vector.broadcast %82 : vector<2x1xf32> to vector<2x256xf32>
    %84 = arith.subf %76, %83 : vector<2x256xf32>
    %85 = arith.mulf %84, %84 : vector<2x256xf32>
    %cst_39 = arith.constant dense<0.000000e+00> : vector<2xf32>
    %86 = vector.multi_reduction <add>, %85, %cst_39 [1] : vector<2x256xf32> to vector<2xf32>
    %87 = vector.shape_cast %86 : vector<2xf32> to vector<2x1xf32>
    %cst_40 = arith.constant 2.560000e+02 : f32
    %88 = vector.broadcast %cst_40 : f32 to vector<2x1xf32>
    %89 = arith.divf %87, %88 : vector<2x1xf32>
    %90 = vector.broadcast %82 : vector<2x1xf32> to vector<2x256xf32>
    %91 = arith.subf %76, %90 : vector<2x256xf32>
    %cst_41 = arith.constant 9.99999974E-6 : f32
    %92 = vector.broadcast %cst_41 : f32 to vector<2x1xf32>
    %93 = arith.addf %89, %92 : vector<2x1xf32>
    %94 = math.rsqrt %93 : vector<2x1xf32>
    %95 = vector.broadcast %94 : vector<2x1xf32> to vector<2x256xf32>
    %96 = arith.mulf %91, %95 : vector<2x256xf32>
    %97 = vector.broadcast %77 : vector<1x256xf32> to vector<2x256xf32>
    %98 = arith.mulf %96, %97 : vector<2x256xf32>
    %99 = vector.broadcast %78 : vector<1x256xf32> to vector<2x256xf32>
    %100 = arith.addf %98, %99 : vector<2x256xf32>
    %cst_42 = arith.constant 0.000000e+00 : f32
    %101 = vector.broadcast %cst_42 : f32 to vector<2x256xf32>
    %102 = arith.cmpf ogt, %100, %101 : vector<2x256xf32>
    %cst_43 = arith.constant 0.000000e+00 : f32
    %103 = vector.broadcast %cst_43 : f32 to vector<2x256xf32>
    %104 = arith.minimumf %100, %103 : vector<2x256xf32>
    %105 = math.exp %104 : vector<2x256xf32>
    %cst_44 = arith.constant 1.000000e+00 : f32
    %106 = vector.broadcast %cst_44 : f32 to vector<2x256xf32>
    %107 = arith.subf %105, %106 : vector<2x256xf32>
    %108 = arith.select %102, %100, %107 : vector<2x256xi1>, vector<2x256xf32>
    %109 = arith.truncf %61 : vector<2x256xf32> to vector<2x256xbf16>
    %c0_45 = arith.constant 0 : index
    %c0_46 = arith.constant 0 : index
    %110 = vector.load %arg6[%c0_45, %c0_46] : memref<512x64xbf16, #tpu.memory_space<vmem>>, vector<256x64xbf16>
    %cst_47 = arith.constant dense<0.000000e+00> : vector<2x64xf32>
    %111 = tpu.matmul %109, %110, %cst_47 {dimension_numbers = #tpu.dot_dimension_numbers<[1], [0], [0], [1], [0, 0, 1, 1], [], []>} : vector<2x256xbf16>, vector<256x64xbf16>, vector<2x64xf32> -> vector<2x64xf32>
    %112 = arith.truncf %108 : vector<2x256xf32> to vector<2x256xbf16>
    %c256 = arith.constant 256 : index
    %c0_48 = arith.constant 0 : index
    %113 = vector.load %arg6[%c256, %c0_48] : memref<512x64xbf16, #tpu.memory_space<vmem>>, vector<256x64xbf16>
    %cst_49 = arith.constant dense<0.000000e+00> : vector<2x64xf32>
    %114 = tpu.matmul %112, %113, %cst_49 {dimension_numbers = #tpu.dot_dimension_numbers<[1], [0], [0], [1], [0, 0, 1, 1], [], []>} : vector<2x256xbf16>, vector<256x64xbf16>, vector<2x64xf32> -> vector<2x64xf32>
    %115 = arith.addf %111, %114 : vector<2x64xf32>
    %c0_50 = arith.constant 0 : index
    %c3712 = arith.constant 3712 : index
    %116 = vector.load %arg9[%c0_50, %c3712] : memref<1x4608xf32, #tpu.memory_space<vmem>>, vector<1x64xf32>
    %117 = vector.broadcast %116 : vector<1x64xf32> to vector<2x64xf32>
    %118 = arith.addf %115, %117 : vector<2x64xf32>
    %c0_51 = arith.constant 0 : index
    %c3840 = arith.constant 3840 : index
    %119 = vector.load %arg9[%c0_51, %c3840] : memref<1x4608xf32, #tpu.memory_space<vmem>>, vector<1x64xf32>
    %c0_52 = arith.constant 0 : index
    %c3968 = arith.constant 3968 : index
    %120 = vector.load %arg9[%c0_52, %c3968] : memref<1x4608xf32, #tpu.memory_space<vmem>>, vector<1x64xf32>
    %cst_53 = arith.constant dense<0.000000e+00> : vector<2xf32>
    %121 = vector.multi_reduction <add>, %118, %cst_53 [1] : vector<2x64xf32> to vector<2xf32>
    %122 = vector.shape_cast %121 : vector<2xf32> to vector<2x1xf32>
    %cst_54 = arith.constant 6.400000e+01 : f32
    %123 = vector.broadcast %cst_54 : f32 to vector<2x1xf32>
    %124 = arith.divf %122, %123 : vector<2x1xf32>
    %125 = vector.broadcast %124 : vector<2x1xf32> to vector<2x64xf32>
    %126 = arith.subf %118, %125 : vector<2x64xf32>
    %127 = arith.mulf %126, %126 : vector<2x64xf32>
    %cst_55 = arith.constant dense<0.000000e+00> : vector<2xf32>
    %128 = vector.multi_reduction <add>, %127, %cst_55 [1] : vector<2x64xf32> to vector<2xf32>
    %129 = vector.shape_cast %128 : vector<2xf32> to vector<2x1xf32>
    %cst_56 = arith.constant 6.400000e+01 : f32
    %130 = vector.broadcast %cst_56 : f32 to vector<2x1xf32>
    %131 = arith.divf %129, %130 : vector<2x1xf32>
    %132 = vector.broadcast %124 : vector<2x1xf32> to vector<2x64xf32>
    %133 = arith.subf %118, %132 : vector<2x64xf32>
    %cst_57 = arith.constant 9.99999974E-6 : f32
    %134 = vector.broadcast %cst_57 : f32 to vector<2x1xf32>
    %135 = arith.addf %131, %134 : vector<2x1xf32>
    %136 = math.rsqrt %135 : vector<2x1xf32>
    %137 = vector.broadcast %136 : vector<2x1xf32> to vector<2x64xf32>
    %138 = arith.mulf %133, %137 : vector<2x64xf32>
    %139 = vector.broadcast %119 : vector<1x64xf32> to vector<2x64xf32>
    %140 = arith.mulf %138, %139 : vector<2x64xf32>
    %141 = vector.broadcast %120 : vector<1x64xf32> to vector<2x64xf32>
    %142 = arith.addf %140, %141 : vector<2x64xf32>
    %cst_58 = arith.constant 0.000000e+00 : f32
    %143 = vector.broadcast %cst_58 : f32 to vector<2x64xf32>
    %144 = arith.cmpf ogt, %142, %143 : vector<2x64xf32>
    %cst_59 = arith.constant 0.000000e+00 : f32
    %145 = vector.broadcast %cst_59 : f32 to vector<2x64xf32>
    %146 = arith.minimumf %142, %145 : vector<2x64xf32>
    %147 = math.exp %146 : vector<2x64xf32>
    %cst_60 = arith.constant 1.000000e+00 : f32
    %148 = vector.broadcast %cst_60 : f32 to vector<2x64xf32>
    %149 = arith.subf %147, %148 : vector<2x64xf32>
    %150 = arith.select %144, %142, %149 : vector<2x64xi1>, vector<2x64xf32>
    %151 = arith.truncf %150 : vector<2x64xf32> to vector<2x64xbf16>
    %c0_61 = arith.constant 0 : index
    %c0_62 = arith.constant 0 : index
    %152 = vector.load %arg7[%c0_61, %c0_62] : memref<64x64xbf16, #tpu.memory_space<vmem>>, vector<64x64xbf16>
    %cst_63 = arith.constant dense<0.000000e+00> : vector<2x64xf32>
    %153 = tpu.matmul %151, %152, %cst_63 {dimension_numbers = #tpu.dot_dimension_numbers<[1], [0], [0], [1], [0, 0, 1, 1], [], []>} : vector<2x64xbf16>, vector<64x64xbf16>, vector<2x64xf32> -> vector<2x64xf32>
    %c0_64 = arith.constant 0 : index
    %c4096 = arith.constant 4096 : index
    %154 = vector.load %arg9[%c0_64, %c4096] : memref<1x4608xf32, #tpu.memory_space<vmem>>, vector<1x64xf32>
    %155 = vector.broadcast %154 : vector<1x64xf32> to vector<2x64xf32>
    %156 = arith.addf %153, %155 : vector<2x64xf32>
    %c0_65 = arith.constant 0 : index
    %c4224 = arith.constant 4224 : index
    %157 = vector.load %arg9[%c0_65, %c4224] : memref<1x4608xf32, #tpu.memory_space<vmem>>, vector<1x64xf32>
    %c0_66 = arith.constant 0 : index
    %c4352 = arith.constant 4352 : index
    %158 = vector.load %arg9[%c0_66, %c4352] : memref<1x4608xf32, #tpu.memory_space<vmem>>, vector<1x64xf32>
    %cst_67 = arith.constant dense<0.000000e+00> : vector<2xf32>
    %159 = vector.multi_reduction <add>, %156, %cst_67 [1] : vector<2x64xf32> to vector<2xf32>
    %160 = vector.shape_cast %159 : vector<2xf32> to vector<2x1xf32>
    %cst_68 = arith.constant 6.400000e+01 : f32
    %161 = vector.broadcast %cst_68 : f32 to vector<2x1xf32>
    %162 = arith.divf %160, %161 : vector<2x1xf32>
    %163 = vector.broadcast %162 : vector<2x1xf32> to vector<2x64xf32>
    %164 = arith.subf %156, %163 : vector<2x64xf32>
    %165 = arith.mulf %164, %164 : vector<2x64xf32>
    %cst_69 = arith.constant dense<0.000000e+00> : vector<2xf32>
    %166 = vector.multi_reduction <add>, %165, %cst_69 [1] : vector<2x64xf32> to vector<2xf32>
    %167 = vector.shape_cast %166 : vector<2xf32> to vector<2x1xf32>
    %cst_70 = arith.constant 6.400000e+01 : f32
    %168 = vector.broadcast %cst_70 : f32 to vector<2x1xf32>
    %169 = arith.divf %167, %168 : vector<2x1xf32>
    %170 = vector.broadcast %162 : vector<2x1xf32> to vector<2x64xf32>
    %171 = arith.subf %156, %170 : vector<2x64xf32>
    %cst_71 = arith.constant 9.99999974E-6 : f32
    %172 = vector.broadcast %cst_71 : f32 to vector<2x1xf32>
    %173 = arith.addf %169, %172 : vector<2x1xf32>
    %174 = math.rsqrt %173 : vector<2x1xf32>
    %175 = vector.broadcast %174 : vector<2x1xf32> to vector<2x64xf32>
    %176 = arith.mulf %171, %175 : vector<2x64xf32>
    %177 = vector.broadcast %157 : vector<1x64xf32> to vector<2x64xf32>
    %178 = arith.mulf %176, %177 : vector<2x64xf32>
    %179 = vector.broadcast %158 : vector<1x64xf32> to vector<2x64xf32>
    %180 = arith.addf %178, %179 : vector<2x64xf32>
    %cst_72 = arith.constant 0.000000e+00 : f32
    %181 = vector.broadcast %cst_72 : f32 to vector<2x64xf32>
    %182 = arith.cmpf ogt, %180, %181 : vector<2x64xf32>
    %cst_73 = arith.constant 0.000000e+00 : f32
    %183 = vector.broadcast %cst_73 : f32 to vector<2x64xf32>
    %184 = arith.minimumf %180, %183 : vector<2x64xf32>
    %185 = math.exp %184 : vector<2x64xf32>
    %cst_74 = arith.constant 1.000000e+00 : f32
    %186 = vector.broadcast %cst_74 : f32 to vector<2x64xf32>
    %187 = arith.subf %185, %186 : vector<2x64xf32>
    %188 = arith.select %182, %180, %187 : vector<2x64xi1>, vector<2x64xf32>
    %189 = arith.truncf %188 : vector<2x64xf32> to vector<2x64xbf16>
    %c0_75 = arith.constant 0 : index
    %c0_76 = arith.constant 0 : index
    %190 = vector.load %arg8[%c0_75, %c0_76] : memref<64x128xbf16, #tpu.memory_space<vmem>>, vector<64x128xbf16>
    %cst_77 = arith.constant dense<0.000000e+00> : vector<2x128xf32>
    %191 = tpu.matmul %189, %190, %cst_77 {dimension_numbers = #tpu.dot_dimension_numbers<[1], [0], [0], [1], [0, 0, 1, 1], [], []>} : vector<2x64xbf16>, vector<64x128xbf16>, vector<2x128xf32> -> vector<2x128xf32>
    %c0_78 = arith.constant 0 : index
    %c4480 = arith.constant 4480 : index
    %192 = vector.load %arg9[%c0_78, %c4480] : memref<1x4608xf32, #tpu.memory_space<vmem>>, vector<1x128xf32>
    %193 = vector.broadcast %192 : vector<1x128xf32> to vector<2x128xf32>
    %194 = arith.addf %191, %193 : vector<2x128xf32>
    %c0_79 = arith.constant 0 : index
    %c0_80 = arith.constant 0 : index
    %195 = vector.load %arg10[%c0_79, %c0_80] : memref<2x128xf32, #tpu.memory_space<vmem>>, vector<2x128xf32>
    tpu.vector_store %arg10[%c0_79, %c0_80], %194 {strides = array<i32>} : memref<2x128xf32, #tpu.memory_space<vmem>>, vector<2x128xf32>,
    return
  }
}

</mosaic_0001>

<bundles_post_ra>
// kernel: critic_forward.1
= control target key start
LH: loop header
LB: loop body
LE: loop exit
PB: predicated region body
PF: predicated region fallthrough
CT: control target
= control target key end

     0   :  { %15 = vsyncpa [#allocation3], 0  ;;  %s9371_s0 = inlined_call_operand.vmem [shape: bf16[2,1024], index: 0, kind: input, shape index: {}]   ;;  %s9372_s1 = inlined_call_operand.hbm [shape: f32[2,2], index: 1, kind: input, shape index: {}]   ;;  %s9373_s2 = inlined_call_operand.hbm [shape: bf16[1024,1024], index: 2, kind: input, shape index: {}]   ;;  %s9374_s3 = inlined_call_operand.hbm [shape: bf16[1024,512], index: 3, kind: input, shape index: {}]   ;;  %s9375_s4 = inlined_call_operand.vmem [shape: bf16[512,64], index: 4, kind: input, shape index: {}]   ;;  %s9376_s5 = inlined_call_operand.hbm [shape: bf16[64,256], index: 5, kind: input, shape index: {}]   ;;  %s9377_s6 = inlined_call_operand.vmem [shape: bf16[512,64], index: 6, kind: input, shape index: {}]   ;;  %s9378_s7 = inlined_call_operand.hbm [shape: bf16[64,64], index: 7, kind: input, shape index: {}]   ;;  %s9379_s8 = inlined_call_operand.hbm [shape: bf16[64,128], index: 8, kind: input, shape index: {}]   ;;  %s9380_s9 = inlined_call_operand.hbm [shape: f32[1,4608], index: 9, kind: input, shape index: {}]   ;;  %s9381_s10 = inlined_call_operand.vmem [shape: f32[2,128], index: 10, kind: output, shape index: {}]  }
   0x1   :  { %16 = vsyncpa [#allocation5], 0 }
   0x2   :  { %17 = vsyncpa [#allocation8], 0 }
   0x3   :  { %18 = vsyncpa [#allocation11], 0  ;;  %s8832_s13 = smov [#allocation4]   ;;  %s8670_s17 = scalar_lea.hbm %s9373_s2, 65536 }
   0x4   :  { %s36_s14 = sshll.u32 %s8832_s13, 4  ;;  %p8671_p0 = scmp.ne.s32.totalorder %s9373_s2, %s8670_s17  ;;  %s37_s14 = int_to_ptr.vmem [resolvable:$true] %s36_s14 }
   0x5   :  { %p8674_p1 = scmp.lt.u32.totalorder %s8670_s17, %s9373_s2 }
   0x7   :  { %p8676_p2 = pnand %p8674_p1, %p8671_p0 }
   0x9   :  { %8679 = shalt.err (!%p8676_p2)
}
   0xa   :  { %s8680_s22 = scalar_lea.vmem %s37_s14, 65536  ;;  %p8685_p4 = scmp.lt.s32.totalorder %s37_s14, %s37_s14 }
   0xb   :  { %p8681_p3 = scmp.ne.s32.totalorder %s37_s14, %s8680_s22  ;;  %p8686_p5 = scmp.lt.s32.totalorder %s8680_s22, %s8680_s22 }
   0xd   :  { %p8687_p6 = por %p8686_p5, %p8685_p4 }
   0xf   :  { %p8688_p7 = pnand %p8687_p6, %p8681_p3 }
  0x11   :  { %8691 = shalt.err (!%p8688_p7)
}
  0x12   :  { %s8833_s23 = smov 512   ;;  %s8834_s24 = smov 32  }
  0x13   :  { %42 = dma.hbm_to_vmem [thread:$0]  %s9373_s2, 65536, %s37_s14, [#allocation5], %s8833_s23, %s8833_s23, %s8834_s24  }
  0x14   :  { %s8835_s27 = smov [#allocation7]   ;;  %s8692_s11 = scalar_lea.hbm %s9376_s5, 1024 }
  0x15   :  { %s62_s28 = sshll.u32 %s8835_s27, 4  ;;  %p8693_p8 = scmp.ne.s32.totalorder %s9376_s5, %s8692_s11  ;;  %s63_s28 = int_to_ptr.vmem [resolvable:$true] %s62_s28 }
  0x16   :  { %p8696_p9 = scmp.lt.u32.totalorder %s8692_s11, %s9376_s5 }
  0x18   :  { %p8698_p10 = pnand %p8696_p9, %p8693_p8 }
  0x1a   :  { %8701 = shalt.err (!%p8698_p10)
}
  0x1b   :  { %s8702_s17 = scalar_lea.vmem %s63_s28, 1024  ;;  %p8707_p12 = scmp.lt.s32.totalorder %s63_s28, %s63_s28 }
  0x1c   :  { %p8703_p11 = scmp.ne.s32.totalorder %s63_s28, %s8702_s17  ;;  %p8708_p13 = scmp.lt.s32.totalorder %s8702_s17, %s8702_s17 }
  0x1e   :  { %p8709_p0 = por %p8708_p13, %p8707_p12 }
  0x20   :  { %p8710_p1 = pnand %p8709_p0, %p8703_p11 }
  0x22   :  { %8713 = shalt.err (!%p8710_p1)
}
  0x23   :  { %s8836_s2 = smov 128   ;;  %s8837_s14 = smov 8  }
  0x24   :  { %68 = dma.hbm_to_vmem [thread:$0]  %s9376_s5, 1024, %s63_s28, [#allocation8], %s8836_s2, %s8836_s2, %s8837_s14  }
  0x25   :  { %s8838_s20 = smov [#allocation10]   ;;  %s8839_s22 = smov [#allocation2]  }
  0x26   :  { %s88_s21 = sshll.u32 %s8838_s20, 4  ;;  %s27_s23 = sshll.u32 %s8839_s22, 4  ;;  %s89_s21 = int_to_ptr.vmem [resolvable:$true] %s88_s21  ;;  %s28_s23 = int_to_ptr.vmem [resolvable:$true] %s27_s23 }
  0x27   :  { %s8714_s26 = scalar_lea.hbm %s9379_s8, 512 }
  0x28   :  { %p8715_p2 = scmp.ne.s32.totalorder %s9379_s8, %s8714_s26  ;;  %p8718_p3 = scmp.lt.u32.totalorder %s8714_s26, %s9379_s8 }
  0x2a   :  { %p8720_p4 = pnand %p8718_p3, %p8715_p2 }
  0x2c   :  { %8723 = shalt.err (!%p8720_p4)
}
  0x2d   :  { %s8724_s5 = scalar_lea.vmem %s89_s21, 512  ;;  %p8729_p6 = scmp.lt.s32.totalorder %s89_s21, %s89_s21 }
  0x2e   :  { %p8725_p5 = scmp.ne.s32.totalorder %s89_s21, %s8724_s5  ;;  %p8730_p7 = scmp.lt.s32.totalorder %s8724_s5, %s8724_s5 }
  0x30   :  { %p8731_p8 = por %p8730_p7, %p8729_p6 }
  0x32   :  { %p8732_p9 = pnand %p8731_p8, %p8725_p5 }
  0x34   :  { %8735 = shalt.err (!%p8732_p9)
}
  0x35   :  { %s8840_s28 = smov 64   ;;  %s8841_s12 = smov 4  }
  0x36   :  { %94 = dma.hbm_to_vmem [thread:$0]  %s9379_s8, 512, %s89_s21, [#allocation11], %s8840_s28, %s8840_s28, %s8841_s12  }
  0x37   :  { %s8736_s2 = scalar_lea.hbm %s9372_s1, 32 }
  0x38   :  { %p8737_p10 = scmp.ne.s32.totalorder %s9372_s1, %s8736_s2  ;;  %p8740_p11 = scmp.lt.u32.totalorder %s8736_s2, %s9372_s1 }
  0x3a   :  { %p8742_p12 = pnand %p8740_p11, %p8737_p10 }
  0x3c   :  { %8745 = shalt.err (!%p8742_p12)
}
  0x3d   :  { %s8746_s22 = scalar_lea.vmem %s28_s23, 32  ;;  %p8751_p0 = scmp.lt.s32.totalorder %s28_s23, %s28_s23 }
  0x3e   :  { %p8747_p13 = scmp.ne.s32.totalorder %s28_s23, %s8746_s22  ;;  %p8752_p1 = scmp.lt.s32.totalorder %s8746_s22, %s8746_s22 }
  0x40   :  { %p8753_p2 = por %p8752_p1, %p8751_p0 }
  0x42   :  { %p8754_p3 = pnand %p8753_p2, %p8747_p13 }
  0x44   :  { %8757 = shalt.err (!%p8754_p3)
}
  0x45   :  { %30 = dma.hbm_to_vmem [thread:$0]  %s9372_s1, 32, %s28_s23, [#allocation3]  }
  0x46   :  { %s8842_s24 = smov [#allocation6]   ;;  %s8758_s29 = scalar_lea.hbm %s9374_s3, 32768 }
  0x47   :  { %s48_s25 = sshll.u32 %s8842_s24, 4  ;;  %p8759_p4 = scmp.ne.s32.totalorder %s9374_s3, %s8758_s29  ;;  %s49_s25 = int_to_ptr.vmem [resolvable:$true] %s48_s25 }
  0x48   :  { %p8762_p5 = scmp.lt.u32.totalorder %s8758_s29, %s9374_s3 }
  0x4a   :  { %p8764_p6 = pnand %p8762_p5, %p8759_p4 }
  0x4c   :  { %8767 = shalt.err (!%p8764_p6)
}
  0x4d   :  { %s8768_s15 = scalar_lea.vmem %s49_s25, 32768  ;;  %p8773_p8 = scmp.lt.s32.totalorder %s49_s25, %s49_s25 }
  0x4e   :  { %p8769_p7 = scmp.ne.s32.totalorder %s49_s25, %s8768_s15  ;;  %p8774_p9 = scmp.lt.s32.totalorder %s8768_s15, %s8768_s15 }
  0x50   :  { %p8775_p10 = por %p8774_p9, %p8773_p8 }
  0x52   :  { %p8776_p11 = pnand %p8775_p10, %p8769_p7 }
  0x54   :  { %8779 = shalt.err (!%p8776_p11)
}
  0x55   :  { %s8843_s1 = smov 256   ;;  %s8844_s23 = smov 16  }
  0x56   :  { %54 = dma.hbm_to_vmem [thread:$0]  %s9374_s3, 32768, %s49_s25, [#allocation5], %s8843_s1, %s8843_s1, %s8844_s23  }
  0x57   :  { %s8845_s2 = smov [#allocation9]   ;;  %s8846_s18 = smov [#allocation12]  }
  0x58   :  { %s76_s14 = sshll.u32 %s8845_s2, 4  ;;  %s101_s19 = sshll.u32 %s8846_s18, 4  ;;  %s77_s14 = int_to_ptr.vmem [resolvable:$true] %s76_s14  ;;  %s102_s19 = int_to_ptr.vmem [resolvable:$true] %s101_s19 }
  0x59   :  { %s8780_s8 = scalar_lea.hbm %s9378_s7, 512 }
  0x5a   :  { %p8781_p12 = scmp.ne.s32.totalorder %s9378_s7, %s8780_s8  ;;  %p8784_p13 = scmp.lt.u32.totalorder %s8780_s8, %s9378_s7 }
  0x5c   :  { %p8786_p0 = pnand %p8784_p13, %p8781_p12 }
  0x5e   :  { %8789 = shalt.err (!%p8786_p0)
}
  0x5f   :  { %s8790_s3 = scalar_lea.vmem %s77_s14, 512  ;;  %p8795_p2 = scmp.lt.s32.totalorder %s77_s14, %s77_s14 }
  0x60   :  { %p8791_p1 = scmp.ne.s32.totalorder %s77_s14, %s8790_s3  ;;  %p8796_p3 = scmp.lt.s32.totalorder %s8790_s3, %s8790_s3 }
  0x62   :  { %p8797_p4 = por %p8796_p3, %p8795_p2 }
  0x64   :  { %p8798_p5 = pnand %p8797_p4, %p8791_p1 }
  0x66   :  { %8801 = shalt.err (!%p8798_p5)
}
  0x67   :  { %82 = dma.hbm_to_vmem [thread:$0]  %s9378_s7, 512, %s77_s14, [#allocation8], %s8840_s28, %s8840_s28, %s8841_s12  }
  0x68   :  { %s8802_s5 = scalar_lea.hbm %s9380_s9, 576 }
  0x69   :  { %p8803_p6 = scmp.ne.s32.totalorder %s9380_s9, %s8802_s5  ;;  %p8806_p7 = scmp.lt.u32.totalorder %s8802_s5, %s9380_s9 }
  0x6b   :  { %p8808_p8 = pnand %p8806_p7, %p8803_p6 }
  0x6d   :  { %8811 = shalt.err (!%p8808_p8)
}
  0x6e   :  { %s8812_s16 = scalar_lea.vmem %s102_s19, 576  ;;  %p8817_p10 = scmp.lt.s32.totalorder %s102_s19, %s102_s19 }
  0x6f   :  { %p8813_p9 = scmp.ne.s32.totalorder %s102_s19, %s8812_s16  ;;  %p8818_p11 = scmp.lt.s32.totalorder %s8812_s16, %s8812_s16 }
  0x71   :  { %p8819_p12 = por %p8818_p11, %p8817_p10 }
  0x73   :  { %p8820_p13 = pnand %p8819_p12, %p8813_p9 }
  0x75   :  { %8823 = shalt.err (!%p8820_p13)
}
  0x76   :  { %104 = dma.hbm_to_vmem [thread:$0]  %s9380_s9, 576, %s102_s19, [#allocation11]  }
  0x77   :  { %8824 = dma.done.wait [#allocation3], 32  }
  0x78   :  { %8825 = vsyncadd [#allocation3], 4294967264 }
  0x79   :  { %8826 = dma.done.wait [#allocation5], 98304  }
  0x7a   :  { %8827 = vsyncadd [#allocation5], 4294868992 }
  0x7b   :  { %8828 = dma.done.wait [#allocation8], 1536  }
  0x7c   :  { %8829 = vsyncadd [#allocation8], 4294965760 }
  0x7d   :  { %8830 = dma.done.wait [#allocation11], 1088  }
  0x7e   :  { %8831 = vsyncadd [#allocation11], 4294966208  ;;  %v128_v0 = vld [vmem:[#allocation4] sm:$0xff]  ;;  %v129_v2 = vld [vmem:[#allocation4 + $0x8] sm:$0xff]  ;;  %v642_v32 = vlaneseq  ;;  %v8847_v33 = vmov 1966171168  }
  0x7f   :  { %v132_v1 = vld [vmem:[#allocation4 + $0x20] sm:$0xff]  ;;  %v133_v4 = vld [vmem:[#allocation4 + $0x28] sm:$0xff]  ;;  %v685_v34 = vunpack.c.l.s4 %v8847_v33  ;;  %vm6271_vm0 = vcmask 523264   ;;  %vm6318_vm1 = vcmask 1041408   ;;  %vm6842_vm6 = vcmask 517120  }
  0x80   :  { %v7088_v3 = vcombine.high %v128_v0, %v132_v1  ;;  %v7087_v5 = vcombine.low %v128_v0, %v132_v1  ;;  %v136_v6 = vld [vmem:[#allocation4 + $0x40] sm:$0xff]  ;;  %v7090_v8 = vcombine.high %v129_v2, %v133_v4  ;;  %v7089_v9 = vcombine.low %v129_v2, %v133_v4  ;;  %v137_v11 = vld [vmem:[#allocation4 + $0x48] sm:$0xff] }
  0x81   :  { %v140_v7 = vld [vmem:[#allocation4 + $0x60] sm:$0xff]  ;;  %v141_v12 = vld [vmem:[#allocation4 + $0x68] sm:$0xff]  ;;  %v8997_v43 = vshrl.u32 %v642_v32, 7  ;;  %v686_v44 = vunpack.c.0.s8 %v685_v34  ;;  %vm8851_vm7 = vmmov 0  }
  0x82   :  { %v7096_v10 = vcombine.high %v136_v6, %v140_v7  ;;  %v144_v13 = vld [vmem:[#allocation4 + $0x80] sm:$0xff]  ;;  %3300 = vmatprep.subr.bf16.mxu0 %v7088_v3  ;;  %v7098_v14 = vcombine.high %v137_v11, %v141_v12  ;;  %v145_v16 = vld [vmem:[#allocation4 + $0x88] sm:$0xff]  ;;  %3464 = vmatprep.subr.bf16.mxu1 %v7090_v8  ;;  %v7095_v18 = vcombine.low %v136_v6, %v140_v7 }
  0x83   :  { %v148_v15 = vld [vmem:[#allocation4 + $0xa0] sm:$0xff]  ;;  %v149_v17 = vld [vmem:[#allocation4 + $0xa8] sm:$0xff]  ;;  %3301 = vmatpush1.bf16.msra.mxu0 %v7087_v5  ;;  %3465 = vmatpush1.bf16.msra.mxu1 %v7089_v9  ;;  %v7097_v19 = vcombine.low %v137_v11, %v141_v12  ;;  %v9000_v53 = vsub.s32 %v686_v44, %v8997_v43 }
  0x84   :  { %3302 = vmatprep.subr.bf16.mxu0 %v7096_v10  ;;  %v7104_v20 = vcombine.high %v144_v13, %v148_v15  ;;  %3466 = vmatprep.subr.bf16.mxu1 %v7098_v14  ;;  %v7106_v21 = vcombine.high %v145_v16, %v149_v17  ;;  %v152_v22 = vld [vmem:[#allocation4 + $0xc0] sm:$0xff]  ;;  %v153_v24 = vld [vmem:[#allocation4 + $0xc8] sm:$0xff]  ;;  %v7103_v26 = vcombine.low %v144_v13, %v148_v15 }
  0x85   :  { %v156_v23 = vld [vmem:[#allocation4 + $0xe0] sm:$0xff]  ;;  %v157_v25 = vld [vmem:[#allocation4 + $0xe8] sm:$0xff]  ;;  %v7105_v27 = vcombine.low %v145_v16, %v149_v17 }
  0x86   :  { %v7112_v28 = vcombine.high %v152_v22, %v156_v23  ;;  %v7114_v29 = vcombine.high %v153_v24, %v157_v25  ;;  %v160_v30 = vld [vmem:[#allocation4 + $0x100] sm:$0xff]  ;;  %v161_v35 = vld [vmem:[#allocation4 + $0x108] sm:$0xff]  ;;  %v7111_v37 = vcombine.low %v152_v22, %v156_v23  ;;  %v7113_v38 = vcombine.low %v153_v24, %v157_v25 }
  0x87   :  { %3303 = vmatpush1.bf16.msra.mxu0 %v7095_v18  ;;  %3467 = vmatpush1.bf16.msra.mxu1 %v7097_v19  ;;  %v164_v31 = vld [vmem:[#allocation4 + $0x120] sm:$0xff]  ;;  %v165_v36 = vld [vmem:[#allocation4 + $0x128] sm:$0xff] }
  0x88   :  { %3304 = vmatprep.subr.bf16.mxu0 %v7104_v20  ;;  %3468 = vmatprep.subr.bf16.mxu1 %v7106_v21  ;;  %v7120_v39 = vcombine.high %v160_v30, %v164_v31  ;;  %v7122_v40 = vcombine.high %v161_v35, %v165_v36  ;;  %v168_v41 = vld [vmem:[#allocation4 + $0x140] sm:$0xff]  ;;  %v169_v45 = vld [vmem:[#allocation4 + $0x148] sm:$0xff]  ;;  %v7119_v47 = vcombine.low %v160_v30, %v164_v31 }
  0x89   :  { %v172_v42 = vld [vmem:[#allocation4 + $0x160] sm:$0xff]  ;;  %v173_v46 = vld [vmem:[#allocation4 + $0x168] sm:$0xff]  ;;  %v7121_v48 = vcombine.low %v161_v35, %v165_v36 }
  0x8a   :  { %v7128_v49 = vcombine.high %v168_v41, %v172_v42  ;;  %v7130_v50 = vcombine.high %v169_v45, %v173_v46  ;;  %v176_v51 = vld [vmem:[#allocation4 + $0x180] sm:$0xff]  ;;  %v177_v54 = vld [vmem:[#allocation4 + $0x188] sm:$0xff]  ;;  %v7127_v56 = vcombine.low %v168_v41, %v172_v42  ;;  %v7129_v57 = vcombine.low %v169_v45, %v173_v46 }
  0x8b   :  { %3305 = vmatpush1.bf16.msra.mxu0 %v7103_v26  ;;  %3469 = vmatpush1.bf16.msra.mxu1 %v7105_v27  ;;  %v180_v52 = vld [vmem:[#allocation4 + $0x1a0] sm:$0xff]  ;;  %v181_v55 = vld [vmem:[#allocation4 + $0x1a8] sm:$0xff] }
  0x8c   :  { %3306 = vmatprep.subr.bf16.mxu0 %v7112_v28  ;;  %3470 = vmatprep.subr.bf16.mxu1 %v7114_v29  ;;  %v7136_v58 = vcombine.high %v176_v51, %v180_v52  ;;  %v9005_v59 = vld [vmem:[%s9371_s0] sm:$0xff]  ;;  %v7138_v60 = vcombine.high %v177_v54, %v181_v55  ;;  %v185_v0 = vld [vmem:[#allocation4 + $0x1c8] sm:$0xff]  ;;  %v7135_v2 = vcombine.low %v176_v51, %v180_v52 }
  0x8d   :  { %v184_v61 = vld [vmem:[#allocation4 + $0x1c0] sm:$0xff]  ;;  %v9009_v63 = vrot.slane %v9005_v59, %v9000_v53  ;;  %v189_v1 = vld [vmem:[#allocation4 + $0x1e8] sm:$0xff]  ;;  %v7137_v4 = vcombine.low %v177_v54, %v181_v55 }
  0x8e   :  { %v188_v62 = vld [vmem:[#allocation4 + $0x1e0] sm:$0xff]  ;;  %v7146_v6 = vcombine.high %v185_v0, %v189_v1  ;;  %v193_v10 = vld [vmem:[#allocation4 + $0x208] sm:$0xff]  ;;  %v7145_v13 = vcombine.low %v185_v0, %v189_v1 }
  0x8f   :  { %3307 = vmatpush1.bf16.msra.mxu0 %v7111_v37  ;;  %3471 = vmatpush1.bf16.msra.mxu1 %v7113_v38  ;;  %v698_v3 = vcombine.high %v9009_v63, %v9009_v63  ;;  %v7144_v5 = vcombine.high %v184_v61, %v188_v62  ;;  %v192_v7 = vld [vmem:[#allocation4 + $0x200] sm:$0xff]  ;;  %v197_v11 = vld [vmem:[#allocation4 + $0x228] sm:$0xff]  ;;  %v7143_v12 = vcombine.low %v184_v61, %v188_v62 }
  0x90   :  { %3308 = vmatprep.subr.bf16.mxu0 %v7120_v39  ;;  %3472 = vmatprep.subr.bf16.mxu1 %v7122_v40  ;;  %v196_v8 = vld [vmem:[#allocation4 + $0x220] sm:$0xff]  ;;  %v7154_v15 = vcombine.high %v193_v10, %v197_v11  ;;  %v201_v18 = vld [vmem:[#allocation4 + $0x248] sm:$0xff]  ;;  %v7153_v21 = vcombine.low %v193_v10, %v197_v11 }
  0x91   :  { %v9014_v9 = vrot.slane %v698_v3, %v9000_v53  ;;  %v7152_v14 = vcombine.high %v192_v7, %v196_v8  ;;  %v200_v16 = vld [vmem:[#allocation4 + $0x240] sm:$0xff]  ;;  %v205_v19 = vld [vmem:[#allocation4 + $0x268] sm:$0xff]  ;;  %v7151_v20 = vcombine.low %v192_v7, %v196_v8 }
  0x92   :  { %v204_v17 = vld [vmem:[#allocation4 + $0x260] sm:$0xff]  ;;  %v7162_v23 = vcombine.high %v201_v18, %v205_v19  ;;  %v209_v26 = vld [vmem:[#allocation4 + $0x288] sm:$0xff]  ;;  %v7161_v29 = vcombine.low %v201_v18, %v205_v19  ;;  %v683_v18 = vcombine.high %v9005_v59, %v9005_v59 }
  0x93   :  { %3309 = vmatpush1.bf16.msra.mxu0 %v7119_v47  ;;  %3473 = vmatpush1.bf16.msra.mxu1 %v7121_v48  ;;  %v7160_v22 = vcombine.high %v200_v16, %v204_v17  ;;  %v208_v24 = vld [vmem:[#allocation4 + $0x280] sm:$0xff]  ;;  %v213_v27 = vld [vmem:[#allocation4 + $0x2a8] sm:$0xff]  ;;  %v7159_v28 = vcombine.low %v200_v16, %v204_v17 }
  0x94   :  { %3310 = vmatprep.subr.bf16.mxu0 %v7128_v49  ;;  %3474 = vmatprep.subr.bf16.mxu1 %v7130_v50  ;;  %v212_v25 = vld [vmem:[#allocation4 + $0x2a0] sm:$0xff]  ;;  %v7170_v31 = vcombine.high %v209_v26, %v213_v27  ;;  %v217_v34 = vld [vmem:[#allocation4 + $0x2c8] sm:$0xff]  ;;  %v7169_v37 = vcombine.low %v209_v26, %v213_v27 }
  0x95   :  { %3332 = vmatprep.mubr.bf16.mxu0 %v9014_v9  ;;  %3496 = vmatprep.mubr.bf16.mxu1 %v9014_v9  ;;  %v7168_v30 = vcombine.high %v208_v24, %v212_v25  ;;  %v216_v32 = vld [vmem:[#allocation4 + $0x2c0] sm:$0xff]  ;;  %v221_v35 = vld [vmem:[#allocation4 + $0x2e8] sm:$0xff]  ;;  %v7167_v36 = vcombine.low %v208_v24, %v212_v25  ;;  %v697_v24 = vrot.slane %v683_v18, %v9000_v53 }
  0x96   :  { %v220_v33 = vld [vmem:[#allocation4 + $0x2e0] sm:$0xff]  ;;  %v7178_v39 = vcombine.high %v217_v34, %v221_v35  ;;  %v225_v42 = vld [vmem:[#allocation4 + $0x308] sm:$0xff]  ;;  %v7177_v46 = vcombine.low %v217_v34, %v221_v35  ;;  %v9023_v25 = vrot.slane %v9009_v63, %v9000_v53 }
  0x97   :  { %3311 = vmatpush1.bf16.msra.mxu0 %v7127_v56  ;;  %3475 = vmatpush1.bf16.msra.mxu1 %v7129_v57  ;;  %v7176_v38 = vcombine.high %v216_v32, %v220_v33  ;;  %v224_v40 = vld [vmem:[#allocation4 + $0x300] sm:$0xff]  ;;  %v229_v44 = vld [vmem:[#allocation4 + $0x328] sm:$0xff]  ;;  %v7175_v45 = vcombine.low %v216_v32, %v220_v33 }
  0x98   :  { %3312 = vmatprep.subr.bf16.mxu0 %v7136_v58  ;;  %3476 = vmatprep.subr.bf16.mxu1 %v7138_v60  ;;  %v228_v41 = vld [vmem:[#allocation4 + $0x320] sm:$0xff]  ;;  %v7186_v48 = vcombine.high %v225_v42, %v229_v44  ;;  %v233_v51 = vld [vmem:[#allocation4 + $0x348] sm:$0xff]  ;;  %v7185_v55 = vcombine.low %v225_v42, %v229_v44 }
  0x99   :  { %v7184_v47 = vcombine.high %v224_v40, %v228_v41  ;;  %v232_v49 = vld [vmem:[#allocation4 + $0x340] sm:$0xff]  ;;  %v237_v52 = vld [vmem:[#allocation4 + $0x368] sm:$0xff]  ;;  %v7183_v54 = vcombine.low %v224_v40, %v228_v41 }
  0x9a   :  { %v236_v50 = vld [vmem:[#allocation4 + $0x360] sm:$0xff]  ;;  %v7194_v57 = vcombine.high %v233_v51, %v237_v52  ;;  %v241_v61 = vld [vmem:[#allocation4 + $0x388] sm:$0xff]  ;;  %v7193_v1 = vcombine.low %v233_v51, %v237_v52 }
  0x9b   :  { %3313 = vmatpush1.bf16.msra.mxu0 %v7135_v2  ;;  %3477 = vmatpush1.bf16.msra.mxu1 %v7137_v4  ;;  %v7192_v56 = vcombine.high %v232_v49, %v236_v50  ;;  %v240_v58 = vld [vmem:[#allocation4 + $0x380] sm:$0xff]  ;;  %v245_v62 = vld [vmem:[#allocation4 + $0x3a8] sm:$0xff]  ;;  %v7191_v0 = vcombine.low %v232_v49, %v236_v50 }
  0x9c   :  { %3314 = vmatprep.subr.bf16.mxu0 %v7144_v5  ;;  %3478 = vmatprep.subr.bf16.mxu1 %v7146_v6  ;;  %v244_v60 = vld [vmem:[#allocation4 + $0x3a0] sm:$0xff]  ;;  %v7202_v3 = vcombine.high %v241_v61, %v245_v62  ;;  %v249_v6 = vld [vmem:[#allocation4 + $0x3c8] sm:$0xff]  ;;  %v7201_v10 = vcombine.low %v241_v61, %v245_v62 }
  0x9d   :  { %v7200_v2 = vcombine.high %v240_v58, %v244_v60  ;;  %v248_v4 = vld [vmem:[#allocation4 + $0x3c0] sm:$0xff]  ;;  %v253_v7 = vld [vmem:[#allocation4 + $0x3e8] sm:$0xff]  ;;  %v7199_v8 = vcombine.low %v240_v58, %v244_v60 }
  0x9e   :  { %v252_v5 = vld [vmem:[#allocation4 + $0x3e0] sm:$0xff]  ;;  %v261_v16 = vld [vmem:[#allocation4 + $0x428] sm:$0xff]  ;;  %v7209_v19 = vcombine.low %v249_v6, %v253_v7 }
  0x9f   :  { %3315 = vmatpush1.bf16.msra.mxu0 %v7143_v12  ;;  %3479 = vmatpush1.bf16.msra.mxu1 %v7145_v13  ;;  %v7208_v11 = vcombine.high %v248_v4, %v252_v5  ;;  %v7210_v12 = vcombine.high %v249_v6, %v253_v7  ;;  %v256_v13 = vld [vmem:[#allocation4 + $0x400] sm:$0xff]  ;;  %v7207_v17 = vcombine.low %v248_v4, %v252_v5  ;;  %v265_v26 = vld [vmem:[#allocation4 + $0x448] sm:$0xff] }
  0xa0   :  { %3316 = vmatprep.subr.bf16.mxu0 %v7152_v14  ;;  %3480 = vmatprep.subr.bf16.mxu1 %v7154_v15  ;;  %v260_v14 = vld [vmem:[#allocation4 + $0x420] sm:$0xff]  ;;  %v257_v15 = vld [vmem:[#allocation4 + $0x408] sm:$0xff] }
  0xa1   :  { %v269_v27 = vld [vmem:[#allocation4 + $0x468] sm:$0xff]  ;;  %v7217_v59 = vcombine.low %v257_v15, %v261_v16  ;;  %v276_v32 = vld [vmem:[#allocation4 + $0x4a0] sm:$0xff] }
  0xa2   :  { %v273_v33 = vld [vmem:[#allocation4 + $0x488] sm:$0xff]  ;;  %v7226_v34 = vcombine.high %v265_v26, %v269_v27  ;;  %v280_v41 = vld [vmem:[#allocation4 + $0x4c0] sm:$0xff] }
  0xa3   :  { %3317 = vmatpush1.bf16.msra.mxu0 %v7151_v20  ;;  %3481 = vmatpush1.bf16.msra.mxu1 %v7153_v21  ;;  %v7216_v20 = vcombine.high %v256_v13, %v260_v14  ;;  %v7218_v21 = vcombine.high %v257_v15, %v261_v16  ;;  %v277_v35 = vld [vmem:[#allocation4 + $0x4a8] sm:$0xff]  ;;  %v284_v42 = vld [vmem:[#allocation4 + $0x4e0] sm:$0xff] }
  0xa4   :  { %3318 = vmatprep.subr.bf16.mxu0 %v7160_v22  ;;  %3482 = vmatprep.subr.bf16.mxu1 %v7162_v23  ;;  %v264_v22 = vld [vmem:[#allocation4 + $0x440] sm:$0xff]  ;;  %v281_v44 = vld [vmem:[#allocation4 + $0x4c8] sm:$0xff] }
  0xa5   :  { %v268_v23 = vld [vmem:[#allocation4 + $0x460] sm:$0xff]  ;;  %v289_v51 = vld [vmem:[#allocation4 + $0x508] sm:$0xff] }
  0xa6   :  { %v288_v49 = vld [vmem:[#allocation4 + $0x500] sm:$0xff]  ;;  %v297_v61 = vld [vmem:[#allocation4 + $0x548] sm:$0xff] }
  0xa7   :  { %3319 = vmatpush1.bf16.msra.mxu0 %v7159_v28  ;;  %3483 = vmatpush1.bf16.msra.mxu1 %v7161_v29  ;;  %v7215_v28 = vcombine.low %v256_v13, %v260_v14  ;;  %v699_v29 = vcombine.high %v697_v24, %v697_v24  ;;  %v292_v50 = vld [vmem:[#allocation4 + $0x520] sm:$0xff]  ;;  %v305_v6 = vld [vmem:[#allocation4 + $0x588] sm:$0xff] }
  0xa8   :  { %3320 = vmatprep.subr.bf16.mxu0 %v7168_v30  ;;  %3484 = vmatprep.subr.bf16.mxu1 %v7170_v31  ;;  %v7224_v30 = vcombine.high %v264_v22, %v268_v23  ;;  %v272_v31 = vld [vmem:[#allocation4 + $0x480] sm:$0xff]  ;;  %v313_v15 = vld [vmem:[#allocation4 + $0x5c8] sm:$0xff] }
  0xa9   :  { %v9030_v63 = vrot.slane %v699_v29, %v9000_v53  ;;  %v7232_v40 = vcombine.high %v272_v31, %v276_v32  ;;  %v296_v58 = vld [vmem:[#allocation4 + $0x540] sm:$0xff] }
  0xaa   :  { %v300_v60 = vld [vmem:[#allocation4 + $0x560] sm:$0xff] }
  0xab   :  { %3321 = vmatpush1.bf16.msra.mxu0 %v7167_v36  ;;  %3485 = vmatpush1.bf16.msra.mxu1 %v7169_v37  ;;  %v9027_v36 = vcombine.high %v9014_v9, %v9014_v9  ;;  %v9033_v37 = vrot.slane %v697_v24, %v9000_v53  ;;  %v7231_v53 = vcombine.low %v272_v31, %v276_v32  ;;  %v304_v4 = vld [vmem:[#allocation4 + $0x580] sm:$0xff]  ;;  %v329_v31 = vld [vmem:[#allocation4 + $0x648] sm:$0xff] }
  0xac   :  { %3322 = vmatprep.subr.bf16.mxu0 %v7176_v38  ;;  %3486 = vmatprep.subr.bf16.mxu1 %v7178_v39  ;;  %v7223_v38 = vcombine.low %v264_v22, %v268_v23  ;;  %v7225_v39 = vcombine.low %v265_v26, %v269_v27  ;;  %v308_v5 = vld [vmem:[#allocation4 + $0x5a0] sm:$0xff]  ;;  %v321_v23 = vld [vmem:[#allocation4 + $0x608] sm:$0xff] }
  0xad   :  { %v312_v13 = vld [vmem:[#allocation4 + $0x5c0] sm:$0xff]  ;;  %v7263_v18 = vcombine.low %v304_v4, %v308_v5  ;;  %v325_v26 = vld [vmem:[#allocation4 + $0x628] sm:$0xff] }
  0xae   :  { %v316_v14 = vld [vmem:[#allocation4 + $0x5e0] sm:$0xff]  ;;  %v7282_v32 = vcombine.high %v321_v23, %v325_v26 }
  0xaf   :  { %3323 = vmatpush1.bf16.msra.mxu0 %v7175_v45  ;;  %3487 = vmatpush1.bf16.msra.mxu1 %v7177_v46  ;;  %v7234_v45 = vcombine.high %v273_v33, %v277_v35  ;;  %v285_v46 = vld [vmem:[#allocation4 + $0x4e8] sm:$0xff]  ;;  %v324_v22 = vld [vmem:[#allocation4 + $0x620] sm:$0xff]  ;;  %v7271_v27 = vcombine.low %v312_v13, %v316_v14 }
  0xb0   :  { %3324 = vmatprep.subr.bf16.mxu0 %v7184_v47  ;;  %3488 = vmatprep.subr.bf16.mxu1 %v7186_v48  ;;  %v7233_v47 = vcombine.low %v273_v33, %v277_v35  ;;  %v7240_v48 = vcombine.high %v280_v41, %v284_v42  ;;  %v7242_v52 = vcombine.high %v281_v44, %v285_v46  ;;  %v333_v33 = vld [vmem:[#allocation4 + $0x668] sm:$0xff] }
  0xb1   :  { %v7281_v35 = vcombine.low %v321_v23, %v325_v26  ;;  %v381_v23 = vld [vmem:[#allocation4 + $0x7e8] sm:$0xff] }
  0xb3   :  { %3325 = vmatpush1.bf16.msra.mxu0 %v7183_v54  ;;  %3489 = vmatpush1.bf16.msra.mxu1 %v7185_v55  ;;  %v293_v54 = vld [vmem:[#allocation4 + $0x528] sm:$0xff]  ;;  %v7239_v55 = vcombine.low %v280_v41, %v284_v42  ;;  %v7290_v42 = vcombine.high %v329_v31, %v333_v33 }
  0xb4   :  { %3326 = vmatprep.subr.bf16.mxu0 %v7192_v56  ;;  %3490 = vmatprep.subr.bf16.mxu1 %v7194_v57  ;;  %v7241_v56 = vcombine.low %v281_v44, %v285_v46  ;;  %v7248_v57 = vcombine.high %v288_v49, %v292_v50  ;;  %v7250_v62 = vcombine.high %v289_v51, %v293_v54  ;;  %v337_v41 = vld [vmem:[#allocation4 + $0x688] sm:$0xff] }
  0xb5   :  { %v341_v44 = vld [vmem:[#allocation4 + $0x6a8] sm:$0xff]  ;;  %v7289_v46 = vcombine.low %v329_v31, %v333_v33 }
  0xb6   :  { %v389_v31 = vld [vmem:[#allocation4 + $0x828] sm:$0xff] }
  0xb7   :  { %3327 = vmatpush1.bf16.msra.mxu0 %v7191_v0  ;;  %3491 = vmatpush1.bf16.msra.mxu1 %v7193_v1  ;;  %v301_v0 = vld [vmem:[#allocation4 + $0x568] sm:$0xff]  ;;  %v7247_v1 = vcombine.low %v288_v49, %v292_v50  ;;  %v7298_v50 = vcombine.high %v337_v41, %v341_v44 }
  0xb8   :  { %3328 = vmatprep.subr.bf16.mxu0 %v7200_v2  ;;  %3492 = vmatprep.subr.bf16.mxu1 %v7202_v3  ;;  %v7249_v2 = vcombine.low %v289_v51, %v293_v54  ;;  %v7256_v3 = vcombine.high %v296_v58, %v300_v60  ;;  %v7258_v7 = vcombine.high %v297_v61, %v301_v0  ;;  %v345_v49 = vld [vmem:[#allocation4 + $0x6c8] sm:$0xff] }
  0xb9   :  { %v349_v51 = vld [vmem:[#allocation4 + $0x6e8] sm:$0xff]  ;;  %v7297_v54 = vcombine.low %v337_v41, %v341_v44 }
  0xba   :  { %v397_v41 = vld [vmem:[#allocation4 + $0x868] sm:$0xff] }
  0xbb   :  { %3329 = vmatpush1.bf16.msra.mxu0 %v7199_v8  ;;  %3493 = vmatpush1.bf16.msra.mxu1 %v7201_v10  ;;  %v309_v8 = vld [vmem:[#allocation4 + $0x5a8] sm:$0xff]  ;;  %v7255_v10 = vcombine.low %v296_v58, %v300_v60  ;;  %v7306_v60 = vcombine.high %v345_v49, %v349_v51 }
  0xbc   :  { %3330 = vmatprep.subr.bf16.mxu0 %v7208_v11  ;;  %3494 = vmatprep.subr.bf16.mxu1 %v7210_v12  ;;  %v7257_v11 = vcombine.low %v297_v61, %v301_v0  ;;  %v7264_v12 = vcombine.high %v304_v4, %v308_v5  ;;  %v7266_v16 = vcombine.high %v305_v6, %v309_v8  ;;  %v353_v58 = vld [vmem:[#allocation4 + $0x708] sm:$0xff] }
  0xbd   :  { %v357_v61 = vld [vmem:[#allocation4 + $0x728] sm:$0xff]  ;;  %v7305_v0 = vcombine.low %v345_v49, %v349_v51 }
  0xbe   :  { %v361_v4 = vld [vmem:[#allocation4 + $0x748] sm:$0xff]  ;;  %v7314_v5 = vcombine.high %v353_v58, %v357_v61 }
  0xbf   :  { %3331 = vmatpush1.bf16.msra.mxu0 %v7207_v17  ;;  %3495 = vmatpush1.bf16.msra.mxu1 %v7209_v19  ;;  %v317_v17 = vld [vmem:[#allocation4 + $0x5e8] sm:$0xff]  ;;  %v7265_v19 = vcombine.low %v305_v6, %v309_v8  ;;  %v7313_v8 = vcombine.low %v353_v58, %v357_v61 }
  0xc0   :  { %3341 = vmatprep.subr.bf16.mxu0 %v7216_v20  ;;  %3505 = vmatprep.subr.bf16.mxu1 %v7218_v21  ;;  %v7272_v20 = vcombine.high %v312_v13, %v316_v14  ;;  %v320_v21 = vld [vmem:[#allocation4 + $0x600] sm:$0xff]  ;;  %v7274_v24 = vcombine.high %v313_v15, %v317_v17  ;;  %v365_v6 = vld [vmem:[#allocation4 + $0x768] sm:$0xff] }
  0xc1   :  { %v7280_v29 = vcombine.high %v320_v21, %v324_v22  ;;  %v369_v13 = vld [vmem:[#allocation4 + $0x788] sm:$0xff]  ;;  %v7322_v14 = vcombine.high %v361_v4, %v365_v6 }
  0xc2   :  { %3333 = vmatmul.mubr.bf16.vlgmr.msra.gmra.mrb[0].mxu0 %v9023_v25  ;;  %3497 = vmatmul.mubr.bf16.vlgmr.msra.gmra.mrb[0].mxu1 %v9023_v25 }
  0xc3   :  { %3342 = vmatpush1.bf16.msra.mxu0 %v7215_v28  ;;  %3506 = vmatpush1.bf16.msra.mxu1 %v7217_v59  ;;  %v7273_v28 = vcombine.low %v313_v15, %v317_v17  ;;  %v328_v59 = vld [vmem:[#allocation4 + $0x640] sm:$0xff]  ;;  %v373_v15 = vld [vmem:[#allocation4 + $0x7a8] sm:$0xff]  ;;  %v7321_v17 = vcombine.low %v361_v4, %v365_v6 }
  0xc4   :  { %3343 = vmatprep.subr.bf16.mxu0 %v7224_v30  ;;  %3507 = vmatprep.subr.bf16.mxu1 %v7226_v34  ;;  %v332_v30 = vld [vmem:[#allocation4 + $0x660] sm:$0xff]  ;;  %v7279_v34 = vcombine.low %v320_v21, %v324_v22  ;;  %v377_v21 = vld [vmem:[#allocation4 + $0x7c8] sm:$0xff]  ;;  %v7330_v22 = vcombine.high %v369_v13, %v373_v15  ;;  %v7329_v26 = vcombine.low %v369_v13, %v373_v15 }
  0xc5   :  { %3373 = vmatprep.mubr.bf16.mxu0 %v9027_v36  ;;  %3537 = vmatprep.mubr.bf16.mxu1 %v9027_v36  ;;  %v7337_v33 = vcombine.low %v377_v21, %v381_v23 }
  0xc7   :  { %3344 = vmatpush1.bf16.msra.mxu0 %v7223_v38  ;;  %3508 = vmatpush1.bf16.msra.mxu1 %v7225_v39  ;;  %v7288_v38 = vcombine.high %v328_v59, %v332_v30  ;;  %v336_v39 = vld [vmem:[#allocation4 + $0x680] sm:$0xff] }
  0xc8   :  { %3345 = vmatprep.subr.bf16.mxu0 %v7232_v40  ;;  %3509 = vmatprep.subr.bf16.mxu1 %v7234_v45  ;;  %v340_v40 = vld [vmem:[#allocation4 + $0x6a0] sm:$0xff]  ;;  %v7287_v45 = vcombine.low %v328_v59, %v332_v30  ;;  %v385_v59 = vld [vmem:[#allocation4 + $0x808] sm:$0xff]  ;;  %v7338_v30 = vcombine.high %v377_v21, %v381_v23 }
  0xcb   :  { %3346 = vmatpush1.bf16.msra.mxu0 %v7231_v53  ;;  %3510 = vmatpush1.bf16.msra.mxu1 %v7233_v47  ;;  %v7296_v53 = vcombine.high %v336_v39, %v340_v40  ;;  %v344_v47 = vld [vmem:[#allocation4 + $0x6c0] sm:$0xff] }
  0xcc   :  { %3347 = vmatprep.subr.bf16.mxu0 %v7240_v48  ;;  %3511 = vmatprep.subr.bf16.mxu1 %v7242_v52  ;;  %v348_v48 = vld [vmem:[#allocation4 + $0x6e0] sm:$0xff]  ;;  %v7295_v52 = vcombine.low %v336_v39, %v340_v40  ;;  %v393_v39 = vld [vmem:[#allocation4 + $0x848] sm:$0xff]  ;;  %v7346_v40 = vcombine.high %v385_v59, %v389_v31 }
  0xcd   :  { %v7354_v49 = vcombine.high %v393_v39, %v397_v41 }
  0xcf   :  { %3348 = vmatpush1.bf16.msra.mxu0 %v7239_v55  ;;  %3512 = vmatpush1.bf16.msra.mxu1 %v7241_v56  ;;  %v7304_v55 = vcombine.high %v344_v47, %v348_v48  ;;  %v352_v56 = vld [vmem:[#allocation4 + $0x700] sm:$0xff] }
  0xd0   :  { %3349 = vmatprep.subr.bf16.mxu0 %v7248_v57  ;;  %3513 = vmatprep.subr.bf16.mxu1 %v7250_v62  ;;  %v356_v57 = vld [vmem:[#allocation4 + $0x720] sm:$0xff]  ;;  %v7303_v62 = vcombine.low %v344_v47, %v348_v48  ;;  %v401_v48 = vld [vmem:[#allocation4 + $0x888] sm:$0xff] }
  0xd1   :  { %v404_v47 = vld [vmem:[#allocation4 + $0x8a0] sm:$0xff] }
  0xd3   :  { %3350 = vmatpush1.bf16.msra.mxu0 %v7247_v1  ;;  %3514 = vmatpush1.bf16.msra.mxu1 %v7249_v2  ;;  %v7312_v1 = vcombine.high %v352_v56, %v356_v57  ;;  %v360_v2 = vld [vmem:[#allocation4 + $0x740] sm:$0xff] }
  0xd4   :  { %3351 = vmatprep.subr.bf16.mxu0 %v7256_v3  ;;  %3515 = vmatprep.subr.bf16.mxu1 %v7258_v7  ;;  %v364_v3 = vld [vmem:[#allocation4 + $0x760] sm:$0xff]  ;;  %v7311_v7 = vcombine.low %v352_v56, %v356_v57  ;;  %v409_v57 = vld [vmem:[#allocation4 + $0x8c8] sm:$0xff] }
  0xd5   :  { %v412_v56 = vld [vmem:[#allocation4 + $0x8e0] sm:$0xff] }
  0xd7   :  { %3352 = vmatpush1.bf16.msra.mxu0 %v7255_v10  ;;  %3516 = vmatpush1.bf16.msra.mxu1 %v7257_v11  ;;  %v7320_v10 = vcombine.high %v360_v2, %v364_v3  ;;  %v368_v11 = vld [vmem:[#allocation4 + $0x780] sm:$0xff] }
  0xd8   :  { %3353 = vmatprep.subr.bf16.mxu0 %v7264_v12  ;;  %3517 = vmatprep.subr.bf16.mxu1 %v7266_v16  ;;  %v372_v12 = vld [vmem:[#allocation4 + $0x7a0] sm:$0xff]  ;;  %v7319_v16 = vcombine.low %v360_v2, %v364_v3  ;;  %v417_v3 = vld [vmem:[#allocation4 + $0x908] sm:$0xff] }
  0xd9   :  { %v420_v2 = vld [vmem:[#allocation4 + $0x920] sm:$0xff] }
  0xdb   :  { %3354 = vmatpush1.bf16.msra.mxu0 %v7263_v18  ;;  %3518 = vmatpush1.bf16.msra.mxu1 %v7265_v19  ;;  %v7328_v18 = vcombine.high %v368_v11, %v372_v12  ;;  %v376_v19 = vld [vmem:[#allocation4 + $0x7c0] sm:$0xff] }
  0xdc   :  { %3355 = vmatprep.subr.bf16.mxu0 %v7272_v20  ;;  %3519 = vmatprep.subr.bf16.mxu1 %v7274_v24  ;;  %v380_v20 = vld [vmem:[#allocation4 + $0x7e0] sm:$0xff]  ;;  %v7327_v24 = vcombine.low %v368_v11, %v372_v12  ;;  %v425_v12 = vld [vmem:[#allocation4 + $0x948] sm:$0xff] }
  0xdd   :  { %v428_v11 = vld [vmem:[#allocation4 + $0x960] sm:$0xff] }
  0xdf   :  { %3356 = vmatpush1.bf16.msra.mxu0 %v7271_v27  ;;  %3520 = vmatpush1.bf16.msra.mxu1 %v7273_v28  ;;  %v7336_v27 = vcombine.high %v376_v19, %v380_v20  ;;  %v384_v28 = vld [vmem:[#allocation4 + $0x800] sm:$0xff] }
  0xe0   :  { %3357 = vmatprep.subr.bf16.mxu0 %v7280_v29  ;;  %3521 = vmatprep.subr.bf16.mxu1 %v7282_v32  ;;  %v388_v29 = vld [vmem:[#allocation4 + $0x820] sm:$0xff]  ;;  %v7335_v32 = vcombine.low %v376_v19, %v380_v20  ;;  %v433_v20 = vld [vmem:[#allocation4 + $0x988] sm:$0xff] }
  0xe1   :  { %v7343_v44 = vcombine.low %v384_v28, %v388_v29  ;;  %v436_v19 = vld [vmem:[#allocation4 + $0x9a0] sm:$0xff] }
  0xe3   :  { %3358 = vmatpush1.bf16.msra.mxu0 %v7279_v34  ;;  %3522 = vmatpush1.bf16.msra.mxu1 %v7281_v35  ;;  %v7344_v34 = vcombine.high %v384_v28, %v388_v29  ;;  %v392_v35 = vld [vmem:[#allocation4 + $0x840] sm:$0xff]  ;;  %v441_v29 = vld [vmem:[#allocation4 + $0x9c8] sm:$0xff] }
  0xe4   :  { %3359 = vmatprep.subr.bf16.mxu0 %v7288_v38  ;;  %3523 = vmatprep.subr.bf16.mxu1 %v7290_v42  ;;  %v396_v38 = vld [vmem:[#allocation4 + $0x860] sm:$0xff]  ;;  %v9041_v42 = vcombine.high %v9023_v25, %v9023_v25 }
  0xe5   :  { %v7351_v51 = vcombine.low %v392_v35, %v396_v38  ;;  %v444_v28 = vld [vmem:[#allocation4 + $0x9e0] sm:$0xff] }
  0xe7   :  { %3360 = vmatpush1.bf16.msra.mxu0 %v7287_v45  ;;  %3524 = vmatpush1.bf16.msra.mxu1 %v7289_v46  ;;  %v7345_v45 = vcombine.low %v385_v59, %v389_v31  ;;  %v7352_v46 = vcombine.high %v392_v35, %v396_v38  ;;  %v452_v35 = vld [vmem:[#allocation4 + $0xa20] sm:$0xff]  ;;  %v449_v38 = vld [vmem:[#allocation4 + $0xa08] sm:$0xff] }
  0xe8   :  { %3361 = vmatprep.subr.bf16.mxu0 %v7296_v53  ;;  %3525 = vmatprep.subr.bf16.mxu1 %v7298_v50  ;;  %v400_v53 = vld [vmem:[#allocation4 + $0x880] sm:$0xff]  ;;  %v405_v50 = vld [vmem:[#allocation4 + $0x8a8] sm:$0xff] }
  0xe9   :  { %v7362_v58 = vcombine.high %v401_v48, %v405_v50  ;;  %v7359_v61 = vcombine.low %v400_v53, %v404_v47 }
  0xeb   :  { %3362 = vmatpush1.bf16.msra.mxu0 %v7295_v52  ;;  %3526 = vmatpush1.bf16.msra.mxu1 %v7297_v54  ;;  %v7353_v52 = vcombine.low %v393_v39, %v397_v41  ;;  %v7360_v54 = vcombine.high %v400_v53, %v404_v47  ;;  %v460_v53 = vld [vmem:[#allocation4 + $0xa60] sm:$0xff]  ;;  %v457_v47 = vld [vmem:[#allocation4 + $0xa48] sm:$0xff] }
  0xec   :  { %3363 = vmatprep.subr.bf16.mxu0 %v7304_v55  ;;  %3527 = vmatprep.subr.bf16.mxu1 %v7306_v60  ;;  %v408_v55 = vld [vmem:[#allocation4 + $0x8c0] sm:$0xff]  ;;  %v413_v60 = vld [vmem:[#allocation4 + $0x8e8] sm:$0xff] }
  0xed   :  { %v7370_v4 = vcombine.high %v409_v57, %v413_v60  ;;  %v7367_v6 = vcombine.low %v408_v55, %v412_v56 }
  0xef   :  { %3364 = vmatpush1.bf16.msra.mxu0 %v7303_v62  ;;  %3528 = vmatpush1.bf16.msra.mxu1 %v7305_v0  ;;  %v7361_v62 = vcombine.low %v401_v48, %v405_v50  ;;  %v7368_v0 = vcombine.high %v408_v55, %v412_v56  ;;  %v468_v55 = vld [vmem:[#allocation4 + $0xaa0] sm:$0xff]  ;;  %v465_v56 = vld [vmem:[#allocation4 + $0xa88] sm:$0xff] }
  0xf0   :  { %3365 = vmatprep.subr.bf16.mxu0 %v7312_v1  ;;  %3529 = vmatprep.subr.bf16.mxu1 %v7314_v5  ;;  %v416_v1 = vld [vmem:[#allocation4 + $0x900] sm:$0xff]  ;;  %v421_v5 = vld [vmem:[#allocation4 + $0x928] sm:$0xff] }
  0xf1   :  { %v7378_v13 = vcombine.high %v417_v3, %v421_v5  ;;  %v7375_v15 = vcombine.low %v416_v1, %v420_v2 }
  0xf3   :  { %3366 = vmatpush1.bf16.msra.mxu0 %v7311_v7  ;;  %3530 = vmatpush1.bf16.msra.mxu1 %v7313_v8  ;;  %v7369_v7 = vcombine.low %v409_v57, %v413_v60  ;;  %v7376_v8 = vcombine.high %v416_v1, %v420_v2  ;;  %v476_v1 = vld [vmem:[#allocation4 + $0xae0] sm:$0xff]  ;;  %v473_v2 = vld [vmem:[#allocation4 + $0xac8] sm:$0xff] }
  0xf4   :  { %3367 = vmatprep.subr.bf16.mxu0 %v7320_v10  ;;  %3531 = vmatprep.subr.bf16.mxu1 %v7322_v14  ;;  %v424_v10 = vld [vmem:[#allocation4 + $0x940] sm:$0xff]  ;;  %v429_v14 = vld [vmem:[#allocation4 + $0x968] sm:$0xff] }
  0xf5   :  { %v7386_v21 = vcombine.high %v425_v12, %v429_v14  ;;  %v7383_v23 = vcombine.low %v424_v10, %v428_v11 }
  0xf7   :  { %3368 = vmatpush1.bf16.msra.mxu0 %v7319_v16  ;;  %3532 = vmatpush1.bf16.msra.mxu1 %v7321_v17  ;;  %v7377_v16 = vcombine.low %v417_v3, %v421_v5  ;;  %v7384_v17 = vcombine.high %v424_v10, %v428_v11  ;;  %v484_v10 = vld [vmem:[#allocation4 + $0xb20] sm:$0xff]  ;;  %v481_v11 = vld [vmem:[#allocation4 + $0xb08] sm:$0xff] }
  0xf8   :  { %3369 = vmatprep.subr.bf16.mxu0 %v7328_v18  ;;  %3533 = vmatprep.subr.bf16.mxu1 %v7330_v22  ;;  %v432_v18 = vld [vmem:[#allocation4 + $0x980] sm:$0xff]  ;;  %v437_v22 = vld [vmem:[#allocation4 + $0x9a8] sm:$0xff] }
  0xf9   :  { %v7394_v59 = vcombine.high %v433_v20, %v437_v22  ;;  %v7391_v31 = vcombine.low %v432_v18, %v436_v19 }
  0xfb   :  { %3370 = vmatpush1.bf16.msra.mxu0 %v7327_v24  ;;  %3534 = vmatpush1.bf16.msra.mxu1 %v7329_v26  ;;  %v7385_v24 = vcombine.low %v425_v12, %v429_v14  ;;  %v7392_v26 = vcombine.high %v432_v18, %v436_v19  ;;  %v492_v18 = vld [vmem:[#allocation4 + $0xb60] sm:$0xff]  ;;  %v489_v19 = vld [vmem:[#allocation4 + $0xb48] sm:$0xff] }
  0xfc   :  { %3371 = vmatprep.subr.bf16.mxu0 %v7336_v27  ;;  %3535 = vmatprep.subr.bf16.mxu1 %v7338_v30  ;;  %v440_v27 = vld [vmem:[#allocation4 + $0x9c0] sm:$0xff]  ;;  %v445_v30 = vld [vmem:[#allocation4 + $0x9e8] sm:$0xff] }
  0xfd   :  { %v7402_v39 = vcombine.high %v441_v29, %v445_v30  ;;  %v7399_v41 = vcombine.low %v440_v27, %v444_v28 }
  0xff   :  { %3372 = vmatpush1.bf16.msra.mxu0 %v7335_v32  ;;  %3536 = vmatpush1.bf16.msra.mxu1 %v7337_v33  ;;  %v7393_v32 = vcombine.low %v433_v20, %v437_v22  ;;  %v7400_v33 = vcombine.high %v440_v27, %v444_v28  ;;  %v500_v27 = vld [vmem:[#allocation4 + $0xba0] sm:$0xff]  ;;  %v497_v28 = vld [vmem:[#allocation4 + $0xb88] sm:$0xff] }
 0x100   :  { %3382 = vmatprep.subr.bf16.mxu0 %v7344_v34  ;;  %3546 = vmatprep.subr.bf16.mxu1 %v7346_v40  ;;  %v448_v34 = vld [vmem:[#allocation4 + $0xa00] sm:$0xff]  ;;  %v453_v40 = vld [vmem:[#allocation4 + $0xa28] sm:$0xff] }
 0x101   :  { %v7410_v48 = vcombine.high %v449_v38, %v453_v40  ;;  %v7407_v50 = vcombine.low %v448_v34, %v452_v35 }
 0x102   :  { %3374 = vmatmul.mubr.bf16.vlgmr.msra.gmra.mrb[0].mxu0 %v9041_v42  ;;  %3538 = vmatmul.mubr.bf16.vlgmr.msra.gmra.mrb[0].mxu1 %v9041_v42 }
 0x103   :  { %3383 = vmatpush1.bf16.msra.mxu0 %v7343_v44  ;;  %3547 = vmatpush1.bf16.msra.mxu1 %v7345_v45  ;;  %v7401_v44 = vcombine.low %v441_v29, %v445_v30  ;;  %v7408_v45 = vcombine.high %v448_v34, %v452_v35  ;;  %v508_v34 = vld [vmem:[#allocation4 + $0xbe0] sm:$0xff]  ;;  %v505_v35 = vld [vmem:[#allocation4 + $0xbc8] sm:$0xff] }
 0x104   :  { %3384 = vmatprep.subr.bf16.mxu0 %v7352_v46  ;;  %3548 = vmatprep.subr.bf16.mxu1 %v7354_v49  ;;  %v456_v46 = vld [vmem:[#allocation4 + $0xa40] sm:$0xff]  ;;  %v461_v49 = vld [vmem:[#allocation4 + $0xa68] sm:$0xff] }
 0x105   :  { %3414 = vmatprep.mubr.bf16.mxu0 %v9030_v63  ;;  %3578 = vmatprep.mubr.bf16.mxu1 %v9030_v63  ;;  %v7418_v57 = vcombine.high %v457_v47, %v461_v49  ;;  %v7415_v60 = vcombine.low %v456_v46, %v460_v53 }
 0x107   :  { %3385 = vmatpush1.bf16.msra.mxu0 %v7351_v51  ;;  %3549 = vmatpush1.bf16.msra.mxu1 %v7353_v52  ;;  %v7409_v51 = vcombine.low %v449_v38, %v453_v40  ;;  %v7416_v52 = vcombine.high %v456_v46, %v460_v53  ;;  %v516_v46 = vld [vmem:[#allocation4 + $0xc20] sm:$0xff]  ;;  %v513_v53 = vld [vmem:[#allocation4 + $0xc08] sm:$0xff] }
 0x108   :  { %3386 = vmatprep.subr.bf16.mxu0 %v7360_v54  ;;  %3550 = vmatprep.subr.bf16.mxu1 %v7362_v58  ;;  %v464_v54 = vld [vmem:[#allocation4 + $0xa80] sm:$0xff]  ;;  %v469_v58 = vld [vmem:[#allocation4 + $0xaa8] sm:$0xff] }
 0x109   :  { %v7426_v3 = vcombine.high %v465_v56, %v469_v58  ;;  %v7423_v5 = vcombine.low %v464_v54, %v468_v55 }
 0x10b   :  { %3387 = vmatpush1.bf16.msra.mxu0 %v7359_v61  ;;  %3551 = vmatpush1.bf16.msra.mxu1 %v7361_v62  ;;  %v7417_v61 = vcombine.low %v457_v47, %v461_v49  ;;  %v7424_v62 = vcombine.high %v464_v54, %v468_v55  ;;  %v524_v54 = vld [vmem:[#allocation4 + $0xc60] sm:$0xff]  ;;  %v521_v55 = vld [vmem:[#allocation4 + $0xc48] sm:$0xff] }
 0x10c   :  { %3388 = vmatprep.subr.bf16.mxu0 %v7368_v0  ;;  %3552 = vmatprep.subr.bf16.mxu1 %v7370_v4  ;;  %v472_v0 = vld [vmem:[#allocation4 + $0xac0] sm:$0xff]  ;;  %v477_v4 = vld [vmem:[#allocation4 + $0xae8] sm:$0xff] }
 0x10d   :  { %v7434_v12 = vcombine.high %v473_v2, %v477_v4  ;;  %v7431_v14 = vcombine.low %v472_v0, %v476_v1 }
 0x10f   :  { %3389 = vmatpush1.bf16.msra.mxu0 %v7367_v6  ;;  %3553 = vmatpush1.bf16.msra.mxu1 %v7369_v7  ;;  %v7425_v6 = vcombine.low %v465_v56, %v469_v58  ;;  %v7432_v7 = vcombine.high %v472_v0, %v476_v1  ;;  %v532_v0 = vld [vmem:[#allocation4 + $0xca0] sm:$0xff]  ;;  %v529_v1 = vld [vmem:[#allocation4 + $0xc88] sm:$0xff] }
 0x110   :  { %3390 = vmatprep.subr.bf16.mxu0 %v7376_v8  ;;  %3554 = vmatprep.subr.bf16.mxu1 %v7378_v13  ;;  %v480_v8 = vld [vmem:[#allocation4 + $0xb00] sm:$0xff]  ;;  %v485_v13 = vld [vmem:[#allocation4 + $0xb28] sm:$0xff] }
 0x111   :  { %v7442_v20 = vcombine.high %v481_v11, %v485_v13  ;;  %v7439_v22 = vcombine.low %v480_v8, %v484_v10 }
 0x113   :  { %3391 = vmatpush1.bf16.msra.mxu0 %v7375_v15  ;;  %3555 = vmatpush1.bf16.msra.mxu1 %v7377_v16  ;;  %v7433_v15 = vcombine.low %v473_v2, %v477_v4  ;;  %v7440_v16 = vcombine.high %v480_v8, %v484_v10  ;;  %v9049_v4 = vcombine.high %v9030_v63, %v9030_v63  ;;  %v536_v8 = vld [vmem:[#allocation4 + $0xcc0] sm:$0xff] }
 0x114   :  { %3392 = vmatprep.subr.bf16.mxu0 %v7384_v17  ;;  %3556 = vmatprep.subr.bf16.mxu1 %v7386_v21  ;;  %v488_v17 = vld [vmem:[#allocation4 + $0xb40] sm:$0xff]  ;;  %v493_v21 = vld [vmem:[#allocation4 + $0xb68] sm:$0xff] }
 0x115   :  { %v7450_v29 = vcombine.high %v489_v19, %v493_v21  ;;  %v7447_v30 = vcombine.low %v488_v17, %v492_v18  ;;  %v540_v10 = vld [vmem:[#allocation4 + $0xce0] sm:$0xff] }
 0x117   :  { %3393 = vmatpush1.bf16.msra.mxu0 %v7383_v23  ;;  %3557 = vmatpush1.bf16.msra.mxu1 %v7385_v24  ;;  %v7441_v23 = vcombine.low %v481_v11, %v485_v13  ;;  %v7448_v24 = vcombine.high %v488_v17, %v492_v18  ;;  %v537_v11 = vld [vmem:[#allocation4 + $0xcc8] sm:$0xff]  ;;  %v544_v17 = vld [vmem:[#allocation4 + $0xd00] sm:$0xff] }
 0x118   :  { %3394 = vmatprep.subr.bf16.mxu0 %v7392_v26  ;;  %3558 = vmatprep.subr.bf16.mxu1 %v7394_v59  ;;  %v496_v26 = vld [vmem:[#allocation4 + $0xb80] sm:$0xff]  ;;  %v501_v59 = vld [vmem:[#allocation4 + $0xba8] sm:$0xff] }
 0x119   :  { %v7458_v38 = vcombine.high %v497_v28, %v501_v59  ;;  %v7455_v40 = vcombine.low %v496_v26, %v500_v27  ;;  %v541_v13 = vld [vmem:[#allocation4 + $0xce8] sm:$0xff]  ;;  %v548_v18 = vld [vmem:[#allocation4 + $0xd20] sm:$0xff] }
 0x11b   :  { %3395 = vmatpush1.bf16.msra.mxu0 %v7391_v31  ;;  %3559 = vmatpush1.bf16.msra.mxu1 %v7393_v32  ;;  %v7449_v31 = vcombine.low %v489_v19, %v493_v21  ;;  %v7456_v32 = vcombine.high %v496_v26, %v500_v27  ;;  %v545_v19 = vld [vmem:[#allocation4 + $0xd08] sm:$0xff]  ;;  %v552_v26 = vld [vmem:[#allocation4 + $0xd40] sm:$0xff] }
 0x11c   :  { %3396 = vmatprep.subr.bf16.mxu0 %v7400_v33  ;;  %3560 = vmatprep.subr.bf16.mxu1 %v7402_v39  ;;  %v504_v33 = vld [vmem:[#allocation4 + $0xbc0] sm:$0xff]  ;;  %v509_v39 = vld [vmem:[#allocation4 + $0xbe8] sm:$0xff] }
 0x11d   :  { %v7466_v47 = vcombine.high %v505_v35, %v509_v39  ;;  %v7463_v49 = vcombine.low %v504_v33, %v508_v34  ;;  %v549_v21 = vld [vmem:[#allocation4 + $0xd28] sm:$0xff]  ;;  %v556_v27 = vld [vmem:[#allocation4 + $0xd60] sm:$0xff] }
 0x11f   :  { %3397 = vmatpush1.bf16.msra.mxu0 %v7399_v41  ;;  %3561 = vmatpush1.bf16.msra.mxu1 %v7401_v44  ;;  %v7457_v41 = vcombine.low %v497_v28, %v501_v59  ;;  %v7464_v44 = vcombine.high %v504_v33, %v508_v34  ;;  %v553_v28 = vld [vmem:[#allocation4 + $0xd48] sm:$0xff]  ;;  %v560_v33 = vld [vmem:[#allocation4 + $0xd80] sm:$0xff] }
 0x120   :  { %3398 = vmatprep.subr.bf16.mxu0 %v7408_v45  ;;  %3562 = vmatprep.subr.bf16.mxu1 %v7410_v48  ;;  %v512_v45 = vld [vmem:[#allocation4 + $0xc00] sm:$0xff]  ;;  %v517_v48 = vld [vmem:[#allocation4 + $0xc28] sm:$0xff] }
 0x121   :  { %v7474_v56 = vcombine.high %v513_v53, %v517_v48  ;;  %v7471_v58 = vcombine.low %v512_v45, %v516_v46  ;;  %v557_v59 = vld [vmem:[#allocation4 + $0xd68] sm:$0xff]  ;;  %v564_v34 = vld [vmem:[#allocation4 + $0xda0] sm:$0xff] }
 0x123   :  { %3399 = vmatpush1.bf16.msra.mxu0 %v7407_v50  ;;  %3563 = vmatpush1.bf16.msra.mxu1 %v7409_v51  ;;  %v7465_v50 = vcombine.low %v505_v35, %v509_v39  ;;  %v7472_v51 = vcombine.high %v512_v45, %v516_v46  ;;  %v561_v35 = vld [vmem:[#allocation4 + $0xd88] sm:$0xff]  ;;  %v568_v45 = vld [vmem:[#allocation4 + $0xdc0] sm:$0xff] }
 0x124   :  { %3400 = vmatprep.subr.bf16.mxu0 %v7416_v52  ;;  %3564 = vmatprep.subr.bf16.mxu1 %v7418_v57  ;;  %v520_v52 = vld [vmem:[#allocation4 + $0xc40] sm:$0xff]  ;;  %v525_v57 = vld [vmem:[#allocation4 + $0xc68] sm:$0xff] }
 0x125   :  { %v7482_v2 = vcombine.high %v521_v55, %v525_v57  ;;  %v565_v39 = vld [vmem:[#allocation4 + $0xda8] sm:$0xff]  ;;  %v572_v46 = vld [vmem:[#allocation4 + $0xde0] sm:$0xff] }
 0x127   :  { %3401 = vmatpush1.bf16.msra.mxu0 %v7415_v60  ;;  %3565 = vmatpush1.bf16.msra.mxu1 %v7417_v61  ;;  %v7473_v60 = vcombine.low %v513_v53, %v517_v48  ;;  %v7480_v61 = vcombine.high %v520_v52, %v524_v54  ;;  %v569_v53 = vld [vmem:[#allocation4 + $0xdc8] sm:$0xff] }
 0x128   :  { %3402 = vmatprep.subr.bf16.mxu0 %v7424_v62  ;;  %3566 = vmatprep.subr.bf16.mxu1 %v7426_v3  ;;  %v528_v62 = vld [vmem:[#allocation4 + $0xc80] sm:$0xff]  ;;  %v533_v3 = vld [vmem:[#allocation4 + $0xca8] sm:$0xff] }
 0x129   :  { %v573_v48 = vld [vmem:[#allocation4 + $0xde8] sm:$0xff] }
 0x12b   :  { %3403 = vmatpush1.bf16.msra.mxu0 %v7423_v5  ;;  %3567 = vmatpush1.bf16.msra.mxu1 %v7425_v6  ;;  %v7479_v5 = vcombine.low %v520_v52, %v524_v54  ;;  %v7481_v6 = vcombine.low %v521_v55, %v525_v57  ;;  %v576_v52 = vld [vmem:[#allocation4 + $0xe00] sm:$0xff]  ;;  %v577_v55 = vld [vmem:[#allocation4 + $0xe08] sm:$0xff] }
 0x12c   :  { %3404 = vmatprep.subr.bf16.mxu0 %v7432_v7  ;;  %3568 = vmatprep.subr.bf16.mxu1 %v7434_v12  ;;  %v7488_v7 = vcombine.high %v528_v62, %v532_v0  ;;  %v7490_v12 = vcombine.high %v529_v1, %v533_v3  ;;  %v580_v54 = vld [vmem:[#allocation4 + $0xe20] sm:$0xff]  ;;  %v581_v57 = vld [vmem:[#allocation4 + $0xe28] sm:$0xff] }
 0x12f   :  { %3405 = vmatpush1.bf16.msra.mxu0 %v7431_v14  ;;  %3569 = vmatpush1.bf16.msra.mxu1 %v7433_v15  ;;  %v7487_v14 = vcombine.low %v528_v62, %v532_v0  ;;  %v7489_v15 = vcombine.low %v529_v1, %v533_v3  ;;  %v584_v62 = vld [vmem:[#allocation4 + $0xe40] sm:$0xff]  ;;  %v585_v1 = vld [vmem:[#allocation4 + $0xe48] sm:$0xff] }
 0x130   :  { %3406 = vmatprep.subr.bf16.mxu0 %v7440_v16  ;;  %3570 = vmatprep.subr.bf16.mxu1 %v7442_v20  ;;  %v7496_v16 = vcombine.high %v536_v8, %v540_v10  ;;  %v7498_v20 = vcombine.high %v537_v11, %v541_v13  ;;  %v588_v0 = vld [vmem:[#allocation4 + $0xe60] sm:$0xff]  ;;  %v589_v3 = vld [vmem:[#allocation4 + $0xe68] sm:$0xff] }
 0x133   :  { %3407 = vmatpush1.bf16.msra.mxu0 %v7439_v22  ;;  %3571 = vmatpush1.bf16.msra.mxu1 %v7441_v23  ;;  %v7495_v22 = vcombine.low %v536_v8, %v540_v10  ;;  %v7497_v23 = vcombine.low %v537_v11, %v541_v13  ;;  %v592_v8 = vld [vmem:[#allocation4 + $0xe80] sm:$0xff]  ;;  %v593_v11 = vld [vmem:[#allocation4 + $0xe88] sm:$0xff] }
 0x134   :  { %3408 = vmatprep.subr.bf16.mxu0 %v7448_v24  ;;  %3572 = vmatprep.subr.bf16.mxu1 %v7450_v29  ;;  %v7504_v24 = vcombine.high %v544_v17, %v548_v18  ;;  %v7506_v29 = vcombine.high %v545_v19, %v549_v21  ;;  %v596_v10 = vld [vmem:[#allocation4 + $0xea0] sm:$0xff]  ;;  %v597_v13 = vld [vmem:[#allocation4 + $0xea8] sm:$0xff] }
 0x137   :  { %3409 = vmatpush1.bf16.msra.mxu0 %v7447_v30  ;;  %3573 = vmatpush1.bf16.msra.mxu1 %v7449_v31  ;;  %v7503_v30 = vcombine.low %v544_v17, %v548_v18  ;;  %v7505_v31 = vcombine.low %v545_v19, %v549_v21  ;;  %v600_v17 = vld [vmem:[#allocation4 + $0xec0] sm:$0xff]  ;;  %v601_v19 = vld [vmem:[#allocation4 + $0xec8] sm:$0xff] }
 0x138   :  { %3410 = vmatprep.subr.bf16.mxu0 %v7456_v32  ;;  %3574 = vmatprep.subr.bf16.mxu1 %v7458_v38  ;;  %v7512_v32 = vcombine.high %v552_v26, %v556_v27  ;;  %v7514_v38 = vcombine.high %v553_v28, %v557_v59  ;;  %v604_v18 = vld [vmem:[#allocation4 + $0xee0] sm:$0xff]  ;;  %v605_v21 = vld [vmem:[#allocation4 + $0xee8] sm:$0xff] }
 0x13b   :  { %3411 = vmatpush1.bf16.msra.mxu0 %v7455_v40  ;;  %3575 = vmatpush1.bf16.msra.mxu1 %v7457_v41  ;;  %v7511_v40 = vcombine.low %v552_v26, %v556_v27  ;;  %v7513_v41 = vcombine.low %v553_v28, %v557_v59  ;;  %v608_v26 = vld [vmem:[#allocation4 + $0xf00] sm:$0xff]  ;;  %v609_v28 = vld [vmem:[#allocation4 + $0xf08] sm:$0xff] }
 0x13c   :  { %3412 = vmatprep.subr.bf16.mxu0 %v7464_v44  ;;  %3576 = vmatprep.subr.bf16.mxu1 %v7466_v47  ;;  %v7520_v44 = vcombine.high %v560_v33, %v564_v34  ;;  %v7522_v47 = vcombine.high %v561_v35, %v565_v39  ;;  %v612_v27 = vld [vmem:[#allocation4 + $0xf20] sm:$0xff]  ;;  %v613_v59 = vld [vmem:[#allocation4 + $0xf28] sm:$0xff] }
 0x13f   :  { %3413 = vmatpush1.bf16.msra.mxu0 %v7463_v49  ;;  %3577 = vmatpush1.bf16.msra.mxu1 %v7465_v50  ;;  %v7519_v49 = vcombine.low %v560_v33, %v564_v34  ;;  %v7521_v50 = vcombine.low %v561_v35, %v565_v39  ;;  %v616_v33 = vld [vmem:[#allocation4 + $0xf40] sm:$0xff]  ;;  %v617_v35 = vld [vmem:[#allocation4 + $0xf48] sm:$0xff] }
 0x140   :  { %3423 = vmatprep.subr.bf16.mxu0 %v7472_v51  ;;  %3587 = vmatprep.subr.bf16.mxu1 %v7474_v56  ;;  %v7528_v51 = vcombine.high %v568_v45, %v572_v46  ;;  %v7530_v56 = vcombine.high %v569_v53, %v573_v48  ;;  %v620_v34 = vld [vmem:[#allocation4 + $0xf60] sm:$0xff]  ;;  %v621_v39 = vld [vmem:[#allocation4 + $0xf68] sm:$0xff] }
 0x142   :  { %3415 = vmatmul.mubr.bf16.vlgmr.msra.gmra.mrb[0].mxu0 %v9033_v37  ;;  %3579 = vmatmul.mubr.bf16.vlgmr.msra.gmra.mrb[0].mxu1 %v9033_v37 }
 0x143   :  { %3424 = vmatpush1.bf16.msra.mxu0 %v7471_v58  ;;  %3588 = vmatpush1.bf16.msra.mxu1 %v7473_v60  ;;  %v7527_v58 = vcombine.low %v568_v45, %v572_v46  ;;  %v7529_v60 = vcombine.low %v569_v53, %v573_v48  ;;  %v624_v45 = vld [vmem:[#allocation4 + $0xf80] sm:$0xff]  ;;  %v625_v53 = vld [vmem:[#allocation4 + $0xf88] sm:$0xff] }
 0x144   :  { %3425 = vmatprep.subr.bf16.mxu0 %v7480_v61  ;;  %3589 = vmatprep.subr.bf16.mxu1 %v7482_v2  ;;  %v7536_v61 = vcombine.high %v576_v52, %v580_v54  ;;  %v7538_v2 = vcombine.high %v577_v55, %v581_v57  ;;  %v628_v46 = vld [vmem:[#allocation4 + $0xfa0] sm:$0xff]  ;;  %v629_v48 = vld [vmem:[#allocation4 + $0xfa8] sm:$0xff] }
 0x145   :  { %3455 = vmatprep.mubr.bf16.mxu0 %v9049_v4  ;;  %3619 = vmatprep.mubr.bf16.mxu1 %v9049_v4 }
 0x147   :  { %3426 = vmatpush1.bf16.msra.mxu0 %v7479_v5  ;;  %3590 = vmatpush1.bf16.msra.mxu1 %v7481_v6  ;;  %v7535_v5 = vcombine.low %v576_v52, %v580_v54  ;;  %v7537_v6 = vcombine.low %v577_v55, %v581_v57  ;;  %v632_v52 = vld [vmem:[#allocation4 + $0xfc0] sm:$0xff]  ;;  %v633_v55 = vld [vmem:[#allocation4 + $0xfc8] sm:$0xff] }
 0x148   :  { %3427 = vmatprep.subr.bf16.mxu0 %v7488_v7  ;;  %3591 = vmatprep.subr.bf16.mxu1 %v7490_v12  ;;  %v7544_v7 = vcombine.high %v584_v62, %v588_v0  ;;  %v7546_v12 = vcombine.high %v585_v1, %v589_v3  ;;  %v636_v54 = vld [vmem:[#allocation4 + $0xfe0] sm:$0xff]  ;;  %v637_v57 = vld [vmem:[#allocation4 + $0xfe8] sm:$0xff] }
 0x14b   :  { %3428 = vmatpush1.bf16.msra.mxu0 %v7487_v14  ;;  %3592 = vmatpush1.bf16.msra.mxu1 %v7489_v15  ;;  %v7543_v14 = vcombine.low %v584_v62, %v588_v0  ;;  %v7545_v15 = vcombine.low %v585_v1, %v589_v3  ;;  %v130_v62 = vld [vmem:[#allocation4 + $0x10] sm:$0xff]  ;;  %v131_v1 = vld [vmem:[#allocation4 + $0x18] sm:$0xff] }
 0x14c   :  { %3429 = vmatprep.subr.bf16.mxu0 %v7496_v16  ;;  %3593 = vmatprep.subr.bf16.mxu1 %v7498_v20  ;;  %v7552_v16 = vcombine.high %v592_v8, %v596_v10  ;;  %v7554_v20 = vcombine.high %v593_v11, %v597_v13  ;;  %v134_v0 = vld [vmem:[#allocation4 + $0x30] sm:$0xff]  ;;  %v135_v3 = vld [vmem:[#allocation4 + $0x38] sm:$0xff] }
 0x14f   :  { %3430 = vmatpush1.bf16.msra.mxu0 %v7495_v22  ;;  %3594 = vmatpush1.bf16.msra.mxu1 %v7497_v23  ;;  %v7551_v22 = vcombine.low %v592_v8, %v596_v10  ;;  %v7553_v23 = vcombine.low %v593_v11, %v597_v13  ;;  %v138_v8 = vld [vmem:[#allocation4 + $0x50] sm:$0xff]  ;;  %v139_v11 = vld [vmem:[#allocation4 + $0x58] sm:$0xff] }
 0x150   :  { %3431 = vmatprep.subr.bf16.mxu0 %v7504_v24  ;;  %3595 = vmatprep.subr.bf16.mxu1 %v7506_v29  ;;  %v7560_v24 = vcombine.high %v600_v17, %v604_v18  ;;  %v7562_v29 = vcombine.high %v601_v19, %v605_v21  ;;  %v142_v10 = vld [vmem:[#allocation4 + $0x70] sm:$0xff]  ;;  %v143_v13 = vld [vmem:[#allocation4 + $0x78] sm:$0xff] }
 0x153   :  { %3432 = vmatpush1.bf16.msra.mxu0 %v7503_v30  ;;  %3596 = vmatpush1.bf16.msra.mxu1 %v7505_v31  ;;  %v7559_v30 = vcombine.low %v600_v17, %v604_v18  ;;  %v7561_v31 = vcombine.low %v601_v19, %v605_v21  ;;  %v7100_v17 = vcombine.high %v138_v8, %v142_v10  ;;  %v146_v18 = vld [vmem:[#allocation4 + $0x90] sm:$0xff] }
 0x154   :  { %3433 = vmatprep.subr.bf16.mxu0 %v7512_v32  ;;  %3597 = vmatprep.subr.bf16.mxu1 %v7514_v38  ;;  %v7568_v32 = vcombine.high %v608_v26, %v612_v27  ;;  %v7570_v38 = vcombine.high %v609_v28, %v613_v59  ;;  %v150_v19 = vld [vmem:[#allocation4 + $0xb0] sm:$0xff]  ;;  %v7102_v21 = vcombine.high %v139_v11, %v143_v13 }
 0x157   :  { %3434 = vmatpush1.bf16.msra.mxu0 %v7511_v40  ;;  %3598 = vmatpush1.bf16.msra.mxu1 %v7513_v41  ;;  %v7567_v40 = vcombine.low %v608_v26, %v612_v27  ;;  %v7569_v41 = vcombine.low %v609_v28, %v613_v59  ;;  %v7108_v26 = vcombine.high %v146_v18, %v150_v19  ;;  %v154_v27 = vld [vmem:[#allocation4 + $0xd0] sm:$0xff] }
 0x158   :  { %3435 = vmatprep.subr.bf16.mxu0 %v7520_v44  ;;  %3599 = vmatprep.subr.bf16.mxu1 %v7522_v47  ;;  %v7576_v44 = vcombine.high %v616_v33, %v620_v34  ;;  %v7578_v47 = vcombine.high %v617_v35, %v621_v39  ;;  %v158_v28 = vld [vmem:[#allocation4 + $0xf0] sm:$0xff] }
 0x15b   :  { %3436 = vmatpush1.bf16.msra.mxu0 %v7519_v49  ;;  %3600 = vmatpush1.bf16.msra.mxu1 %v7521_v50  ;;  %v7575_v49 = vcombine.low %v616_v33, %v620_v34  ;;  %v7577_v50 = vcombine.low %v617_v35, %v621_v39  ;;  %v7116_v33 = vcombine.high %v154_v27, %v158_v28  ;;  %v162_v34 = vld [vmem:[#allocation4 + $0x110] sm:$0xff] }
 0x15c   :  { %3437 = vmatprep.subr.bf16.mxu0 %v7528_v51  ;;  %3601 = vmatprep.subr.bf16.mxu1 %v7530_v56  ;;  %v7584_v51 = vcombine.high %v624_v45, %v628_v46  ;;  %v7586_v56 = vcombine.high %v625_v53, %v629_v48  ;;  %v166_v35 = vld [vmem:[#allocation4 + $0x130] sm:$0xff] }
 0x15f   :  { %3438 = vmatpush1.bf16.msra.mxu0 %v7527_v58  ;;  %3602 = vmatpush1.bf16.msra.mxu1 %v7529_v60  ;;  %v7583_v58 = vcombine.low %v624_v45, %v628_v46  ;;  %v7585_v60 = vcombine.low %v625_v53, %v629_v48  ;;  %v7124_v45 = vcombine.high %v162_v34, %v166_v35  ;;  %v170_v46 = vld [vmem:[#allocation4 + $0x150] sm:$0xff]  ;;  %v175_v48 = vld [vmem:[#allocation4 + $0x178] sm:$0xff] }
 0x160   :  { %3439 = vmatprep.subr.bf16.mxu0 %v7536_v61  ;;  %3603 = vmatprep.subr.bf16.mxu1 %v7538_v2  ;;  %v7592_v61 = vcombine.high %v632_v52, %v636_v54  ;;  %v7594_v2 = vcombine.high %v633_v55, %v637_v57  ;;  %v174_v53 = vld [vmem:[#allocation4 + $0x170] sm:$0xff] }
 0x163   :  { %3440 = vmatpush1.bf16.msra.mxu0 %v7535_v5  ;;  %3604 = vmatpush1.bf16.msra.mxu1 %v7537_v6  ;;  %v7591_v5 = vcombine.low %v632_v52, %v636_v54  ;;  %v7593_v6 = vcombine.low %v633_v55, %v637_v57  ;;  %v178_v54 = vld [vmem:[#allocation4 + $0x190] sm:$0xff]  ;;  %v183_v57 = vld [vmem:[#allocation4 + $0x1b8] sm:$0xff] }
 0x164   :  { %3441 = vmatprep.subr.bf16.mxu0 %v7544_v7  ;;  %3605 = vmatprep.subr.bf16.mxu1 %v7546_v12  ;;  %v7092_v7 = vcombine.high %v130_v62, %v134_v0  ;;  %v7094_v12 = vcombine.high %v131_v1, %v135_v3  ;;  %v182_v55 = vld [vmem:[#allocation4 + $0x1b0] sm:$0xff] }
 0x167   :  { %3442 = vmatpush1.bf16.msra.mxu0 %v7543_v14  ;;  %3606 = vmatpush1.bf16.msra.mxu1 %v7545_v15  ;;  %v9057_v14 = vcombine.high %v9033_v37, %v9033_v37  ;;  %v7091_v15 = vcombine.low %v130_v62, %v134_v0  ;;  %v186_v0 = vld [vmem:[#allocation4 + $0x1d0] sm:$0xff] }
 0x168   :  { %3443 = vmatprep.subr.bf16.mxu0 %v7552_v16  ;;  %3607 = vmatprep.subr.bf16.mxu1 %v7554_v20  ;;  %v7093_v16 = vcombine.low %v131_v1, %v135_v3  ;;  %v147_v20 = vld [vmem:[#allocation4 + $0x98] sm:$0xff]  ;;  %v190_v1 = vld [vmem:[#allocation4 + $0x1f0] sm:$0xff] }
 0x169   :  { %v191_v3 = vld [vmem:[#allocation4 + $0x1f8] sm:$0xff] }
 0x16b   :  { %3444 = vmatpush1.bf16.msra.mxu0 %v7551_v22  ;;  %3608 = vmatpush1.bf16.msra.mxu1 %v7553_v23  ;;  %v151_v22 = vld [vmem:[#allocation4 + $0xb8] sm:$0xff]  ;;  %v7099_v23 = vcombine.low %v138_v8, %v142_v10  ;;  %v194_v10 = vld [vmem:[#allocation4 + $0x210] sm:$0xff] }
 0x16c   :  { %3445 = vmatprep.subr.bf16.mxu0 %v7560_v24  ;;  %3609 = vmatprep.subr.bf16.mxu1 %v7562_v29  ;;  %v7101_v24 = vcombine.low %v139_v11, %v143_v13  ;;  %v155_v29 = vld [vmem:[#allocation4 + $0xd8] sm:$0xff]  ;;  %v7110_v59 = vcombine.high %v147_v20, %v151_v22  ;;  %v198_v11 = vld [vmem:[#allocation4 + $0x230] sm:$0xff] }
 0x16d   :  { %v199_v13 = vld [vmem:[#allocation4 + $0x238] sm:$0xff] }
 0x16f   :  { %3446 = vmatpush1.bf16.msra.mxu0 %v7559_v30  ;;  %3610 = vmatpush1.bf16.msra.mxu1 %v7561_v31  ;;  %v159_v30 = vld [vmem:[#allocation4 + $0xf8] sm:$0xff]  ;;  %v7107_v31 = vcombine.low %v146_v18, %v150_v19  ;;  %v202_v19 = vld [vmem:[#allocation4 + $0x250] sm:$0xff] }
 0x170   :  { %3447 = vmatprep.subr.bf16.mxu0 %v7568_v32  ;;  %3611 = vmatprep.subr.bf16.mxu1 %v7570_v38  ;;  %v7109_v32 = vcombine.low %v147_v20, %v151_v22  ;;  %v163_v38 = vld [vmem:[#allocation4 + $0x118] sm:$0xff]  ;;  %v7118_v39 = vcombine.high %v155_v29, %v159_v30  ;;  %v206_v20 = vld [vmem:[#allocation4 + $0x270] sm:$0xff] }
 0x171   :  { %v207_v22 = vld [vmem:[#allocation4 + $0x278] sm:$0xff] }
 0x173   :  { %3448 = vmatpush1.bf16.msra.mxu0 %v7567_v40  ;;  %3612 = vmatpush1.bf16.msra.mxu1 %v7569_v41  ;;  %v167_v40 = vld [vmem:[#allocation4 + $0x138] sm:$0xff]  ;;  %v7115_v41 = vcombine.low %v154_v27, %v158_v28  ;;  %v210_v28 = vld [vmem:[#allocation4 + $0x290] sm:$0xff] }
 0x174   :  { %3449 = vmatprep.subr.bf16.mxu0 %v7576_v44  ;;  %3613 = vmatprep.subr.bf16.mxu1 %v7578_v47  ;;  %v7117_v44 = vcombine.low %v155_v29, %v159_v30  ;;  %v171_v47 = vld [vmem:[#allocation4 + $0x158] sm:$0xff]  ;;  %v214_v29 = vld [vmem:[#allocation4 + $0x2b0] sm:$0xff] }
 0x175   :  { %v7134_v52 = vcombine.high %v171_v47, %v175_v48  ;;  %v215_v30 = vld [vmem:[#allocation4 + $0x2b8] sm:$0xff] }
 0x177   :  { %3450 = vmatpush1.bf16.msra.mxu0 %v7575_v49  ;;  %3614 = vmatpush1.bf16.msra.mxu1 %v7577_v50  ;;  %v7123_v49 = vcombine.low %v162_v34, %v166_v35  ;;  %v7125_v50 = vcombine.low %v163_v38, %v167_v40  ;;  %v218_v35 = vld [vmem:[#allocation4 + $0x2d0] sm:$0xff] }
 0x178   :  { %3451 = vmatprep.subr.bf16.mxu0 %v7584_v51  ;;  %3615 = vmatprep.subr.bf16.mxu1 %v7586_v56  ;;  %v7132_v51 = vcombine.high %v170_v46, %v174_v53  ;;  %v179_v56 = vld [vmem:[#allocation4 + $0x198] sm:$0xff] }
 0x179   :  { %v7142_v62 = vcombine.high %v179_v56, %v183_v57 }
 0x17b   :  { %3452 = vmatpush1.bf16.msra.mxu0 %v7583_v58  ;;  %3616 = vmatpush1.bf16.msra.mxu1 %v7585_v60  ;;  %v7131_v58 = vcombine.low %v170_v46, %v174_v53  ;;  %v7133_v60 = vcombine.low %v171_v47, %v175_v48  ;;  %v226_v46 = vld [vmem:[#allocation4 + $0x310] sm:$0xff]  ;;  %v227_v47 = vld [vmem:[#allocation4 + $0x318] sm:$0xff] }
 0x17c   :  { %3453 = vmatprep.subr.bf16.mxu0 %v7592_v61  ;;  %3617 = vmatprep.subr.bf16.mxu1 %v7594_v2  ;;  %v7140_v61 = vcombine.high %v178_v54, %v182_v55  ;;  %v187_v2 = vld [vmem:[#allocation4 + $0x1d8] sm:$0xff]  ;;  %v230_v53 = vld [vmem:[#allocation4 + $0x330] sm:$0xff] }
 0x17d   :  { %v7150_v8 = vcombine.high %v187_v2, %v191_v3  ;;  %v231_v48 = vld [vmem:[#allocation4 + $0x338] sm:$0xff] }
 0x17f   :  { %3454 = vmatpush1.bf16.msra.mxu0 %v7591_v5  ;;  %3618 = vmatpush1.bf16.msra.mxu1 %v7593_v6  ;;  %v7139_v5 = vcombine.low %v178_v54, %v182_v55  ;;  %v7141_v6 = vcombine.low %v179_v56, %v183_v57  ;;  %v234_v54 = vld [vmem:[#allocation4 + $0x350] sm:$0xff]  ;;  %v235_v56 = vld [vmem:[#allocation4 + $0x358] sm:$0xff] }
 0x180   :  { %3628 = vmatprep.subr.bf16.mxu0 %v7092_v7  ;;  %3792 = vmatprep.subr.bf16.mxu1 %v7094_v12  ;;  %v7148_v7 = vcombine.high %v186_v0, %v190_v1  ;;  %v195_v12 = vld [vmem:[#allocation4 + $0x218] sm:$0xff]  ;;  %v238_v55 = vld [vmem:[#allocation4 + $0x370] sm:$0xff] }
 0x181   :  { %v7158_v18 = vcombine.high %v195_v12, %v199_v13  ;;  %v239_v57 = vld [vmem:[#allocation4 + $0x378] sm:$0xff] }
 0x182   :  { %3456 = vmatmul.mubr.bf16.vlgmr.msra.gmra.mrb[0].mxu0 %v9057_v14  ;;  %3620 = vmatmul.mubr.bf16.vlgmr.msra.gmra.mrb[0].mxu1 %v9057_v14 }
 0x183   :  { %3629 = vmatpush1.bf16.msra.mxu0 %v7091_v15  ;;  %3793 = vmatpush1.bf16.msra.mxu1 %v7093_v16  ;;  %v7147_v15 = vcombine.low %v186_v0, %v190_v1  ;;  %v7149_v16 = vcombine.low %v187_v2, %v191_v3  ;;  %v242_v0 = vld [vmem:[#allocation4 + $0x390] sm:$0xff]  ;;  %v243_v2 = vld [vmem:[#allocation4 + $0x398] sm:$0xff] }
 0x184   :  { %3630 = vmatprep.subr.bf16.mxu0 %v7100_v17  ;;  %3794 = vmatprep.subr.bf16.mxu1 %v7102_v21  ;;  %v7156_v17 = vcombine.high %v194_v10, %v198_v11  ;;  %v203_v21 = vld [vmem:[#allocation4 + $0x258] sm:$0xff]  ;;  %v246_v1 = vld [vmem:[#allocation4 + $0x3b0] sm:$0xff] }
 0x185   :  { %3660 = vmatprep.mubr.bf16.mxu0 %v9014_v9  ;;  %3824 = vmatprep.mubr.bf16.mxu1 %v9014_v9  ;;  %v7126_v9 = vcombine.high %v163_v38, %v167_v40  ;;  %v7166_v27 = vcombine.high %v203_v21, %v207_v22  ;;  %v222_v38 = vld [vmem:[#allocation4 + $0x2f0] sm:$0xff]  ;;  %v223_v40 = vld [vmem:[#allocation4 + $0x2f8] sm:$0xff] }
 0x186   :  { %v247_v3 = vld [vmem:[#allocation4 + $0x3b8] sm:$0xff] }
 0x187   :  { %3631 = vmatpush1.bf16.msra.mxu0 %v7099_v23  ;;  %3795 = vmatpush1.bf16.msra.mxu1 %v7101_v24  ;;  %v7155_v23 = vcombine.low %v194_v10, %v198_v11  ;;  %v7157_v24 = vcombine.low %v195_v12, %v199_v13  ;;  %v250_v10 = vld [vmem:[#allocation4 + $0x3d0] sm:$0xff]  ;;  %v251_v12 = vld [vmem:[#allocation4 + $0x3d8] sm:$0xff] }
 0x188   :  { %3632 = vmatprep.subr.bf16.mxu0 %v7108_v26  ;;  %3796 = vmatprep.subr.bf16.mxu1 %v7110_v59  ;;  %v7164_v26 = vcombine.high %v202_v19, %v206_v20  ;;  %v211_v59 = vld [vmem:[#allocation4 + $0x298] sm:$0xff]  ;;  %v254_v11 = vld [vmem:[#allocation4 + $0x3f0] sm:$0xff] }
 0x189   :  { %v7174_v34 = vcombine.high %v211_v59, %v215_v30  ;;  %v255_v13 = vld [vmem:[#allocation4 + $0x3f8] sm:$0xff] }
 0x18b   :  { %3633 = vmatpush1.bf16.msra.mxu0 %v7107_v31  ;;  %3797 = vmatpush1.bf16.msra.mxu1 %v7109_v32  ;;  %v7163_v31 = vcombine.low %v202_v19, %v206_v20  ;;  %v7165_v32 = vcombine.low %v203_v21, %v207_v22  ;;  %v258_v19 = vld [vmem:[#allocation4 + $0x410] sm:$0xff]  ;;  %v259_v21 = vld [vmem:[#allocation4 + $0x418] sm:$0xff] }
 0x18c   :  { %3634 = vmatprep.subr.bf16.mxu0 %v7116_v33  ;;  %3798 = vmatprep.subr.bf16.mxu1 %v7118_v39  ;;  %v7172_v33 = vcombine.high %v210_v28, %v214_v29  ;;  %v219_v39 = vld [vmem:[#allocation4 + $0x2d8] sm:$0xff]  ;;  %v262_v20 = vld [vmem:[#allocation4 + $0x430] sm:$0xff] }
 0x18d   :  { %v263_v22 = vld [vmem:[#allocation4 + $0x438] sm:$0xff] }
 0x18f   :  { %3635 = vmatpush1.bf16.msra.mxu0 %v7115_v41  ;;  %3799 = vmatpush1.bf16.msra.mxu1 %v7117_v44  ;;  %v7171_v41 = vcombine.low %v210_v28, %v214_v29  ;;  %v7173_v44 = vcombine.low %v211_v59, %v215_v30  ;;  %v266_v28 = vld [vmem:[#allocation4 + $0x450] sm:$0xff]  ;;  %v267_v59 = vld [vmem:[#allocation4 + $0x458] sm:$0xff] }
 0x190   :  { %3636 = vmatprep.subr.bf16.mxu0 %v7124_v45  ;;  %3800 = vmatprep.subr.bf16.mxu1 %v7126_v9  ;;  %v7180_v45 = vcombine.high %v218_v35, %v222_v38  ;;  %v7182_v9 = vcombine.high %v219_v39, %v223_v40  ;;  %v270_v29 = vld [vmem:[#allocation4 + $0x470] sm:$0xff]  ;;  %v271_v30 = vld [vmem:[#allocation4 + $0x478] sm:$0xff] }
 0x193   :  { %3637 = vmatpush1.bf16.msra.mxu0 %v7123_v49  ;;  %3801 = vmatpush1.bf16.msra.mxu1 %v7125_v50  ;;  %v7179_v49 = vcombine.low %v218_v35, %v222_v38  ;;  %v7181_v50 = vcombine.low %v219_v39, %v223_v40  ;;  %v274_v35 = vld [vmem:[#allocation4 + $0x490] sm:$0xff]  ;;  %v275_v39 = vld [vmem:[#allocation4 + $0x498] sm:$0xff] }
 0x194   :  { %3638 = vmatprep.subr.bf16.mxu0 %v7132_v51  ;;  %3802 = vmatprep.subr.bf16.mxu1 %v7134_v52  ;;  %v7188_v51 = vcombine.high %v226_v46, %v230_v53  ;;  %v7190_v52 = vcombine.high %v227_v47, %v231_v48  ;;  %v278_v38 = vld [vmem:[#allocation4 + $0x4b0] sm:$0xff]  ;;  %v279_v40 = vld [vmem:[#allocation4 + $0x4b8] sm:$0xff] }
 0x197   :  { %3639 = vmatpush1.bf16.msra.mxu0 %v7131_v58  ;;  %3803 = vmatpush1.bf16.msra.mxu1 %v7133_v60  ;;  %v7187_v58 = vcombine.low %v226_v46, %v230_v53  ;;  %v7189_v60 = vcombine.low %v227_v47, %v231_v48  ;;  %v282_v46 = vld [vmem:[#allocation4 + $0x4d0] sm:$0xff]  ;;  %v283_v47 = vld [vmem:[#allocation4 + $0x4d8] sm:$0xff] }
 0x198   :  { %3640 = vmatprep.subr.bf16.mxu0 %v7140_v61  ;;  %3804 = vmatprep.subr.bf16.mxu1 %v7142_v62  ;;  %v7196_v61 = vcombine.high %v234_v54, %v238_v55  ;;  %v7198_v62 = vcombine.high %v235_v56, %v239_v57  ;;  %v286_v53 = vld [vmem:[#allocation4 + $0x4f0] sm:$0xff]  ;;  %v287_v48 = vld [vmem:[#allocation4 + $0x4f8] sm:$0xff] }
 0x19b   :  { %3641 = vmatpush1.bf16.msra.mxu0 %v7139_v5  ;;  %3805 = vmatpush1.bf16.msra.mxu1 %v7141_v6  ;;  %v7195_v5 = vcombine.low %v234_v54, %v238_v55  ;;  %v7197_v6 = vcombine.low %v235_v56, %v239_v57  ;;  %v294_v54 = vld [vmem:[#allocation4 + $0x530] sm:$0xff]  ;;  %v291_v55 = vld [vmem:[#allocation4 + $0x518] sm:$0xff]  ;;  %v7243_v57 = vcombine.low %v282_v46, %v286_v53 }
 0x19c   :  { %3642 = vmatprep.subr.bf16.mxu0 %v7148_v7  ;;  %3806 = vmatprep.subr.bf16.mxu1 %v7150_v8  ;;  %v7204_v7 = vcombine.high %v242_v0, %v246_v1  ;;  %v7206_v8 = vcombine.high %v243_v2, %v247_v3  ;;  %v295_v56 = vld [vmem:[#allocation4 + $0x538] sm:$0xff] }
 0x19f   :  { %3643 = vmatpush1.bf16.msra.mxu0 %v7147_v15  ;;  %3807 = vmatpush1.bf16.msra.mxu1 %v7149_v16  ;;  %v7203_v15 = vcombine.low %v242_v0, %v246_v1  ;;  %v7205_v16 = vcombine.low %v243_v2, %v247_v3  ;;  %v299_v0 = vld [vmem:[#allocation4 + $0x558] sm:$0xff]  ;;  %v7253_v3 = vcombine.low %v291_v55, %v295_v56 }
 0x1a0   :  { %3644 = vmatprep.subr.bf16.mxu0 %v7156_v17  ;;  %3808 = vmatprep.subr.bf16.mxu1 %v7158_v18  ;;  %v7212_v17 = vcombine.high %v250_v10, %v254_v11  ;;  %v7214_v18 = vcombine.high %v251_v12, %v255_v13  ;;  %v303_v1 = vld [vmem:[#allocation4 + $0x578] sm:$0xff] }
 0x1a3   :  { %3645 = vmatpush1.bf16.msra.mxu0 %v7155_v23  ;;  %3809 = vmatpush1.bf16.msra.mxu1 %v7157_v24  ;;  %v7211_v23 = vcombine.low %v250_v10, %v254_v11  ;;  %v7213_v24 = vcombine.low %v251_v12, %v255_v13  ;;  %v307_v10 = vld [vmem:[#allocation4 + $0x598] sm:$0xff]  ;;  %v7261_v13 = vcombine.low %v299_v0, %v303_v1 }
 0x1a4   :  { %3646 = vmatprep.subr.bf16.mxu0 %v7164_v26  ;;  %3810 = vmatprep.subr.bf16.mxu1 %v7166_v27  ;;  %v7220_v26 = vcombine.high %v258_v19, %v262_v20  ;;  %v7222_v27 = vcombine.high %v259_v21, %v263_v22  ;;  %v311_v11 = vld [vmem:[#allocation4 + $0x5b8] sm:$0xff] }
 0x1a7   :  { %3647 = vmatpush1.bf16.msra.mxu0 %v7163_v31  ;;  %3811 = vmatpush1.bf16.msra.mxu1 %v7165_v32  ;;  %v7219_v31 = vcombine.low %v258_v19, %v262_v20  ;;  %v7221_v32 = vcombine.low %v259_v21, %v263_v22  ;;  %v315_v19 = vld [vmem:[#allocation4 + $0x5d8] sm:$0xff]  ;;  %v7269_v22 = vcombine.low %v307_v10, %v311_v11 }
 0x1a8   :  { %3648 = vmatprep.subr.bf16.mxu0 %v7172_v33  ;;  %3812 = vmatprep.subr.bf16.mxu1 %v7174_v34  ;;  %v7228_v33 = vcombine.high %v266_v28, %v270_v29  ;;  %v7230_v34 = vcombine.high %v267_v59, %v271_v30  ;;  %v319_v20 = vld [vmem:[#allocation4 + $0x5f8] sm:$0xff] }
 0x1ab   :  { %3649 = vmatpush1.bf16.msra.mxu0 %v7171_v41  ;;  %3813 = vmatpush1.bf16.msra.mxu1 %v7173_v44  ;;  %v7227_v41 = vcombine.low %v266_v28, %v270_v29  ;;  %v7229_v44 = vcombine.low %v267_v59, %v271_v30  ;;  %v323_v28 = vld [vmem:[#allocation4 + $0x618] sm:$0xff]  ;;  %v7277_v30 = vcombine.low %v315_v19, %v319_v20 }
 0x1ac   :  { %3650 = vmatprep.subr.bf16.mxu0 %v7180_v45  ;;  %3814 = vmatprep.subr.bf16.mxu1 %v7182_v9  ;;  %v7236_v45 = vcombine.high %v274_v35, %v278_v38  ;;  %v7238_v9 = vcombine.high %v275_v39, %v279_v40  ;;  %v327_v29 = vld [vmem:[#allocation4 + $0x638] sm:$0xff] }
 0x1af   :  { %3651 = vmatpush1.bf16.msra.mxu0 %v7179_v49  ;;  %3815 = vmatpush1.bf16.msra.mxu1 %v7181_v50  ;;  %v7235_v49 = vcombine.low %v274_v35, %v278_v38  ;;  %v7244_v50 = vcombine.high %v282_v46, %v286_v53  ;;  %v331_v35 = vld [vmem:[#allocation4 + $0x658] sm:$0xff] }
 0x1b0   :  { %3652 = vmatprep.subr.bf16.mxu0 %v7188_v51  ;;  %3816 = vmatprep.subr.bf16.mxu1 %v7190_v52  ;;  %v7246_v51 = vcombine.high %v283_v47, %v287_v48  ;;  %v290_v52 = vld [vmem:[#allocation4 + $0x510] sm:$0xff]  ;;  %v335_v38 = vld [vmem:[#allocation4 + $0x678] sm:$0xff] }
 0x1b1   :  { %v7251_v2 = vcombine.low %v290_v52, %v294_v54  ;;  %v339_v46 = vld [vmem:[#allocation4 + $0x698] sm:$0xff] }
 0x1b2   :  { %v343_v53 = vld [vmem:[#allocation4 + $0x6b8] sm:$0xff] }
 0x1b3   :  { %3653 = vmatpush1.bf16.msra.mxu0 %v7187_v58  ;;  %3817 = vmatpush1.bf16.msra.mxu1 %v7189_v60  ;;  %v7245_v58 = vcombine.low %v283_v47, %v287_v48  ;;  %v7252_v60 = vcombine.high %v290_v52, %v294_v54  ;;  %v7293_v48 = vcombine.low %v331_v35, %v335_v38  ;;  %v347_v52 = vld [vmem:[#allocation4 + $0x6d8] sm:$0xff] }
 0x1b4   :  { %3654 = vmatprep.subr.bf16.mxu0 %v7196_v61  ;;  %3818 = vmatprep.subr.bf16.mxu1 %v7198_v62  ;;  %v298_v61 = vld [vmem:[#allocation4 + $0x550] sm:$0xff]  ;;  %v351_v54 = vld [vmem:[#allocation4 + $0x6f8] sm:$0xff] }
 0x1b5   :  { %v302_v62 = vld [vmem:[#allocation4 + $0x570] sm:$0xff] }
 0x1b6   :  { %v7259_v12 = vcombine.low %v298_v61, %v302_v62 }
 0x1b7   :  { %3655 = vmatpush1.bf16.msra.mxu0 %v7195_v5  ;;  %3819 = vmatpush1.bf16.msra.mxu1 %v7197_v6  ;;  %v7260_v5 = vcombine.high %v298_v61, %v302_v62  ;;  %v7262_v6 = vcombine.high %v299_v0, %v303_v1  ;;  %v355_v61 = vld [vmem:[#allocation4 + $0x718] sm:$0xff]  ;;  %v7309_v1 = vcombine.low %v347_v52, %v351_v54 }
 0x1b8   :  { %3656 = vmatprep.subr.bf16.mxu0 %v7204_v7  ;;  %3820 = vmatprep.subr.bf16.mxu1 %v7206_v8  ;;  %v306_v7 = vld [vmem:[#allocation4 + $0x590] sm:$0xff]  ;;  %v359_v62 = vld [vmem:[#allocation4 + $0x738] sm:$0xff] }
 0x1b9   :  { %v310_v8 = vld [vmem:[#allocation4 + $0x5b0] sm:$0xff] }
 0x1ba   :  { %v7267_v21 = vcombine.low %v306_v7, %v310_v8 }
 0x1bb   :  { %3657 = vmatpush1.bf16.msra.mxu0 %v7203_v15  ;;  %3821 = vmatpush1.bf16.msra.mxu1 %v7205_v16  ;;  %v7268_v15 = vcombine.high %v306_v7, %v310_v8  ;;  %v7270_v16 = vcombine.high %v307_v10, %v311_v11  ;;  %v363_v7 = vld [vmem:[#allocation4 + $0x758] sm:$0xff]  ;;  %v7317_v11 = vcombine.low %v355_v61, %v359_v62 }
 0x1bc   :  { %3658 = vmatprep.subr.bf16.mxu0 %v7212_v17  ;;  %3822 = vmatprep.subr.bf16.mxu1 %v7214_v18  ;;  %v314_v17 = vld [vmem:[#allocation4 + $0x5d0] sm:$0xff]  ;;  %v367_v8 = vld [vmem:[#allocation4 + $0x778] sm:$0xff] }
 0x1bd   :  { %v318_v18 = vld [vmem:[#allocation4 + $0x5f0] sm:$0xff] }
 0x1be   :  { %v7275_v59 = vcombine.low %v314_v17, %v318_v18 }
 0x1bf   :  { %3659 = vmatpush1.bf16.msra.mxu0 %v7211_v23  ;;  %3823 = vmatpush1.bf16.msra.mxu1 %v7213_v24  ;;  %v7276_v23 = vcombine.high %v314_v17, %v318_v18  ;;  %v7278_v24 = vcombine.high %v315_v19, %v319_v20  ;;  %v371_v17 = vld [vmem:[#allocation4 + $0x798] sm:$0xff]  ;;  %v7325_v20 = vcombine.low %v363_v7, %v367_v8 }
 0x1c0   :  { %3669 = vmatprep.subr.bf16.mxu0 %v7220_v26  ;;  %3833 = vmatprep.subr.bf16.mxu1 %v7222_v27  ;;  %v322_v26 = vld [vmem:[#allocation4 + $0x610] sm:$0xff]  ;;  %v375_v18 = vld [vmem:[#allocation4 + $0x7b8] sm:$0xff] }
 0x1c1   :  { %v326_v27 = vld [vmem:[#allocation4 + $0x630] sm:$0xff] }
 0x1c2   :  { %3661 = vmatmul.mubr.bf16.vlgmr.msra.gmra.mrb[4].mxu0 %v9023_v25  ;;  %3825 = vmatmul.mubr.bf16.vlgmr.msra.gmra.mrb[4].mxu1 %v9023_v25  ;;  %v7237_v25 = vcombine.low %v275_v39, %v279_v40  ;;  %v7283_v39 = vcombine.low %v322_v26, %v326_v27  ;;  %v7285_v40 = vcombine.low %v323_v28, %v327_v29 }
 0x1c3   :  { %3670 = vmatpush1.bf16.msra.mxu0 %v7219_v31  ;;  %3834 = vmatpush1.bf16.msra.mxu1 %v7221_v32  ;;  %v7284_v31 = vcombine.high %v322_v26, %v326_v27  ;;  %v7286_v32 = vcombine.high %v323_v28, %v327_v29  ;;  %v379_v26 = vld [vmem:[#allocation4 + $0x7d8] sm:$0xff]  ;;  %v7333_v29 = vcombine.low %v371_v17, %v375_v18 }
 0x1c4   :  { %3671 = vmatprep.subr.bf16.mxu0 %v7228_v33  ;;  %3835 = vmatprep.subr.bf16.mxu1 %v7230_v34  ;;  %v330_v33 = vld [vmem:[#allocation4 + $0x650] sm:$0xff]  ;;  %v383_v27 = vld [vmem:[#allocation4 + $0x7f8] sm:$0xff] }
 0x1c5   :  { %3701 = vmatprep.mubr.bf16.mxu0 %v9027_v36  ;;  %3865 = vmatprep.mubr.bf16.mxu1 %v9027_v36  ;;  %v7254_v36 = vcombine.high %v291_v55, %v295_v56  ;;  %v334_v34 = vld [vmem:[#allocation4 + $0x670] sm:$0xff]  ;;  %v7301_v56 = vcombine.low %v339_v46, %v343_v53 }
 0x1c6   :  { %v7291_v47 = vcombine.low %v330_v33, %v334_v34 }
 0x1c7   :  { %3672 = vmatpush1.bf16.msra.mxu0 %v7227_v41  ;;  %3836 = vmatpush1.bf16.msra.mxu1 %v7229_v44  ;;  %v7292_v41 = vcombine.high %v330_v33, %v334_v34  ;;  %v7294_v44 = vcombine.high %v331_v35, %v335_v38  ;;  %v387_v33 = vld [vmem:[#allocation4 + $0x818] sm:$0xff]  ;;  %v7341_v38 = vcombine.low %v379_v26, %v383_v27 }
 0x1c8   :  { %3673 = vmatprep.subr.bf16.mxu0 %v7236_v45  ;;  %3837 = vmatprep.subr.bf16.mxu1 %v7238_v9  ;;  %v338_v45 = vld [vmem:[#allocation4 + $0x690] sm:$0xff]  ;;  %v391_v34 = vld [vmem:[#allocation4 + $0x838] sm:$0xff] }
 0x1c9   :  { %v342_v9 = vld [vmem:[#allocation4 + $0x6b0] sm:$0xff] }
 0x1ca   :  { %v7299_v55 = vcombine.low %v338_v45, %v342_v9 }
 0x1cb   :  { %3674 = vmatpush1.bf16.msra.mxu0 %v7235_v49  ;;  %3838 = vmatpush1.bf16.msra.mxu1 %v7237_v25  ;;  %v7300_v49 = vcombine.high %v338_v45, %v342_v9  ;;  %v7302_v25 = vcombine.high %v339_v46, %v343_v53  ;;  %v395_v45 = vld [vmem:[#allocation4 + $0x858] sm:$0xff]  ;;  %v7349_v53 = vcombine.low %v387_v33, %v391_v34 }
 0x1cc   :  { %3675 = vmatprep.subr.bf16.mxu0 %v7244_v50  ;;  %3839 = vmatprep.subr.bf16.mxu1 %v7246_v51  ;;  %v346_v50 = vld [vmem:[#allocation4 + $0x6d0] sm:$0xff]  ;;  %v399_v9 = vld [vmem:[#allocation4 + $0x878] sm:$0xff] }
 0x1cd   :  { %v350_v51 = vld [vmem:[#allocation4 + $0x6f0] sm:$0xff] }
 0x1ce   :  { %v7307_v0 = vcombine.low %v346_v50, %v350_v51 }
 0x1cf   :  { %3676 = vmatpush1.bf16.msra.mxu0 %v7243_v57  ;;  %3840 = vmatpush1.bf16.msra.mxu1 %v7245_v58  ;;  %v7308_v57 = vcombine.high %v346_v50, %v350_v51  ;;  %v7310_v58 = vcombine.high %v347_v52, %v351_v54  ;;  %v403_v50 = vld [vmem:[#allocation4 + $0x898] sm:$0xff]  ;;  %v7357_v54 = vcombine.low %v395_v45, %v399_v9 }
 0x1d0   :  { %3677 = vmatprep.subr.bf16.mxu0 %v7252_v60  ;;  %3841 = vmatprep.subr.bf16.mxu1 %v7254_v36  ;;  %v354_v60 = vld [vmem:[#allocation4 + $0x710] sm:$0xff]  ;;  %v407_v51 = vld [vmem:[#allocation4 + $0x8b8] sm:$0xff] }
 0x1d1   :  { %v358_v36 = vld [vmem:[#allocation4 + $0x730] sm:$0xff] }
 0x1d2   :  { %v7315_v10 = vcombine.low %v354_v60, %v358_v36 }
 0x1d3   :  { %3678 = vmatpush1.bf16.msra.mxu0 %v7251_v2  ;;  %3842 = vmatpush1.bf16.msra.mxu1 %v7253_v3  ;;  %v7316_v2 = vcombine.high %v354_v60, %v358_v36  ;;  %v7318_v3 = vcombine.high %v355_v61, %v359_v62  ;;  %v411_v60 = vld [vmem:[#allocation4 + $0x8d8] sm:$0xff] }
 0x1d4   :  { %3679 = vmatprep.subr.bf16.mxu0 %v7260_v5  ;;  %3843 = vmatprep.subr.bf16.mxu1 %v7262_v6  ;;  %v362_v5 = vld [vmem:[#allocation4 + $0x750] sm:$0xff]  ;;  %v415_v36 = vld [vmem:[#allocation4 + $0x8f8] sm:$0xff] }
 0x1d5   :  { %v366_v6 = vld [vmem:[#allocation4 + $0x770] sm:$0xff] }
 0x1d6   :  { %v7323_v19 = vcombine.low %v362_v5, %v366_v6 }
 0x1d7   :  { %3680 = vmatpush1.bf16.msra.mxu0 %v7259_v12  ;;  %3844 = vmatpush1.bf16.msra.mxu1 %v7261_v13  ;;  %v7324_v12 = vcombine.high %v362_v5, %v366_v6  ;;  %v7326_v13 = vcombine.high %v363_v7, %v367_v8  ;;  %v423_v5 = vld [vmem:[#allocation4 + $0x938] sm:$0xff]  ;;  %v7373_v7 = vcombine.low %v411_v60, %v415_v36 }
 0x1d8   :  { %3681 = vmatprep.subr.bf16.mxu0 %v7268_v15  ;;  %3845 = vmatprep.subr.bf16.mxu1 %v7270_v16  ;;  %v370_v15 = vld [vmem:[#allocation4 + $0x790] sm:$0xff] }
 0x1d9   :  { %v374_v16 = vld [vmem:[#allocation4 + $0x7b0] sm:$0xff] }
 0x1da   :  { %v7331_v28 = vcombine.low %v370_v15, %v374_v16 }
 0x1db   :  { %3682 = vmatpush1.bf16.msra.mxu0 %v7267_v21  ;;  %3846 = vmatpush1.bf16.msra.mxu1 %v7269_v22  ;;  %v7332_v21 = vcombine.high %v370_v15, %v374_v16  ;;  %v7334_v22 = vcombine.high %v371_v17, %v375_v18 }
 0x1dc   :  { %3683 = vmatprep.subr.bf16.mxu0 %v7276_v23  ;;  %3847 = vmatprep.subr.bf16.mxu1 %v7278_v24  ;;  %v378_v23 = vld [vmem:[#allocation4 + $0x7d0] sm:$0xff] }
 0x1dd   :  { %v382_v24 = vld [vmem:[#allocation4 + $0x7f0] sm:$0xff] }
 0x1de   :  { %v7339_v35 = vcombine.low %v378_v23, %v382_v24 }
 0x1df   :  { %3684 = vmatpush1.bf16.msra.mxu0 %v7275_v59  ;;  %3848 = vmatpush1.bf16.msra.mxu1 %v7277_v30  ;;  %v7340_v59 = vcombine.high %v378_v23, %v382_v24  ;;  %v7342_v30 = vcombine.high %v379_v26, %v383_v27 }
 0x1e0   :  { %3685 = vmatprep.subr.bf16.mxu0 %v7284_v31  ;;  %3849 = vmatprep.subr.bf16.mxu1 %v7286_v32  ;;  %v386_v31 = vld [vmem:[#allocation4 + $0x810] sm:$0xff] }
 0x1e1   :  { %v390_v32 = vld [vmem:[#allocation4 + $0x830] sm:$0xff] }
 0x1e2   :  { %v7347_v46 = vcombine.low %v386_v31, %v390_v32 }
 0x1e3   :  { %3686 = vmatpush1.bf16.msra.mxu0 %v7283_v39  ;;  %3850 = vmatpush1.bf16.msra.mxu1 %v7285_v40  ;;  %v7348_v39 = vcombine.high %v386_v31, %v390_v32  ;;  %v7350_v40 = vcombine.high %v387_v33, %v391_v34 }
 0x1e4   :  { %3687 = vmatprep.subr.bf16.mxu0 %v7292_v41  ;;  %3851 = vmatprep.subr.bf16.mxu1 %v7294_v44  ;;  %v394_v41 = vld [vmem:[#allocation4 + $0x850] sm:$0xff] }
 0x1e5   :  { %v398_v44 = vld [vmem:[#allocation4 + $0x870] sm:$0xff] }
 0x1e6   :  { %v7355_v52 = vcombine.low %v394_v41, %v398_v44 }
 0x1e7   :  { %3688 = vmatpush1.bf16.msra.mxu0 %v7291_v47  ;;  %3852 = vmatpush1.bf16.msra.mxu1 %v7293_v48  ;;  %v7356_v47 = vcombine.high %v394_v41, %v398_v44  ;;  %v7358_v48 = vcombine.high %v395_v45, %v399_v9 }
 0x1e8   :  { %3689 = vmatprep.subr.bf16.mxu0 %v7300_v49  ;;  %3853 = vmatprep.subr.bf16.mxu1 %v7302_v25  ;;  %v402_v49 = vld [vmem:[#allocation4 + $0x890] sm:$0xff] }
 0x1e9   :  { %v406_v25 = vld [vmem:[#allocation4 + $0x8b0] sm:$0xff] }
 0x1ea   :  { %v7363_v61 = vcombine.low %v402_v49, %v406_v25 }
 0x1eb   :  { %3690 = vmatpush1.bf16.msra.mxu0 %v7299_v55  ;;  %3854 = vmatpush1.bf16.msra.mxu1 %v7301_v56  ;;  %v7364_v55 = vcombine.high %v402_v49, %v406_v25  ;;  %v7366_v56 = vcombine.high %v403_v50, %v407_v51 }
 0x1ec   :  { %3691 = vmatprep.subr.bf16.mxu0 %v7308_v57  ;;  %3855 = vmatprep.subr.bf16.mxu1 %v7310_v58  ;;  %v410_v57 = vld [vmem:[#allocation4 + $0x8d0] sm:$0xff] }
 0x1ed   :  { %v414_v58 = vld [vmem:[#allocation4 + $0x8f0] sm:$0xff] }
 0x1ee   :  { %v7372_v62 = vcombine.high %v410_v57, %v414_v58  ;;  %v7371_v6 = vcombine.low %v410_v57, %v414_v58 }
 0x1ef   :  { %3692 = vmatpush1.bf16.msra.mxu0 %v7307_v0  ;;  %3856 = vmatpush1.bf16.msra.mxu1 %v7309_v1  ;;  %v7374_v0 = vcombine.high %v411_v60, %v415_v36  ;;  %v418_v1 = vld [vmem:[#allocation4 + $0x910] sm:$0xff] }
 0x1f0   :  { %3693 = vmatprep.subr.bf16.mxu0 %v7316_v2  ;;  %3857 = vmatprep.subr.bf16.mxu1 %v7318_v3  ;;  %v422_v2 = vld [vmem:[#allocation4 + $0x930] sm:$0xff]  ;;  %v419_v3 = vld [vmem:[#allocation4 + $0x918] sm:$0xff] }
 0x1f1   :  { %v7380_v8 = vcombine.high %v418_v1, %v422_v2  ;;  %v7379_v15 = vcombine.low %v418_v1, %v422_v2  ;;  %v7381_v16 = vcombine.low %v419_v3, %v423_v5 }
 0x1f3   :  { %3694 = vmatpush1.bf16.msra.mxu0 %v7315_v10  ;;  %3858 = vmatpush1.bf16.msra.mxu1 %v7317_v11  ;;  %v426_v10 = vld [vmem:[#allocation4 + $0x950] sm:$0xff] }
 0x1f4   :  { %3695 = vmatprep.subr.bf16.mxu0 %v7324_v12  ;;  %3859 = vmatprep.subr.bf16.mxu1 %v7326_v13  ;;  %v430_v11 = vld [vmem:[#allocation4 + $0x970] sm:$0xff]  ;;  %v427_v12 = vld [vmem:[#allocation4 + $0x958] sm:$0xff] }
 0x1f5   :  { %v431_v13 = vld [vmem:[#allocation4 + $0x978] sm:$0xff]  ;;  %v7388_v17 = vcombine.high %v426_v10, %v430_v11  ;;  %v7387_v23 = vcombine.low %v426_v10, %v430_v11 }
 0x1f6   :  { %v7390_v18 = vcombine.high %v427_v12, %v431_v13  ;;  %v7389_v24 = vcombine.low %v427_v12, %v431_v13 }
 0x1f7   :  { %3696 = vmatpush1.bf16.msra.mxu0 %v7323_v19  ;;  %3860 = vmatpush1.bf16.msra.mxu1 %v7325_v20  ;;  %v434_v19 = vld [vmem:[#allocation4 + $0x990] sm:$0xff] }
 0x1f8   :  { %3697 = vmatprep.subr.bf16.mxu0 %v7332_v21  ;;  %3861 = vmatprep.subr.bf16.mxu1 %v7334_v22  ;;  %v438_v20 = vld [vmem:[#allocation4 + $0x9b0] sm:$0xff]  ;;  %v435_v21 = vld [vmem:[#allocation4 + $0x998] sm:$0xff] }
 0x1f9   :  { %v439_v22 = vld [vmem:[#allocation4 + $0x9b8] sm:$0xff]  ;;  %v7396_v26 = vcombine.high %v434_v19, %v438_v20  ;;  %v7395_v31 = vcombine.low %v434_v19, %v438_v20 }
 0x1fa   :  { %v7398_v27 = vcombine.high %v435_v21, %v439_v22  ;;  %v7397_v32 = vcombine.low %v435_v21, %v439_v22 }
 0x1fb   :  { %3698 = vmatpush1.bf16.msra.mxu0 %v7331_v28  ;;  %3862 = vmatpush1.bf16.msra.mxu1 %v7333_v29  ;;  %v442_v28 = vld [vmem:[#allocation4 + $0x9d0] sm:$0xff] }
 0x1fc   :  { %3699 = vmatprep.subr.bf16.mxu0 %v7340_v59  ;;  %3863 = vmatprep.subr.bf16.mxu1 %v7342_v30  ;;  %v446_v29 = vld [vmem:[#allocation4 + $0x9f0] sm:$0xff]  ;;  %v443_v59 = vld [vmem:[#allocation4 + $0x9d8] sm:$0xff] }
 0x1fd   :  { %v447_v30 = vld [vmem:[#allocation4 + $0x9f8] sm:$0xff]  ;;  %v7404_v33 = vcombine.high %v442_v28, %v446_v29  ;;  %v7403_v41 = vcombine.low %v442_v28, %v446_v29 }
 0x1fe   :  { %v7406_v34 = vcombine.high %v443_v59, %v447_v30  ;;  %v7405_v44 = vcombine.low %v443_v59, %v447_v30 }
 0x1ff   :  { %3700 = vmatpush1.bf16.msra.mxu0 %v7339_v35  ;;  %3864 = vmatpush1.bf16.msra.mxu1 %v7341_v38  ;;  %v450_v35 = vld [vmem:[#allocation4 + $0xa10] sm:$0xff] }
 0x200   :  { %3710 = vmatprep.subr.bf16.mxu0 %v7348_v39  ;;  %3874 = vmatprep.subr.bf16.mxu1 %v7350_v40  ;;  %v454_v38 = vld [vmem:[#allocation4 + $0xa30] sm:$0xff]  ;;  %v451_v39 = vld [vmem:[#allocation4 + $0xa18] sm:$0xff] }
 0x201   :  { %v455_v40 = vld [vmem:[#allocation4 + $0xa38] sm:$0xff]  ;;  %v7412_v45 = vcombine.high %v450_v35, %v454_v38  ;;  %v7411_v49 = vcombine.low %v450_v35, %v454_v38 }
 0x202   :  { %3702 = vmatmul.mubr.bf16.vlgmr.msra.gmra.mrb[4].mxu0 %v9041_v42  ;;  %3866 = vmatmul.mubr.bf16.vlgmr.msra.gmra.mrb[4].mxu1 %v9041_v42  ;;  %v7365_v42 = vcombine.low %v403_v50, %v407_v51  ;;  %v7414_v9 = vcombine.high %v451_v39, %v455_v40  ;;  %v7413_v25 = vcombine.low %v451_v39, %v455_v40 }
 0x203   :  { %3711 = vmatpush1.bf16.msra.mxu0 %v7347_v46  ;;  %3875 = vmatpush1.bf16.msra.mxu1 %v7349_v53  ;;  %v458_v46 = vld [vmem:[#allocation4 + $0xa50] sm:$0xff] }
 0x204   :  { %3712 = vmatprep.subr.bf16.mxu0 %v7356_v47  ;;  %3876 = vmatprep.subr.bf16.mxu1 %v7358_v48  ;;  %v462_v53 = vld [vmem:[#allocation4 + $0xa70] sm:$0xff]  ;;  %v459_v47 = vld [vmem:[#allocation4 + $0xa58] sm:$0xff] }
 0x205   :  { %3742 = vmatprep.mubr.bf16.mxu0 %v9030_v63  ;;  %3906 = vmatprep.mubr.bf16.mxu1 %v9030_v63  ;;  %v7382_v63 = vcombine.high %v419_v3, %v423_v5  ;;  %v463_v48 = vld [vmem:[#allocation4 + $0xa78] sm:$0xff]  ;;  %v7420_v50 = vcombine.high %v458_v46, %v462_v53  ;;  %v7419_v57 = vcombine.low %v458_v46, %v462_v53 }
 0x206   :  { %v7422_v51 = vcombine.high %v459_v47, %v463_v48  ;;  %v7421_v58 = vcombine.low %v459_v47, %v463_v48 }
 0x207   :  { %3713 = vmatpush1.bf16.msra.mxu0 %v7355_v52  ;;  %3877 = vmatpush1.bf16.msra.mxu1 %v7357_v54  ;;  %v466_v52 = vld [vmem:[#allocation4 + $0xa90] sm:$0xff] }
 0x208   :  { %3714 = vmatprep.subr.bf16.mxu0 %v7364_v55  ;;  %3878 = vmatprep.subr.bf16.mxu1 %v7366_v56  ;;  %v470_v54 = vld [vmem:[#allocation4 + $0xab0] sm:$0xff]  ;;  %v467_v55 = vld [vmem:[#allocation4 + $0xa98] sm:$0xff] }
 0x209   :  { %v471_v56 = vld [vmem:[#allocation4 + $0xab8] sm:$0xff]  ;;  %v7428_v60 = vcombine.high %v466_v52, %v470_v54  ;;  %v7427_v1 = vcombine.low %v466_v52, %v470_v54 }
 0x20a   :  { %v7430_v36 = vcombine.high %v467_v55, %v471_v56  ;;  %v7429_v2 = vcombine.low %v467_v55, %v471_v56 }
 0x20b   :  { %3715 = vmatpush1.bf16.msra.mxu0 %v7363_v61  ;;  %3879 = vmatpush1.bf16.msra.mxu1 %v7365_v42  ;;  %v474_v61 = vld [vmem:[#allocation4 + $0xad0] sm:$0xff] }
 0x20c   :  { %3716 = vmatprep.subr.bf16.mxu0 %v7372_v62  ;;  %3880 = vmatprep.subr.bf16.mxu1 %v7374_v0  ;;  %v478_v42 = vld [vmem:[#allocation4 + $0xaf0] sm:$0xff]  ;;  %v475_v62 = vld [vmem:[#allocation4 + $0xad8] sm:$0xff] }
 0x20d   :  { %v479_v0 = vld [vmem:[#allocation4 + $0xaf8] sm:$0xff]  ;;  %v7436_v3 = vcombine.high %v474_v61, %v478_v42  ;;  %v7435_v10 = vcombine.low %v474_v61, %v478_v42 }
 0x20e   :  { %v7438_v5 = vcombine.high %v475_v62, %v479_v0  ;;  %v7437_v11 = vcombine.low %v475_v62, %v479_v0 }
 0x20f   :  { %3717 = vmatpush1.bf16.msra.mxu0 %v7371_v6  ;;  %3881 = vmatpush1.bf16.msra.mxu1 %v7373_v7  ;;  %v482_v6 = vld [vmem:[#allocation4 + $0xb10] sm:$0xff] }
 0x210   :  { %3718 = vmatprep.subr.bf16.mxu0 %v7380_v8  ;;  %3882 = vmatprep.subr.bf16.mxu1 %v7382_v63  ;;  %v486_v7 = vld [vmem:[#allocation4 + $0xb30] sm:$0xff]  ;;  %v483_v8 = vld [vmem:[#allocation4 + $0xb18] sm:$0xff] }
 0x211   :  { %v487_v63 = vld [vmem:[#allocation4 + $0xb38] sm:$0xff]  ;;  %v7444_v12 = vcombine.high %v482_v6, %v486_v7  ;;  %v7443_v19 = vcombine.low %v482_v6, %v486_v7 }
 0x212   :  { %v7446_v13 = vcombine.high %v483_v8, %v487_v63  ;;  %v7445_v20 = vcombine.low %v483_v8, %v487_v63  ;;  %v546_v63 = vld [vmem:[#allocation4 + $0xd10] sm:$0xff] }
 0x213   :  { %3719 = vmatpush1.bf16.msra.mxu0 %v7379_v15  ;;  %3883 = vmatpush1.bf16.msra.mxu1 %v7381_v16  ;;  %v490_v15 = vld [vmem:[#allocation4 + $0xb50] sm:$0xff] }
 0x214   :  { %3720 = vmatprep.subr.bf16.mxu0 %v7388_v17  ;;  %3884 = vmatprep.subr.bf16.mxu1 %v7390_v18  ;;  %v494_v16 = vld [vmem:[#allocation4 + $0xb70] sm:$0xff]  ;;  %v491_v17 = vld [vmem:[#allocation4 + $0xb58] sm:$0xff] }
 0x215   :  { %v495_v18 = vld [vmem:[#allocation4 + $0xb78] sm:$0xff]  ;;  %v7452_v21 = vcombine.high %v490_v15, %v494_v16  ;;  %v7451_v28 = vcombine.low %v490_v15, %v494_v16 }
 0x216   :  { %v7454_v22 = vcombine.high %v491_v17, %v495_v18  ;;  %v7453_v29 = vcombine.low %v491_v17, %v495_v18  ;;  %v554_v17 = vld [vmem:[#allocation4 + $0xd50] sm:$0xff] }
 0x217   :  { %3721 = vmatpush1.bf16.msra.mxu0 %v7387_v23  ;;  %3885 = vmatpush1.bf16.msra.mxu1 %v7389_v24  ;;  %v498_v23 = vld [vmem:[#allocation4 + $0xb90] sm:$0xff] }
 0x218   :  { %3722 = vmatprep.subr.bf16.mxu0 %v7396_v26  ;;  %3886 = vmatprep.subr.bf16.mxu1 %v7398_v27  ;;  %v502_v24 = vld [vmem:[#allocation4 + $0xbb0] sm:$0xff]  ;;  %v499_v26 = vld [vmem:[#allocation4 + $0xb98] sm:$0xff] }
 0x219   :  { %v503_v27 = vld [vmem:[#allocation4 + $0xbb8] sm:$0xff]  ;;  %v7460_v59 = vcombine.high %v498_v23, %v502_v24  ;;  %v7459_v35 = vcombine.low %v498_v23, %v502_v24  ;;  %v558_v18 = vld [vmem:[#allocation4 + $0xd70] sm:$0xff] }
 0x21a   :  { %v7462_v30 = vcombine.high %v499_v26, %v503_v27  ;;  %v7461_v38 = vcombine.low %v499_v26, %v503_v27  ;;  %v7516_v23 = vcombine.high %v554_v17, %v558_v18  ;;  %v562_v26 = vld [vmem:[#allocation4 + $0xd90] sm:$0xff] }
 0x21b   :  { %3723 = vmatpush1.bf16.msra.mxu0 %v7395_v31  ;;  %3887 = vmatpush1.bf16.msra.mxu1 %v7397_v32  ;;  %v506_v31 = vld [vmem:[#allocation4 + $0xbd0] sm:$0xff] }
 0x21c   :  { %3724 = vmatprep.subr.bf16.mxu0 %v7404_v33  ;;  %3888 = vmatprep.subr.bf16.mxu1 %v7406_v34  ;;  %v510_v32 = vld [vmem:[#allocation4 + $0xbf0] sm:$0xff]  ;;  %v507_v33 = vld [vmem:[#allocation4 + $0xbd8] sm:$0xff] }
 0x21d   :  { %v511_v34 = vld [vmem:[#allocation4 + $0xbf8] sm:$0xff]  ;;  %v7468_v39 = vcombine.high %v506_v31, %v510_v32  ;;  %v7467_v46 = vcombine.low %v506_v31, %v510_v32  ;;  %v566_v27 = vld [vmem:[#allocation4 + $0xdb0] sm:$0xff] }
 0x21e   :  { %v7470_v40 = vcombine.high %v507_v33, %v511_v34  ;;  %v7469_v53 = vcombine.low %v507_v33, %v511_v34  ;;  %v7524_v31 = vcombine.high %v562_v26, %v566_v27  ;;  %v570_v34 = vld [vmem:[#allocation4 + $0xdd0] sm:$0xff] }
 0x21f   :  { %3725 = vmatpush1.bf16.msra.mxu0 %v7403_v41  ;;  %3889 = vmatpush1.bf16.msra.mxu1 %v7405_v44  ;;  %v514_v41 = vld [vmem:[#allocation4 + $0xc10] sm:$0xff] }
 0x220   :  { %3726 = vmatprep.subr.bf16.mxu0 %v7412_v45  ;;  %3890 = vmatprep.subr.bf16.mxu1 %v7414_v9  ;;  %v518_v44 = vld [vmem:[#allocation4 + $0xc30] sm:$0xff]  ;;  %v515_v45 = vld [vmem:[#allocation4 + $0xc18] sm:$0xff] }
 0x221   :  { %v519_v9 = vld [vmem:[#allocation4 + $0xc38] sm:$0xff]  ;;  %v7476_v47 = vcombine.high %v514_v41, %v518_v44  ;;  %v7475_v52 = vcombine.low %v514_v41, %v518_v44 }
 0x222   :  { %v7478_v48 = vcombine.high %v515_v45, %v519_v9  ;;  %v7477_v54 = vcombine.low %v515_v45, %v519_v9  ;;  %v575_v41 = vld [vmem:[#allocation4 + $0xdf8] sm:$0xff]  ;;  %v7523_v9 = vcombine.low %v562_v26, %v566_v27 }
 0x223   :  { %3727 = vmatpush1.bf16.msra.mxu0 %v7411_v49  ;;  %3891 = vmatpush1.bf16.msra.mxu1 %v7413_v25  ;;  %v522_v49 = vld [vmem:[#allocation4 + $0xc50] sm:$0xff] }
 0x224   :  { %3728 = vmatprep.subr.bf16.mxu0 %v7420_v50  ;;  %3892 = vmatprep.subr.bf16.mxu1 %v7422_v51  ;;  %v526_v25 = vld [vmem:[#allocation4 + $0xc70] sm:$0xff]  ;;  %v523_v50 = vld [vmem:[#allocation4 + $0xc58] sm:$0xff] }
 0x225   :  { %v527_v51 = vld [vmem:[#allocation4 + $0xc78] sm:$0xff]  ;;  %v7484_v55 = vcombine.high %v522_v49, %v526_v25  ;;  %v7483_v61 = vcombine.low %v522_v49, %v526_v25 }
 0x226   :  { %v7486_v56 = vcombine.high %v523_v50, %v527_v51  ;;  %v7485_v42 = vcombine.low %v523_v50, %v527_v51  ;;  %v578_v50 = vld [vmem:[#allocation4 + $0xe10] sm:$0xff] }
 0x227   :  { %3729 = vmatpush1.bf16.msra.mxu0 %v7419_v57  ;;  %3893 = vmatpush1.bf16.msra.mxu1 %v7421_v58  ;;  %v530_v57 = vld [vmem:[#allocation4 + $0xc90] sm:$0xff] }
 0x228   :  { %3730 = vmatprep.subr.bf16.mxu0 %v7428_v60  ;;  %3894 = vmatprep.subr.bf16.mxu1 %v7430_v36  ;;  %v534_v58 = vld [vmem:[#allocation4 + $0xcb0] sm:$0xff]  ;;  %v531_v60 = vld [vmem:[#allocation4 + $0xc98] sm:$0xff] }
 0x229   :  { %v535_v36 = vld [vmem:[#allocation4 + $0xcb8] sm:$0xff]  ;;  %v7492_v62 = vcombine.high %v530_v57, %v534_v58  ;;  %v7491_v6 = vcombine.low %v530_v57, %v534_v58  ;;  %v582_v51 = vld [vmem:[#allocation4 + $0xe30] sm:$0xff] }
 0x22a   :  { %v7494_v0 = vcombine.high %v531_v60, %v535_v36  ;;  %v7540_v57 = vcombine.high %v578_v50, %v582_v51 }
 0x22b   :  { %3731 = vmatpush1.bf16.msra.mxu0 %v7427_v1  ;;  %3895 = vmatpush1.bf16.msra.mxu1 %v7429_v2  ;;  %v538_v1 = vld [vmem:[#allocation4 + $0xcd0] sm:$0xff] }
 0x22c   :  { %3732 = vmatprep.subr.bf16.mxu0 %v7436_v3  ;;  %3896 = vmatprep.subr.bf16.mxu1 %v7438_v5  ;;  %v542_v2 = vld [vmem:[#allocation4 + $0xcf0] sm:$0xff]  ;;  %v539_v3 = vld [vmem:[#allocation4 + $0xcd8] sm:$0xff] }
 0x22d   :  { %v543_v5 = vld [vmem:[#allocation4 + $0xcf8] sm:$0xff]  ;;  %v7500_v7 = vcombine.high %v538_v1, %v542_v2 }
 0x22e   :  { %v7502_v8 = vcombine.high %v539_v3, %v543_v5  ;;  %v7501_v15 = vcombine.low %v539_v3, %v543_v5  ;;  %v594_v3 = vld [vmem:[#allocation4 + $0xe90] sm:$0xff] }
 0x22f   :  { %3733 = vmatpush1.bf16.msra.mxu0 %v7435_v10  ;;  %3897 = vmatpush1.bf16.msra.mxu1 %v7437_v11  ;;  %v550_v10 = vld [vmem:[#allocation4 + $0xd30] sm:$0xff]  ;;  %v547_v11 = vld [vmem:[#allocation4 + $0xd18] sm:$0xff] }
 0x230   :  { %3734 = vmatprep.subr.bf16.mxu0 %v7444_v12  ;;  %3898 = vmatprep.subr.bf16.mxu1 %v7446_v13  ;;  %v551_v12 = vld [vmem:[#allocation4 + $0xd38] sm:$0xff]  ;;  %v7499_v13 = vcombine.low %v538_v1, %v542_v2  ;;  %v7508_v16 = vcombine.high %v546_v63, %v550_v10  ;;  %v598_v5 = vld [vmem:[#allocation4 + $0xeb0] sm:$0xff] }
 0x233   :  { %3735 = vmatpush1.bf16.msra.mxu0 %v7443_v19  ;;  %3899 = vmatpush1.bf16.msra.mxu1 %v7445_v20  ;;  %v555_v19 = vld [vmem:[#allocation4 + $0xd58] sm:$0xff] }
 0x234   :  { %3736 = vmatprep.subr.bf16.mxu0 %v7452_v21  ;;  %3900 = vmatprep.subr.bf16.mxu1 %v7454_v22  ;;  %v559_v20 = vld [vmem:[#allocation4 + $0xd78] sm:$0xff]  ;;  %v7507_v21 = vcombine.low %v546_v63, %v550_v10  ;;  %v7509_v22 = vcombine.low %v547_v11, %v551_v12  ;;  %v7556_v63 = vcombine.high %v594_v3, %v598_v5 }
 0x235   :  { %v7518_v24 = vcombine.high %v555_v19, %v559_v20 }
 0x237   :  { %3737 = vmatpush1.bf16.msra.mxu0 %v7451_v28  ;;  %3901 = vmatpush1.bf16.msra.mxu1 %v7453_v29  ;;  %v563_v28 = vld [vmem:[#allocation4 + $0xd98] sm:$0xff] }
 0x238   :  { %3738 = vmatprep.subr.bf16.mxu0 %v7460_v59  ;;  %3902 = vmatprep.subr.bf16.mxu1 %v7462_v30  ;;  %v567_v29 = vld [vmem:[#allocation4 + $0xdb8] sm:$0xff]  ;;  %v7515_v59 = vcombine.low %v554_v17, %v558_v18  ;;  %v7517_v30 = vcombine.low %v555_v19, %v559_v20  ;;  %v610_v19 = vld [vmem:[#allocation4 + $0xf10] sm:$0xff] }
 0x239   :  { %v7526_v33 = vcombine.high %v563_v28, %v567_v29  ;;  %v614_v20 = vld [vmem:[#allocation4 + $0xf30] sm:$0xff] }
 0x23a   :  { %v7572_v26 = vcombine.high %v610_v19, %v614_v20 }
 0x23b   :  { %3739 = vmatpush1.bf16.msra.mxu0 %v7459_v35  ;;  %3903 = vmatpush1.bf16.msra.mxu1 %v7461_v38  ;;  %v574_v35 = vld [vmem:[#allocation4 + $0xdf0] sm:$0xff] }
 0x23c   :  { %3740 = vmatprep.subr.bf16.mxu0 %v7468_v39  ;;  %3904 = vmatprep.subr.bf16.mxu1 %v7470_v40  ;;  %v571_v40 = vld [vmem:[#allocation4 + $0xdd8] sm:$0xff] }
 0x23d   :  { %v7534_v25 = vcombine.high %v571_v40, %v575_v41 }
 0x23f   :  { %3741 = vmatpush1.bf16.msra.mxu0 %v7467_v46  ;;  %3905 = vmatpush1.bf16.msra.mxu1 %v7469_v53 }
 0x240   :  { %3751 = vmatprep.subr.bf16.mxu0 %v7476_v47  ;;  %3915 = vmatprep.subr.bf16.mxu1 %v7478_v48  ;;  %v7525_v47 = vcombine.low %v563_v28, %v567_v29  ;;  %v7532_v48 = vcombine.high %v570_v34, %v574_v35  ;;  %v618_v28 = vld [vmem:[#allocation4 + $0xf50] sm:$0xff] }
 0x241   :  { %v622_v29 = vld [vmem:[#allocation4 + $0xf70] sm:$0xff] }
 0x242   :  { %3743 = vmatmul.mubr.bf16.vlgmr.msra.gmra.mrb[4].mxu0 %v9033_v37  ;;  %3907 = vmatmul.mubr.bf16.vlgmr.msra.gmra.mrb[4].mxu1 %v9033_v37  ;;  %v7493_v37 = vcombine.low %v531_v60, %v535_v36  ;;  %v586_v60 = vld [vmem:[#allocation4 + $0xe50] sm:$0xff] }
 0x243   :  { %3752 = vmatpush1.bf16.msra.mxu0 %v7475_v52  ;;  %3916 = vmatpush1.bf16.msra.mxu1 %v7477_v54  ;;  %v579_v52 = vld [vmem:[#allocation4 + $0xe18] sm:$0xff]  ;;  %v590_v36 = vld [vmem:[#allocation4 + $0xe70] sm:$0xff] }
 0x244   :  { %3753 = vmatprep.subr.bf16.mxu0 %v7484_v55  ;;  %3917 = vmatprep.subr.bf16.mxu1 %v7486_v56  ;;  %v583_v54 = vld [vmem:[#allocation4 + $0xe38] sm:$0xff]  ;;  %v7531_v55 = vcombine.low %v570_v34, %v574_v35  ;;  %v7533_v56 = vcombine.low %v571_v40, %v575_v41  ;;  %v7548_v1 = vcombine.high %v586_v60, %v590_v36  ;;  %v626_v40 = vld [vmem:[#allocation4 + $0xf90] sm:$0xff] }
 0x245   :  { %3783 = vmatprep.mubr.bf16.mxu0 %v9049_v4  ;;  %3947 = vmatprep.mubr.bf16.mxu1 %v9049_v4  ;;  %v7510_v4 = vcombine.high %v547_v11, %v551_v12  ;;  %v7542_v58 = vcombine.high %v579_v52, %v583_v54  ;;  %v602_v11 = vld [vmem:[#allocation4 + $0xed0] sm:$0xff]  ;;  %v7580_v34 = vcombine.high %v618_v28, %v622_v29 }
 0x246   :  { %v606_v12 = vld [vmem:[#allocation4 + $0xef0] sm:$0xff] }
 0x247   :  { %3754 = vmatpush1.bf16.msra.mxu0 %v7483_v61  ;;  %3918 = vmatpush1.bf16.msra.mxu1 %v7485_v42  ;;  %v587_v61 = vld [vmem:[#allocation4 + $0xe58] sm:$0xff]  ;;  %v7564_v17 = vcombine.high %v602_v11, %v606_v12  ;;  %v630_v41 = vld [vmem:[#allocation4 + $0xfb0] sm:$0xff] }
 0x248   :  { %3755 = vmatprep.subr.bf16.mxu0 %v7492_v62  ;;  %3919 = vmatprep.subr.bf16.mxu1 %v7494_v0  ;;  %v591_v42 = vld [vmem:[#allocation4 + $0xe78] sm:$0xff]  ;;  %v7539_v62 = vcombine.low %v578_v50, %v582_v51  ;;  %v7541_v0 = vcombine.low %v579_v52, %v583_v54  ;;  %v634_v50 = vld [vmem:[#allocation4 + $0xfd0] sm:$0xff] }
 0x249   :  { %v7550_v2 = vcombine.high %v587_v61, %v591_v42  ;;  %v638_v51 = vld [vmem:[#allocation4 + $0xff0] sm:$0xff]  ;;  %v635_v54 = vld [vmem:[#allocation4 + $0xfd8] sm:$0xff] }
 0x24b   :  { %3756 = vmatpush1.bf16.msra.mxu0 %v7491_v6  ;;  %3920 = vmatpush1.bf16.msra.mxu1 %v7493_v37  ;;  %v595_v6 = vld [vmem:[#allocation4 + $0xe98] sm:$0xff] }
 0x24c   :  { %3757 = vmatprep.subr.bf16.mxu0 %v7500_v7  ;;  %3921 = vmatprep.subr.bf16.mxu1 %v7502_v8  ;;  %v599_v37 = vld [vmem:[#allocation4 + $0xeb8] sm:$0xff]  ;;  %v7547_v7 = vcombine.low %v586_v60, %v590_v36  ;;  %v7549_v8 = vcombine.low %v587_v61, %v591_v42  ;;  %v7595_v61 = vcombine.low %v634_v50, %v638_v51 }
 0x24d   :  { %v7558_v10 = vcombine.high %v595_v6, %v599_v37 }
 0x24f   :  { %3758 = vmatpush1.bf16.msra.mxu0 %v7499_v13  ;;  %3922 = vmatpush1.bf16.msra.mxu1 %v7501_v15  ;;  %v603_v13 = vld [vmem:[#allocation4 + $0xed8] sm:$0xff] }
 0x250   :  { %3759 = vmatprep.subr.bf16.mxu0 %v7508_v16  ;;  %3923 = vmatprep.subr.bf16.mxu1 %v7510_v4  ;;  %v607_v15 = vld [vmem:[#allocation4 + $0xef8] sm:$0xff]  ;;  %v7555_v16 = vcombine.low %v594_v3, %v598_v5  ;;  %v7557_v4 = vcombine.low %v595_v6, %v599_v37  ;;  %v8189_v5 = vld [vmem:[#allocation6 + $0x24] ss:$16 sps:$4 sm:$0xff]   ;;  %v8187_v37 = vld [vmem:[#allocation6 + $0x20] ss:$16 sps:$4 sm:$0xff]  }
 0x251   :  { %v7566_v18 = vcombine.high %v603_v13, %v607_v15  ;;  %v8184_v3 = vld [vmem:[#allocation6 + $0x8] ss:$16 sps:$4 sm:$0xff]  }
 0x253   :  { %3760 = vmatpush1.bf16.msra.mxu0 %v7507_v21  ;;  %3924 = vmatpush1.bf16.msra.mxu1 %v7509_v22  ;;  %v611_v21 = vld [vmem:[#allocation4 + $0xf18] sm:$0xff] }
 0x254   :  { %3761 = vmatprep.subr.bf16.mxu0 %v7516_v23  ;;  %3925 = vmatprep.subr.bf16.mxu1 %v7518_v24  ;;  %v615_v22 = vld [vmem:[#allocation4 + $0xf38] sm:$0xff]  ;;  %v7563_v23 = vcombine.low %v602_v11, %v606_v12  ;;  %v7565_v24 = vcombine.low %v603_v13, %v607_v15  ;;  %v8201_v12 = vld [vmem:[#allocation6 + $0x64] ss:$16 sps:$4 sm:$0xff]  }
 0x255   :  { %v9075_v32 = vpop.f32.mrb[0].mxu0  ;;  %v9077_v38 = vpop.f32.mrb[0].mxu1  ;;  %v7574_v27 = vcombine.high %v611_v21, %v615_v22  ;;  %v8196_v11 = vld [vmem:[#allocation6 + $0x48] ss:$16 sps:$4 sm:$0xff]   ;;  %v8204_v13 = vld [vmem:[#allocation6 + $0x6c] ss:$16 sps:$4 sm:$0xff]  }
 0x256   :  { %v9079_v39 = vpop.f32.mrb[1].mxu0  ;;  %v9081_v44 = vpop.f32.mrb[1].mxu1  ;;  %v8202_v15 = vld [vmem:[#allocation6 + $0x68] ss:$16 sps:$4 sm:$0xff]  }
 0x257   :  { %v3461_v45 = vpop.f32.mrb[2].mxu0  ;;  %3762 = vmatpush1.bf16.msra.mxu0 %v7515_v59  ;;  %v3625_v46 = vpop.f32.mrb[2].mxu1  ;;  %3926 = vmatpush1.bf16.msra.mxu1 %v7517_v30  ;;  %v619_v59 = vld [vmem:[#allocation4 + $0xf58] sm:$0xff] }
 0x258   :  { %v3462_v53 = vpop.f32.mrb[3].mxu0  ;;  %3763 = vmatprep.subr.bf16.mxu0 %v7524_v31  ;;  %v3626_v49 = vpop.f32.mrb[3].mxu1  ;;  %3927 = vmatprep.subr.bf16.mxu1 %v7526_v33  ;;  %v623_v30 = vld [vmem:[#allocation4 + $0xf78] sm:$0xff]  ;;  %v7571_v31 = vcombine.low %v610_v19, %v614_v20  ;;  %v7573_v33 = vcombine.low %v611_v21, %v615_v22  ;;  %v9084_v45 = vsub.s32 1, %v8997_v43  ;;  %v8213_v19 = vld [vmem:[#allocation6 + $0xa4] ss:$16 sps:$4 sm:$0xff]  }
 0x259   :  { %v7582_v35 = vcombine.high %v619_v59, %v623_v30  ;;  %v631_v46 = vld [vmem:[#allocation4 + $0xfb8] sm:$0xff]  ;;  %v9086_v53 = vld [vmem:[#allocation12] sm:$0xff]  ;;  %v7588_v49 = vcombine.high %v626_v40, %v630_v41 }
 0x25a   :  { %v649_v52 = vrot.slane %v9086_v53, %v9084_v45  ;;  %v8216_v20 = vld [vmem:[#allocation6 + $0xac] ss:$16 sps:$4 sm:$0xff]   ;;  %v8211_v21 = vld [vmem:[#allocation6 + $0xa0] ss:$16 sps:$4 sm:$0xff]   ;;  %v8214_v22 = vld [vmem:[#allocation6 + $0xa8] ss:$16 sps:$4 sm:$0xff]  }
 0x25b   :  { %3764 = vmatpush1.bf16.msra.mxu0 %v7523_v9  ;;  %3928 = vmatpush1.bf16.msra.mxu1 %v7525_v47  ;;  %v627_v9 = vld [vmem:[#allocation4 + $0xf98] sm:$0xff]  ;;  %v7579_v47 = vcombine.low %v618_v28, %v622_v29  ;;  %v8225_v28 = vld [vmem:[#allocation6 + $0xe4] ss:$16 sps:$4 sm:$0xff]  }
 0x25c   :  { %3765 = vmatprep.subr.bf16.mxu0 %v7532_v48  ;;  %3929 = vmatprep.subr.bf16.mxu1 %v7534_v25  ;;  %v7581_v48 = vcombine.low %v619_v59, %v623_v30  ;;  %v7590_v25 = vcombine.high %v627_v9, %v631_v46  ;;  %v8075_v36 = vadd.f32 %v9079_v39, %v649_v52  ;;  %v8192_v39 = vld [vmem:[#allocation6 + $0x2c] ss:$16 sps:$4 sm:$0xff]   ;;  %v8223_v59 = vld [vmem:[#allocation6 + $0xe0] ss:$16 sps:$4 sm:$0xff]   ;;  %v8226_v30 = vld [vmem:[#allocation6 + $0xe8] ss:$16 sps:$4 sm:$0xff]  }
 0x25d   :  { %v8228_v29 = vld [vmem:[#allocation6 + $0xec] ss:$16 sps:$4 sm:$0xff]   ;;  %v8247_v52 = vld [vmem:[#allocation6 + $0x160] ss:$16 sps:$4 sm:$0xff]  }
 0x25f   :  { %3766 = vmatpush1.bf16.msra.mxu0 %v7531_v55  ;;  %3930 = vmatpush1.bf16.msra.mxu1 %v7533_v56  ;;  %v639_v55 = vld [vmem:[#allocation4 + $0xff8] sm:$0xff]  ;;  %v7587_v56 = vcombine.low %v626_v40, %v630_v41  ;;  %v8237_v40 = vld [vmem:[#allocation6 + $0x124] ss:$16 sps:$4 sm:$0xff]  }
 0x260   :  { %3767 = vmatprep.subr.bf16.mxu0 %v7540_v57  ;;  %3931 = vmatprep.subr.bf16.mxu1 %v7542_v58  ;;  %v7589_v57 = vcombine.low %v627_v9, %v631_v46  ;;  %v7596_v58 = vcombine.high %v634_v50, %v638_v51  ;;  %v7598_v60 = vcombine.high %v635_v54, %v639_v55  ;;  %v8240_v41 = vld [vmem:[#allocation6 + $0x12c] ss:$16 sps:$4 sm:$0xff]   ;;  %v8235_v9 = vld [vmem:[#allocation6 + $0x120] ss:$16 sps:$4 sm:$0xff]   ;;  %v8238_v46 = vld [vmem:[#allocation6 + $0x128] ss:$16 sps:$4 sm:$0xff]  }
 0x261   :  { %v7597_v42 = vcombine.low %v635_v54, %v639_v55  ;;  %v8249_v50 = vld [vmem:[#allocation6 + $0x164] ss:$16 sps:$4 sm:$0xff]   ;;  %v8252_v51 = vld [vmem:[#allocation6 + $0x16c] ss:$16 sps:$4 sm:$0xff]   ;;  %v8250_v54 = vld [vmem:[#allocation6 + $0x168] ss:$16 sps:$4 sm:$0xff]  }
 0x262   :  { %v8255_v55 = vld [vmem:[#allocation6 + $0x184] ss:$16 sps:$4 sm:$0xff]  }
 0x263   :  { %3768 = vmatpush1.bf16.msra.mxu0 %v7539_v62  ;;  %3932 = vmatpush1.bf16.msra.mxu1 %v7541_v0  ;;  %v8183_v62 = vld [vmem:[#allocation6 + $0x4] ss:$16 sps:$4 sm:$0xff]   ;;  %v8186_v0 = vld [vmem:[#allocation6 + $0xc] ss:$16 sps:$4 sm:$0xff]  }
 0x264   :  { %3769 = vmatprep.subr.bf16.mxu0 %v7548_v1  ;;  %3933 = vmatprep.subr.bf16.mxu1 %v7550_v2  ;;  %v3957_v1 = vmax.f32 %v8075_v36, 0.0  ;;  %v8181_v2 = vld [vmem:[#allocation6] ss:$16 sps:$4 sm:$0xff]   ;;  %v8261_v36 = vld [vmem:[#allocation6 + $0x1a4] ss:$16 sps:$4 sm:$0xff]  }
 0x266   :  { %v3965_v6 = vpack.c.bf16 %v3957_v1, %v3957_v1  ;;  %v8262_v1 = vld [vmem:[#allocation6 + $0x1a8] ss:$16 sps:$4 sm:$0xff]  }
 0x267   :  { %3770 = vmatpush1.bf16.msra.mxu0 %v7547_v7  ;;  %3934 = vmatpush1.bf16.msra.mxu1 %v7549_v8  ;;  %v8190_v7 = vld [vmem:[#allocation6 + $0x28] ss:$16 sps:$4 sm:$0xff]   ;;  %v8195_v8 = vld [vmem:[#allocation6 + $0x44] ss:$16 sps:$4 sm:$0xff]  }
 0x268   :  { %3771 = vmatprep.subr.bf16.mxu0 %v7556_v63  ;;  %3935 = vmatprep.subr.bf16.mxu1 %v7558_v10  ;;  %v8198_v63 = vld [vmem:[#allocation6 + $0x4c] ss:$16 sps:$4 sm:$0xff]   ;;  %v8193_v10 = vld [vmem:[#allocation6 + $0x40] ss:$16 sps:$4 sm:$0xff]  }
 0x26b   :  { %3772 = vmatpush1.bf16.msra.mxu0 %v7555_v16  ;;  %3936 = vmatpush1.bf16.msra.mxu1 %v7557_v4  ;;  %v8207_v16 = vld [vmem:[#allocation6 + $0x84] ss:$16 sps:$4 sm:$0xff]   ;;  %v8210_v4 = vld [vmem:[#allocation6 + $0x8c] ss:$16 sps:$4 sm:$0xff]  }
 0x26c   :  { %3773 = vmatprep.subr.bf16.mxu0 %v7564_v17  ;;  %3937 = vmatprep.subr.bf16.mxu1 %v7566_v18  ;;  %v8205_v17 = vld [vmem:[#allocation6 + $0x80] ss:$16 sps:$4 sm:$0xff]   ;;  %v8208_v18 = vld [vmem:[#allocation6 + $0x88] ss:$16 sps:$4 sm:$0xff]  }
 0x26f   :  { %3774 = vmatpush1.bf16.msra.mxu0 %v7563_v23  ;;  %3938 = vmatpush1.bf16.msra.mxu1 %v7565_v24  ;;  %v8219_v23 = vld [vmem:[#allocation6 + $0xc4] ss:$16 sps:$4 sm:$0xff]   ;;  %v8222_v24 = vld [vmem:[#allocation6 + $0xcc] ss:$16 sps:$4 sm:$0xff]  }
 0x270   :  { %3775 = vmatprep.subr.bf16.mxu0 %v7572_v26  ;;  %3939 = vmatprep.subr.bf16.mxu1 %v7574_v27  ;;  %v8217_v26 = vld [vmem:[#allocation6 + $0xc0] ss:$16 sps:$4 sm:$0xff]   ;;  %v8220_v27 = vld [vmem:[#allocation6 + $0xc8] ss:$16 sps:$4 sm:$0xff]  }
 0x273   :  { %3776 = vmatpush1.bf16.msra.mxu0 %v7571_v31  ;;  %3940 = vmatpush1.bf16.msra.mxu1 %v7573_v33  ;;  %v8231_v31 = vld [vmem:[#allocation6 + $0x104] ss:$16 sps:$4 sm:$0xff]   ;;  %v8234_v33 = vld [vmem:[#allocation6 + $0x10c] ss:$16 sps:$4 sm:$0xff]  }
 0x274   :  { %3777 = vmatprep.subr.bf16.mxu0 %v7580_v34  ;;  %3941 = vmatprep.subr.bf16.mxu1 %v7582_v35  ;;  %v8229_v34 = vld [vmem:[#allocation6 + $0x100] ss:$16 sps:$4 sm:$0xff]   ;;  %v8232_v35 = vld [vmem:[#allocation6 + $0x108] ss:$16 sps:$4 sm:$0xff]  }
 0x277   :  { %3778 = vmatpush1.bf16.msra.mxu0 %v7579_v47  ;;  %3942 = vmatpush1.bf16.msra.mxu1 %v7581_v48  ;;  %v8243_v47 = vld [vmem:[#allocation6 + $0x144] ss:$16 sps:$4 sm:$0xff]   ;;  %v8246_v48 = vld [vmem:[#allocation6 + $0x14c] ss:$16 sps:$4 sm:$0xff]  }
 0x278   :  { %3779 = vmatprep.subr.bf16.mxu0 %v7588_v49  ;;  %3943 = vmatprep.subr.bf16.mxu1 %v7590_v25  ;;  %v8241_v49 = vld [vmem:[#allocation6 + $0x140] ss:$16 sps:$4 sm:$0xff]   ;;  %v8244_v25 = vld [vmem:[#allocation6 + $0x148] ss:$16 sps:$4 sm:$0xff]  }
 0x27b   :  { %3780 = vmatpush1.bf16.msra.mxu0 %v7587_v56  ;;  %3944 = vmatpush1.bf16.msra.mxu1 %v7589_v57  ;;  %v8258_v56 = vld [vmem:[#allocation6 + $0x18c] ss:$16 sps:$4 sm:$0xff]   ;;  %v8253_v57 = vld [vmem:[#allocation6 + $0x180] ss:$16 sps:$4 sm:$0xff]  }
 0x27c   :  { %3781 = vmatprep.subr.bf16.mxu0 %v7596_v58  ;;  %3945 = vmatprep.subr.bf16.mxu1 %v7598_v60  ;;  %v9094_v58 = vsub.s32 0, %v8997_v43  ;;  %v8256_v60 = vld [vmem:[#allocation6 + $0x188] ss:$16 sps:$4 sm:$0xff]  }
 0x27f   :  { %3782 = vmatpush1.bf16.msra.mxu0 %v7595_v61  ;;  %3946 = vmatpush1.bf16.msra.mxu1 %v7597_v42  ;;  %v8264_v61 = vld [vmem:[#allocation6 + $0x1ac] ss:$16 sps:$4 sm:$0xff]   ;;  %v656_v42 = vsub.s32 3, %v8997_v43 }
 0x280   :  { %5530 = vmatprep.subr.bf16.mxu0 %v8183_v62  ;;  %5694 = vmatprep.subr.bf16.mxu1 %v8186_v0  ;;  %v8259_v62 = vld [vmem:[#allocation6 + $0x1a0] ss:$16 sps:$4 sm:$0xff]   ;;  %v645_v0 = vrot.slane %v9086_v53, %v9094_v58 }
 0x282   :  { %3784 = vmatmul.mubr.bf16.vlgmr.msra.gmra.mrb[4].mxu0 %v9057_v14  ;;  %3948 = vmatmul.mubr.bf16.vlgmr.msra.gmra.mrb[4].mxu1 %v9057_v14  ;;  %v8199_v14 = vld [vmem:[#allocation6 + $0x60] ss:$16 sps:$4 sm:$0xff]  }
 0x283   :  { %5531 = vmatpush1.bf16.msra.mxu0 %v8181_v2  ;;  %5562 = vmatprep.mubr.bf16.mxu0 %v3965_v6  ;;  %v8267_v2 = vld [vmem:[#allocation6 + $0x1c4] ss:$16 sps:$4 sm:$0xff]  }
 0x284   :  { %5695 = vmatpush1.bf16.msra.mxu1 %v8184_v3  ;;  %5726 = vmatprep.mubr.bf16.mxu1 %v3965_v6  ;;  %v8270_v3 = vld [vmem:[#allocation6 + $0x1cc] ss:$16 sps:$4 sm:$0xff]   ;;  %v8265_v6 = vld [vmem:[#allocation6 + $0x1c0] ss:$16 sps:$4 sm:$0xff]  }
 0x285   :  { %5532 = vmatprep.subr.bf16.mxu0 %v8189_v5  ;;  %5696 = vmatprep.subr.bf16.mxu1 %v8192_v39  ;;  %v657_v5 = vrot.slane %v9086_v53, %v656_v42  ;;  %v8074_v39 = vadd.f32 %v9075_v32, %v645_v0  ;;  %v8277_v32 = vld [vmem:[#allocation6 + $0x200] ss:$16 sps:$4 sm:$0xff]   ;;  %v8342_v0 = vld [vmem:[#allocation6 + $0x34c] ss:$16 sps:$4 sm:$0xff]  }
 0x287   :  { %5533 = vmatpush1.bf16.msra.mxu0 %v8187_v37  ;;  %v8268_v37 = vld [vmem:[#allocation6 + $0x1c8] ss:$16 sps:$4 sm:$0xff]  }
 0x288   :  { %5697 = vmatpush1.bf16.msra.mxu1 %v8190_v7  ;;  %5534 = vmatprep.subr.bf16.mxu0 %v8195_v8  ;;  %v8273_v7 = vld [vmem:[#allocation6 + $0x1e4] ss:$16 sps:$4 sm:$0xff]   ;;  %v8276_v8 = vld [vmem:[#allocation6 + $0x1ec] ss:$16 sps:$4 sm:$0xff]  }
 0x289   :  { %5698 = vmatprep.subr.bf16.mxu1 %v8198_v63  ;;  %v8077_v63 = vadd.f32 %v9081_v44, %v657_v5  ;;  %v8288_v44 = vld [vmem:[#allocation6 + $0x22c] ss:$16 sps:$4 sm:$0xff]  }
 0x28a   :  { %v8348_v5 = vld [vmem:[#allocation6 + $0x36c] ss:$16 sps:$4 sm:$0xff]  }
 0x28b   :  { %5535 = vmatpush1.bf16.msra.mxu0 %v8193_v10  ;;  %v8271_v10 = vld [vmem:[#allocation6 + $0x1e0] ss:$16 sps:$4 sm:$0xff]  }
 0x28c   :  { %5699 = vmatpush1.bf16.msra.mxu1 %v8196_v11  ;;  %5536 = vmatprep.subr.bf16.mxu0 %v8201_v12  ;;  %v3956_v11 = vmax.f32 %v8074_v39, 0.0  ;;  %v8274_v12 = vld [vmem:[#allocation6 + $0x1e8] ss:$16 sps:$4 sm:$0xff]  }
 0x28d   :  { %5700 = vmatprep.subr.bf16.mxu1 %v8204_v13  ;;  %v8279_v13 = vld [vmem:[#allocation6 + $0x204] ss:$16 sps:$4 sm:$0xff]   ;;  %v8346_v39 = vld [vmem:[#allocation6 + $0x368] ss:$16 sps:$4 sm:$0xff]  }
 0x28f   :  { %5537 = vmatpush1.bf16.msra.mxu0 %v8199_v14  ;;  %v8282_v14 = vld [vmem:[#allocation6 + $0x20c] ss:$16 sps:$4 sm:$0xff]  }
 0x290   :  { %5701 = vmatpush1.bf16.msra.mxu1 %v8202_v15  ;;  %5538 = vmatprep.subr.bf16.mxu0 %v8207_v16  ;;  %v3959_v15 = vmax.f32 %v8077_v63, 0.0  ;;  %v3964_v16 = vpack.c.bf16 %v3956_v11, %v3956_v11  ;;  %v652_v63 = vsub.s32 2, %v8997_v43  ;;  %v8357_v11 = vld [vmem:[#allocation6 + $0x3a4] ss:$16 sps:$4 sm:$0xff]  }
 0x291   :  { %5702 = vmatprep.subr.bf16.mxu1 %v8210_v4  ;;  %v8280_v4 = vld [vmem:[#allocation6 + $0x208] ss:$16 sps:$4 sm:$0xff]  }
 0x293   :  { %5539 = vmatpush1.bf16.msra.mxu0 %v8205_v17  ;;  %v8285_v17 = vld [vmem:[#allocation6 + $0x224] ss:$16 sps:$4 sm:$0xff]  }
 0x294   :  { %5703 = vmatpush1.bf16.msra.mxu1 %v8208_v18  ;;  %5540 = vmatprep.subr.bf16.mxu0 %v8213_v19  ;;  %v3967_v18 = vpack.c.bf16 %v3959_v15, %v3959_v15  ;;  %v8283_v19 = vld [vmem:[#allocation6 + $0x220] ss:$16 sps:$4 sm:$0xff]   ;;  %v8358_v15 = vld [vmem:[#allocation6 + $0x3a8] ss:$16 sps:$4 sm:$0xff]  }
 0x295   :  { %5704 = vmatprep.subr.bf16.mxu1 %v8216_v20  ;;  %v8286_v20 = vld [vmem:[#allocation6 + $0x228] ss:$16 sps:$4 sm:$0xff]  }
 0x297   :  { %5541 = vmatpush1.bf16.msra.mxu0 %v8211_v21  ;;  %v8291_v21 = vld [vmem:[#allocation6 + $0x244] ss:$16 sps:$4 sm:$0xff]  }
 0x298   :  { %5705 = vmatpush1.bf16.msra.mxu1 %v8214_v22  ;;  %5542 = vmatprep.subr.bf16.mxu0 %v8219_v23  ;;  %v8294_v22 = vld [vmem:[#allocation6 + $0x24c] ss:$16 sps:$4 sm:$0xff]   ;;  %v8289_v23 = vld [vmem:[#allocation6 + $0x240] ss:$16 sps:$4 sm:$0xff]  }
 0x299   :  { %5706 = vmatprep.subr.bf16.mxu1 %v8222_v24  ;;  %v8292_v24 = vld [vmem:[#allocation6 + $0x248] ss:$16 sps:$4 sm:$0xff]  }
 0x29b   :  { %5543 = vmatpush1.bf16.msra.mxu0 %v8217_v26  ;;  %v8297_v26 = vld [vmem:[#allocation6 + $0x264] ss:$16 sps:$4 sm:$0xff]  }
 0x29c   :  { %5707 = vmatpush1.bf16.msra.mxu1 %v8220_v27  ;;  %5544 = vmatprep.subr.bf16.mxu0 %v8225_v28  ;;  %v8300_v27 = vld [vmem:[#allocation6 + $0x26c] ss:$16 sps:$4 sm:$0xff]   ;;  %v8295_v28 = vld [vmem:[#allocation6 + $0x260] ss:$16 sps:$4 sm:$0xff]  }
 0x29d   :  { %5708 = vmatprep.subr.bf16.mxu1 %v8228_v29  ;;  %v8298_v29 = vld [vmem:[#allocation6 + $0x268] ss:$16 sps:$4 sm:$0xff]  }
 0x29f   :  { %5545 = vmatpush1.bf16.msra.mxu0 %v8223_v59  ;;  %v8303_v59 = vld [vmem:[#allocation6 + $0x284] ss:$16 sps:$4 sm:$0xff]  }
 0x2a0   :  { %5709 = vmatpush1.bf16.msra.mxu1 %v8226_v30  ;;  %5546 = vmatprep.subr.bf16.mxu0 %v8231_v31  ;;  %v8306_v30 = vld [vmem:[#allocation6 + $0x28c] ss:$16 sps:$4 sm:$0xff]   ;;  %v8301_v31 = vld [vmem:[#allocation6 + $0x280] ss:$16 sps:$4 sm:$0xff]  }
 0x2a1   :  { %5710 = vmatprep.subr.bf16.mxu1 %v8234_v33  ;;  %v8304_v33 = vld [vmem:[#allocation6 + $0x288] ss:$16 sps:$4 sm:$0xff]  }
 0x2a3   :  { %5547 = vmatpush1.bf16.msra.mxu0 %v8229_v34  ;;  %v8309_v34 = vld [vmem:[#allocation6 + $0x2a4] ss:$16 sps:$4 sm:$0xff]  }
 0x2a4   :  { %5711 = vmatpush1.bf16.msra.mxu1 %v8232_v35  ;;  %5548 = vmatprep.subr.bf16.mxu0 %v8237_v40  ;;  %v8312_v35 = vld [vmem:[#allocation6 + $0x2ac] ss:$16 sps:$4 sm:$0xff]   ;;  %v8307_v40 = vld [vmem:[#allocation6 + $0x2a0] ss:$16 sps:$4 sm:$0xff]  }
 0x2a5   :  { %5712 = vmatprep.subr.bf16.mxu1 %v8240_v41  ;;  %v8310_v41 = vld [vmem:[#allocation6 + $0x2a8] ss:$16 sps:$4 sm:$0xff]  }
 0x2a7   :  { %5549 = vmatpush1.bf16.msra.mxu0 %v8235_v9  ;;  %v8315_v9 = vld [vmem:[#allocation6 + $0x2c4] ss:$16 sps:$4 sm:$0xff]  }
 0x2a8   :  { %5713 = vmatpush1.bf16.msra.mxu1 %v8238_v46  ;;  %5550 = vmatprep.subr.bf16.mxu0 %v8243_v47  ;;  %v8318_v46 = vld [vmem:[#allocation6 + $0x2cc] ss:$16 sps:$4 sm:$0xff]   ;;  %v8313_v47 = vld [vmem:[#allocation6 + $0x2c0] ss:$16 sps:$4 sm:$0xff]  }
 0x2a9   :  { %5714 = vmatprep.subr.bf16.mxu1 %v8246_v48  ;;  %v8316_v48 = vld [vmem:[#allocation6 + $0x2c8] ss:$16 sps:$4 sm:$0xff]  }
 0x2ab   :  { %5551 = vmatpush1.bf16.msra.mxu0 %v8241_v49  ;;  %v8321_v49 = vld [vmem:[#allocation6 + $0x2e4] ss:$16 sps:$4 sm:$0xff]  }
 0x2ac   :  { %5715 = vmatpush1.bf16.msra.mxu1 %v8244_v25  ;;  %5552 = vmatprep.subr.bf16.mxu0 %v8249_v50  ;;  %v8324_v25 = vld [vmem:[#allocation6 + $0x2ec] ss:$16 sps:$4 sm:$0xff]   ;;  %v8319_v50 = vld [vmem:[#allocation6 + $0x2e0] ss:$16 sps:$4 sm:$0xff]  }
 0x2ad   :  { %5716 = vmatprep.subr.bf16.mxu1 %v8252_v51  ;;  %v8322_v51 = vld [vmem:[#allocation6 + $0x2e8] ss:$16 sps:$4 sm:$0xff]  }
 0x2af   :  { %5553 = vmatpush1.bf16.msra.mxu0 %v8247_v52  ;;  %v8327_v52 = vld [vmem:[#allocation6 + $0x304] ss:$16 sps:$4 sm:$0xff]  }
 0x2b0   :  { %5717 = vmatpush1.bf16.msra.mxu1 %v8250_v54  ;;  %5554 = vmatprep.subr.bf16.mxu0 %v8255_v55  ;;  %v8330_v54 = vld [vmem:[#allocation6 + $0x30c] ss:$16 sps:$4 sm:$0xff]   ;;  %v8325_v55 = vld [vmem:[#allocation6 + $0x300] ss:$16 sps:$4 sm:$0xff]  }
 0x2b1   :  { %5718 = vmatprep.subr.bf16.mxu1 %v8258_v56  ;;  %v8328_v56 = vld [vmem:[#allocation6 + $0x308] ss:$16 sps:$4 sm:$0xff]  }
 0x2b3   :  { %5555 = vmatpush1.bf16.msra.mxu0 %v8253_v57  ;;  %v8333_v57 = vld [vmem:[#allocation6 + $0x324] ss:$16 sps:$4 sm:$0xff]  }
 0x2b4   :  { %5719 = vmatpush1.bf16.msra.mxu1 %v8256_v60  ;;  %5556 = vmatprep.subr.bf16.mxu0 %v8261_v36  ;;  %v8336_v60 = vld [vmem:[#allocation6 + $0x32c] ss:$16 sps:$4 sm:$0xff]   ;;  %v8331_v36 = vld [vmem:[#allocation6 + $0x320] ss:$16 sps:$4 sm:$0xff]  }
 0x2b5   :  { %5720 = vmatprep.subr.bf16.mxu1 %v8264_v61  ;;  %v8334_v61 = vld [vmem:[#allocation6 + $0x328] ss:$16 sps:$4 sm:$0xff]  }
 0x2b7   :  { %5557 = vmatpush1.bf16.msra.mxu0 %v8259_v62  ;;  %v8339_v62 = vld [vmem:[#allocation6 + $0x344] ss:$16 sps:$4 sm:$0xff]  }
 0x2b8   :  { %5721 = vmatpush1.bf16.msra.mxu1 %v8262_v1  ;;  %5558 = vmatprep.subr.bf16.mxu0 %v8267_v2  ;;  %v8337_v1 = vld [vmem:[#allocation6 + $0x340] ss:$16 sps:$4 sm:$0xff]   ;;  %v8340_v2 = vld [vmem:[#allocation6 + $0x348] ss:$16 sps:$4 sm:$0xff]  }
 0x2b9   :  { %5722 = vmatprep.subr.bf16.mxu1 %v8270_v3  ;;  %v8345_v3 = vld [vmem:[#allocation6 + $0x364] ss:$16 sps:$4 sm:$0xff]  }
 0x2bb   :  { %5559 = vmatpush1.bf16.msra.mxu0 %v8265_v6  ;;  %v8343_v6 = vld [vmem:[#allocation6 + $0x360] ss:$16 sps:$4 sm:$0xff]  }
 0x2bc   :  { %5723 = vmatpush1.bf16.msra.mxu1 %v8268_v37  ;;  %5560 = vmatprep.subr.bf16.mxu0 %v8273_v7  ;;  %v8351_v37 = vld [vmem:[#allocation6 + $0x384] ss:$16 sps:$4 sm:$0xff]   ;;  %v8354_v7 = vld [vmem:[#allocation6 + $0x38c] ss:$16 sps:$4 sm:$0xff]  }
 0x2bd   :  { %5724 = vmatprep.subr.bf16.mxu1 %v8276_v8  ;;  %v8349_v8 = vld [vmem:[#allocation6 + $0x380] ss:$16 sps:$4 sm:$0xff]  }
 0x2bf   :  { %5561 = vmatpush1.bf16.msra.mxu0 %v8271_v10  ;;  %v8352_v10 = vld [vmem:[#allocation6 + $0x388] ss:$16 sps:$4 sm:$0xff]  }
 0x2c0   :  { %5725 = vmatpush1.bf16.msra.mxu1 %v8274_v12  ;;  %5571 = vmatprep.subr.bf16.mxu0 %v8279_v13  ;;  %v8360_v12 = vld [vmem:[#allocation6 + $0x3ac] ss:$16 sps:$4 sm:$0xff]   ;;  %v8355_v13 = vld [vmem:[#allocation6 + $0x3a0] ss:$16 sps:$4 sm:$0xff]  }
 0x2c1   :  { %5735 = vmatprep.subr.bf16.mxu1 %v8282_v14  ;;  %v653_v14 = vrot.slane %v9086_v53, %v652_v63 }
 0x2c2   :  { %5563 = vmatmul.mubr.bf16.vlgmr.msra.gmra.mrb[8].mxu0 %v3964_v16 }
 0x2c3   :  { %5727 = vmatmul.mubr.bf16.vlgmr.msra.gmra.mrb[8].mxu1 %v3964_v16  ;;  %5572 = vmatpush1.bf16.msra.mxu0 %v8277_v32  ;;  %v8363_v32 = vld [vmem:[#allocation6 + $0x3c4] ss:$16 sps:$4 sm:$0xff]   ;;  %v8366_v16 = vld [vmem:[#allocation6 + $0x3cc] ss:$16 sps:$4 sm:$0xff]  }
 0x2c4   :  { %5603 = vmatprep.mubr.bf16.mxu0 %v3967_v18  ;;  %5736 = vmatpush1.bf16.msra.mxu1 %v8280_v4  ;;  %v8361_v4 = vld [vmem:[#allocation6 + $0x3c0] ss:$16 sps:$4 sm:$0xff]  }
 0x2c5   :  { %5767 = vmatprep.mubr.bf16.mxu1 %v3967_v18  ;;  %5573 = vmatprep.subr.bf16.mxu0 %v8285_v17  ;;  %v8076_v17 = vadd.f32 %v9077_v38, %v653_v14  ;;  %v8364_v18 = vld [vmem:[#allocation6 + $0x3c8] ss:$16 sps:$4 sm:$0xff]   ;;  %v8444_v14 = vld [vmem:[#allocation6 + $0x56c] ss:$16 sps:$4 sm:$0xff]  }
 0x2c6   :  { %5737 = vmatprep.subr.bf16.mxu1 %v8288_v44  ;;  %v8369_v44 = vld [vmem:[#allocation6 + $0x3e4] ss:$16 sps:$4 sm:$0xff]   ;;  %v8376_v38 = vld [vmem:[#allocation6 + $0x408] ss:$16 sps:$4 sm:$0xff]  }
 0x2c7   :  { %5574 = vmatpush1.bf16.msra.mxu0 %v8283_v19  ;;  %v8372_v19 = vld [vmem:[#allocation6 + $0x3ec] ss:$16 sps:$4 sm:$0xff]  }
 0x2c8   :  { %5738 = vmatpush1.bf16.msra.mxu1 %v8286_v20  ;;  %5575 = vmatprep.subr.bf16.mxu0 %v8291_v21  ;;  %v8367_v20 = vld [vmem:[#allocation6 + $0x3e0] ss:$16 sps:$4 sm:$0xff]   ;;  %v3958_v21 = vmax.f32 %v8076_v17, 0.0 }
 0x2c9   :  { %5739 = vmatprep.subr.bf16.mxu1 %v8294_v22  ;;  %v8370_v22 = vld [vmem:[#allocation6 + $0x3e8] ss:$16 sps:$4 sm:$0xff]   ;;  %v8445_v17 = vld [vmem:[#allocation6 + $0x580] ss:$16 sps:$4 sm:$0xff]  }
 0x2cb   :  { %5576 = vmatpush1.bf16.msra.mxu0 %v8289_v23  ;;  %v8375_v23 = vld [vmem:[#allocation6 + $0x404] ss:$16 sps:$4 sm:$0xff]  }
 0x2cc   :  { %5740 = vmatpush1.bf16.msra.mxu1 %v8292_v24  ;;  %5577 = vmatprep.subr.bf16.mxu0 %v8297_v26  ;;  %v8378_v24 = vld [vmem:[#allocation6 + $0x40c] ss:$16 sps:$4 sm:$0xff]   ;;  %v8373_v26 = vld [vmem:[#allocation6 + $0x400] ss:$16 sps:$4 sm:$0xff]  }
 0x2cd   :  { %5741 = vmatprep.subr.bf16.mxu1 %v8300_v27  ;;  %v3966_v27 = vpack.c.bf16 %v3958_v21, %v3958_v21  ;;  %v8454_v21 = vld [vmem:[#allocation6 + $0x5a8] ss:$16 sps:$4 sm:$0xff]  }
 0x2cf   :  { %5578 = vmatpush1.bf16.msra.mxu0 %v8295_v28  ;;  %v8381_v28 = vld [vmem:[#allocation6 + $0x424] ss:$16 sps:$4 sm:$0xff]  }
 0x2d0   :  { %5742 = vmatpush1.bf16.msra.mxu1 %v8298_v29  ;;  %5579 = vmatprep.subr.bf16.mxu0 %v8303_v59  ;;  %v8384_v29 = vld [vmem:[#allocation6 + $0x42c] ss:$16 sps:$4 sm:$0xff]   ;;  %v8379_v59 = vld [vmem:[#allocation6 + $0x420] ss:$16 sps:$4 sm:$0xff]  }
 0x2d1   :  { %5743 = vmatprep.subr.bf16.mxu1 %v8306_v30  ;;  %v8382_v30 = vld [vmem:[#allocation6 + $0x428] ss:$16 sps:$4 sm:$0xff]  }
 0x2d3   :  { %5580 = vmatpush1.bf16.msra.mxu0 %v8301_v31  ;;  %v8387_v31 = vld [vmem:[#allocation6 + $0x444] ss:$16 sps:$4 sm:$0xff]  }
 0x2d4   :  { %5744 = vmatpush1.bf16.msra.mxu1 %v8304_v33  ;;  %5581 = vmatprep.subr.bf16.mxu0 %v8309_v34  ;;  %v8390_v33 = vld [vmem:[#allocation6 + $0x44c] ss:$16 sps:$4 sm:$0xff]   ;;  %v8385_v34 = vld [vmem:[#allocation6 + $0x440] ss:$16 sps:$4 sm:$0xff]  }
 0x2d5   :  { %5745 = vmatprep.subr.bf16.mxu1 %v8312_v35  ;;  %v8388_v35 = vld [vmem:[#allocation6 + $0x448] ss:$16 sps:$4 sm:$0xff]  }
 0x2d7   :  { %5582 = vmatpush1.bf16.msra.mxu0 %v8307_v40  ;;  %v8393_v40 = vld [vmem:[#allocation6 + $0x464] ss:$16 sps:$4 sm:$0xff]  }
 0x2d8   :  { %5746 = vmatpush1.bf16.msra.mxu1 %v8310_v41  ;;  %5583 = vmatprep.subr.bf16.mxu0 %v8315_v9  ;;  %v8396_v41 = vld [vmem:[#allocation6 + $0x46c] ss:$16 sps:$4 sm:$0xff]   ;;  %v8391_v9 = vld [vmem:[#allocation6 + $0x460] ss:$16 sps:$4 sm:$0xff]  }
 0x2d9   :  { %5747 = vmatprep.subr.bf16.mxu1 %v8318_v46  ;;  %v8394_v46 = vld [vmem:[#allocation6 + $0x468] ss:$16 sps:$4 sm:$0xff]  }
 0x2db   :  { %5584 = vmatpush1.bf16.msra.mxu0 %v8313_v47  ;;  %v8399_v47 = vld [vmem:[#allocation6 + $0x484] ss:$16 sps:$4 sm:$0xff]  }
 0x2dc   :  { %5748 = vmatpush1.bf16.msra.mxu1 %v8316_v48  ;;  %5585 = vmatprep.subr.bf16.mxu0 %v8321_v49  ;;  %v8402_v48 = vld [vmem:[#allocation6 + $0x48c] ss:$16 sps:$4 sm:$0xff]   ;;  %v8397_v49 = vld [vmem:[#allocation6 + $0x480] ss:$16 sps:$4 sm:$0xff]  }
 0x2dd   :  { %5749 = vmatprep.subr.bf16.mxu1 %v8324_v25  ;;  %v8400_v25 = vld [vmem:[#allocation6 + $0x488] ss:$16 sps:$4 sm:$0xff]  }
 0x2df   :  { %5586 = vmatpush1.bf16.msra.mxu0 %v8319_v50  ;;  %v8405_v50 = vld [vmem:[#allocation6 + $0x4a4] ss:$16 sps:$4 sm:$0xff]  }
 0x2e0   :  { %5750 = vmatpush1.bf16.msra.mxu1 %v8322_v51  ;;  %5587 = vmatprep.subr.bf16.mxu0 %v8327_v52  ;;  %v8408_v51 = vld [vmem:[#allocation6 + $0x4ac] ss:$16 sps:$4 sm:$0xff]   ;;  %v8403_v52 = vld [vmem:[#allocation6 + $0x4a0] ss:$16 sps:$4 sm:$0xff]  }
 0x2e1   :  { %5751 = vmatprep.subr.bf16.mxu1 %v8330_v54  ;;  %v8406_v54 = vld [vmem:[#allocation6 + $0x4a8] ss:$16 sps:$4 sm:$0xff]  }
 0x2e3   :  { %5588 = vmatpush1.bf16.msra.mxu0 %v8325_v55  ;;  %v8411_v55 = vld [vmem:[#allocation6 + $0x4c4] ss:$16 sps:$4 sm:$0xff]  }
 0x2e4   :  { %5752 = vmatpush1.bf16.msra.mxu1 %v8328_v56  ;;  %5589 = vmatprep.subr.bf16.mxu0 %v8333_v57  ;;  %v8414_v56 = vld [vmem:[#allocation6 + $0x4cc] ss:$16 sps:$4 sm:$0xff]   ;;  %v8409_v57 = vld [vmem:[#allocation6 + $0x4c0] ss:$16 sps:$4 sm:$0xff]  }
 0x2e5   :  { %5753 = vmatprep.subr.bf16.mxu1 %v8336_v60  ;;  %v8412_v60 = vld [vmem:[#allocation6 + $0x4c8] ss:$16 sps:$4 sm:$0xff]  }
 0x2e7   :  { %5590 = vmatpush1.bf16.msra.mxu0 %v8331_v36  ;;  %v8417_v36 = vld [vmem:[#allocation6 + $0x4e4] ss:$16 sps:$4 sm:$0xff]  }
 0x2e8   :  { %5754 = vmatpush1.bf16.msra.mxu1 %v8334_v61  ;;  %5591 = vmatprep.subr.bf16.mxu0 %v8339_v62  ;;  %v8420_v61 = vld [vmem:[#allocation6 + $0x4ec] ss:$16 sps:$4 sm:$0xff]   ;;  %v8415_v62 = vld [vmem:[#allocation6 + $0x4e0] ss:$16 sps:$4 sm:$0xff]  }
 0x2e9   :  { %5755 = vmatprep.subr.bf16.mxu1 %v8342_v0  ;;  %v8418_v0 = vld [vmem:[#allocation6 + $0x4e8] ss:$16 sps:$4 sm:$0xff]  }
 0x2eb   :  { %5592 = vmatpush1.bf16.msra.mxu0 %v8337_v1  ;;  %v8423_v1 = vld [vmem:[#allocation6 + $0x504] ss:$16 sps:$4 sm:$0xff]  }
 0x2ec   :  { %5756 = vmatpush1.bf16.msra.mxu1 %v8340_v2  ;;  %5593 = vmatprep.subr.bf16.mxu0 %v8345_v3  ;;  %v8426_v2 = vld [vmem:[#allocation6 + $0x50c] ss:$16 sps:$4 sm:$0xff]   ;;  %v8421_v3 = vld [vmem:[#allocation6 + $0x500] ss:$16 sps:$4 sm:$0xff]  }
 0x2ed   :  { %5757 = vmatprep.subr.bf16.mxu1 %v8348_v5  ;;  %v8424_v5 = vld [vmem:[#allocation6 + $0x508] ss:$16 sps:$4 sm:$0xff]  }
 0x2ef   :  { %5594 = vmatpush1.bf16.msra.mxu0 %v8343_v6  ;;  %v8429_v6 = vld [vmem:[#allocation6 + $0x524] ss:$16 sps:$4 sm:$0xff]  }
 0x2f0   :  { %5758 = vmatpush1.bf16.msra.mxu1 %v8346_v39  ;;  %5595 = vmatprep.subr.bf16.mxu0 %v8351_v37  ;;  %v8432_v39 = vld [vmem:[#allocation6 + $0x52c] ss:$16 sps:$4 sm:$0xff]   ;;  %v8427_v37 = vld [vmem:[#allocation6 + $0x520] ss:$16 sps:$4 sm:$0xff]  }
 0x2f1   :  { %5759 = vmatprep.subr.bf16.mxu1 %v8354_v7  ;;  %v8430_v7 = vld [vmem:[#allocation6 + $0x528] ss:$16 sps:$4 sm:$0xff]  }
 0x2f3   :  { %5596 = vmatpush1.bf16.msra.mxu0 %v8349_v8  ;;  %v8435_v8 = vld [vmem:[#allocation6 + $0x544] ss:$16 sps:$4 sm:$0xff]  }
 0x2f4   :  { %5760 = vmatpush1.bf16.msra.mxu1 %v8352_v10  ;;  %5597 = vmatprep.subr.bf16.mxu0 %v8357_v11  ;;  %v8438_v10 = vld [vmem:[#allocation6 + $0x54c] ss:$16 sps:$4 sm:$0xff]   ;;  %v8433_v11 = vld [vmem:[#allocation6 + $0x540] ss:$16 sps:$4 sm:$0xff]  }
 0x2f5   :  { %5761 = vmatprep.subr.bf16.mxu1 %v8360_v12  ;;  %v8436_v12 = vld [vmem:[#allocation6 + $0x548] ss:$16 sps:$4 sm:$0xff]  }
 0x2f7   :  { %5598 = vmatpush1.bf16.msra.mxu0 %v8355_v13  ;;  %v8441_v13 = vld [vmem:[#allocation6 + $0x564] ss:$16 sps:$4 sm:$0xff]  }
 0x2f8   :  { %5762 = vmatpush1.bf16.msra.mxu1 %v8358_v15  ;;  %5599 = vmatprep.subr.bf16.mxu0 %v8363_v32  ;;  %v8439_v15 = vld [vmem:[#allocation6 + $0x560] ss:$16 sps:$4 sm:$0xff]   ;;  %v8442_v32 = vld [vmem:[#allocation6 + $0x568] ss:$16 sps:$4 sm:$0xff]  }
 0x2f9   :  { %5763 = vmatprep.subr.bf16.mxu1 %v8366_v16  ;;  %v8447_v16 = vld [vmem:[#allocation6 + $0x584] ss:$16 sps:$4 sm:$0xff]  }
 0x2fb   :  { %5600 = vmatpush1.bf16.msra.mxu0 %v8361_v4  ;;  %v8450_v4 = vld [vmem:[#allocation6 + $0x58c] ss:$16 sps:$4 sm:$0xff]  }
 0x2fc   :  { %5764 = vmatpush1.bf16.msra.mxu1 %v8364_v18  ;;  %5601 = vmatprep.subr.bf16.mxu0 %v8369_v44  ;;  %v8448_v18 = vld [vmem:[#allocation6 + $0x588] ss:$16 sps:$4 sm:$0xff]   ;;  %v8453_v44 = vld [vmem:[#allocation6 + $0x5a4] ss:$16 sps:$4 sm:$0xff]  }
 0x2fd   :  { %5765 = vmatprep.subr.bf16.mxu1 %v8372_v19  ;;  %v8456_v19 = vld [vmem:[#allocation6 + $0x5ac] ss:$16 sps:$4 sm:$0xff]  }
 0x2ff   :  { %5602 = vmatpush1.bf16.msra.mxu0 %v8367_v20  ;;  %v8451_v20 = vld [vmem:[#allocation6 + $0x5a0] ss:$16 sps:$4 sm:$0xff]  }
 0x300   :  { %5766 = vmatpush1.bf16.msra.mxu1 %v8370_v22  ;;  %5612 = vmatprep.subr.bf16.mxu0 %v8375_v23  ;;  %v8459_v22 = vld [vmem:[#allocation6 + $0x5c4] ss:$16 sps:$4 sm:$0xff]   ;;  %v8462_v23 = vld [vmem:[#allocation6 + $0x5cc] ss:$16 sps:$4 sm:$0xff]  }
 0x301   :  { %5776 = vmatprep.subr.bf16.mxu1 %v8378_v24  ;;  %v8457_v24 = vld [vmem:[#allocation6 + $0x5c0] ss:$16 sps:$4 sm:$0xff]  }
 0x302   :  { %5604 = vmatmul.mubr.bf16.vlgmr.msra.gmra.mrb[8].mxu0 %v3966_v27 }
 0x303   :  { %5768 = vmatmul.mubr.bf16.vlgmr.msra.gmra.mrb[8].mxu1 %v3966_v27  ;;  %5613 = vmatpush1.bf16.msra.mxu0 %v8373_v26  ;;  %v8460_v26 = vld [vmem:[#allocation6 + $0x5c8] ss:$16 sps:$4 sm:$0xff]   ;;  %v8465_v27 = vld [vmem:[#allocation6 + $0x5e4] ss:$16 sps:$4 sm:$0xff]  }
 0x304   :  { %5777 = vmatpush1.bf16.msra.mxu1 %v8376_v38  ;;  %5614 = vmatprep.subr.bf16.mxu0 %v8381_v28  ;;  %v8468_v38 = vld [vmem:[#allocation6 + $0x5ec] ss:$16 sps:$4 sm:$0xff]   ;;  %v8463_v28 = vld [vmem:[#allocation6 + $0x5e0] ss:$16 sps:$4 sm:$0xff]  }
 0x305   :  { %5778 = vmatprep.subr.bf16.mxu1 %v8384_v29  ;;  %v8466_v29 = vld [vmem:[#allocation6 + $0x5e8] ss:$16 sps:$4 sm:$0xff]  }
 0x307   :  { %5615 = vmatpush1.bf16.msra.mxu0 %v8379_v59  ;;  %v8471_v59 = vld [vmem:[#allocation6 + $0x604] ss:$16 sps:$4 sm:$0xff]  }
 0x308   :  { %5779 = vmatpush1.bf16.msra.mxu1 %v8382_v30  ;;  %5616 = vmatprep.subr.bf16.mxu0 %v8387_v31  ;;  %v8474_v30 = vld [vmem:[#allocation6 + $0x60c] ss:$16 sps:$4 sm:$0xff]   ;;  %v660_v31 = vsub.s32 4, %v8997_v43 }
 0x309   :  { %5780 = vmatprep.subr.bf16.mxu1 %v8390_v33  ;;  %v664_v33 = vsub.s32 5, %v8997_v43 }
 0x30b   :  { %5617 = vmatpush1.bf16.msra.mxu0 %v8385_v34  ;;  %v672_v34 = vsub.s32 7, %v8997_v43 }
 0x30c   :  { %5781 = vmatpush1.bf16.msra.mxu1 %v8388_v35  ;;  %5618 = vmatprep.subr.bf16.mxu0 %v8393_v40  ;;  %v661_v35 = vrot.slane %v9086_v53, %v660_v31  ;;  %v665_v40 = vrot.slane %v9086_v53, %v664_v33  ;;  %v8523_v31 = vld [vmem:[#allocation6 + $0x720] ss:$16 sps:$4 sm:$0xff]   ;;  %v8526_v33 = vld [vmem:[#allocation6 + $0x728] ss:$16 sps:$4 sm:$0xff]  }
 0x30d   :  { %5782 = vmatprep.subr.bf16.mxu1 %v8396_v41  ;;  %v673_v41 = vrot.slane %v9086_v53, %v672_v34  ;;  %v8477_v53 = vld [vmem:[#allocation6 + $0x624] ss:$16 sps:$4 sm:$0xff]  }
 0x30e   :  { %v8531_v34 = vld [vmem:[#allocation6 + $0x744] ss:$16 sps:$4 sm:$0xff]  }
 0x30f   :  { %5619 = vmatpush1.bf16.msra.mxu0 %v8391_v9 }
 0x310   :  { %5783 = vmatpush1.bf16.msra.mxu1 %v8394_v46  ;;  %5620 = vmatprep.subr.bf16.mxu0 %v8399_v47 }
 0x311   :  { %5784 = vmatprep.subr.bf16.mxu1 %v8402_v48 }
 0x313   :  { %5621 = vmatpush1.bf16.msra.mxu0 %v8397_v49 }
 0x314   :  { %5785 = vmatpush1.bf16.msra.mxu1 %v8400_v25  ;;  %5622 = vmatprep.subr.bf16.mxu0 %v8405_v50 }
 0x315   :  { %5786 = vmatprep.subr.bf16.mxu1 %v8408_v51 }
 0x317   :  { %5623 = vmatpush1.bf16.msra.mxu0 %v8403_v52 }
 0x318   :  { %5787 = vmatpush1.bf16.msra.mxu1 %v8406_v54  ;;  %5624 = vmatprep.subr.bf16.mxu0 %v8411_v55 }
 0x319   :  { %5788 = vmatprep.subr.bf16.mxu1 %v8414_v56 }
 0x31b   :  { %5625 = vmatpush1.bf16.msra.mxu0 %v8409_v57 }
 0x31c   :  { %5789 = vmatpush1.bf16.msra.mxu1 %v8412_v60  ;;  %5626 = vmatprep.subr.bf16.mxu0 %v8417_v36 }
 0x31d   :  { %5790 = vmatprep.subr.bf16.mxu1 %v8420_v61  ;;  %v8469_v61 = vld [vmem:[#allocation6 + $0x600] ss:$16 sps:$4 sm:$0xff]  }
 0x31f   :  { %5627 = vmatpush1.bf16.msra.mxu0 %v8415_v62  ;;  %v8472_v62 = vld [vmem:[#allocation6 + $0x608] ss:$16 sps:$4 sm:$0xff]  }
 0x320   :  { %5791 = vmatpush1.bf16.msra.mxu1 %v8418_v0  ;;  %5628 = vmatprep.subr.bf16.mxu0 %v8423_v1  ;;  %v8480_v1 = vld [vmem:[#allocation6 + $0x62c] ss:$16 sps:$4 sm:$0xff]  }
 0x321   :  { %5792 = vmatprep.subr.bf16.mxu1 %v8426_v2 }
 0x323   :  { %5629 = vmatpush1.bf16.msra.mxu0 %v8421_v3  ;;  %v8475_v3 = vld [vmem:[#allocation6 + $0x620] ss:$16 sps:$4 sm:$0xff]  }
 0x324   :  { %5793 = vmatpush1.bf16.msra.mxu1 %v8424_v5  ;;  %5630 = vmatprep.subr.bf16.mxu0 %v8429_v6  ;;  %v8478_v5 = vld [vmem:[#allocation6 + $0x628] ss:$16 sps:$4 sm:$0xff]   ;;  %v8483_v6 = vld [vmem:[#allocation6 + $0x644] ss:$16 sps:$4 sm:$0xff]  }
 0x325   :  { %5794 = vmatprep.subr.bf16.mxu1 %v8432_v39  ;;  %v8486_v39 = vld [vmem:[#allocation6 + $0x64c] ss:$16 sps:$4 sm:$0xff]  }
 0x327   :  { %5631 = vmatpush1.bf16.msra.mxu0 %v8427_v37  ;;  %v8481_v37 = vld [vmem:[#allocation6 + $0x640] ss:$16 sps:$4 sm:$0xff]  }
 0x328   :  { %5795 = vmatpush1.bf16.msra.mxu1 %v8430_v7  ;;  %5632 = vmatprep.subr.bf16.mxu0 %v8435_v8  ;;  %v8484_v7 = vld [vmem:[#allocation6 + $0x648] ss:$16 sps:$4 sm:$0xff]   ;;  %v8489_v8 = vld [vmem:[#allocation6 + $0x664] ss:$16 sps:$4 sm:$0xff]  }
 0x329   :  { %5796 = vmatprep.subr.bf16.mxu1 %v8438_v10  ;;  %v8492_v10 = vld [vmem:[#allocation6 + $0x66c] ss:$16 sps:$4 sm:$0xff]  }
 0x32b   :  { %5633 = vmatpush1.bf16.msra.mxu0 %v8433_v11  ;;  %v8487_v11 = vld [vmem:[#allocation6 + $0x660] ss:$16 sps:$4 sm:$0xff]  }
 0x32c   :  { %5797 = vmatpush1.bf16.msra.mxu1 %v8436_v12  ;;  %5634 = vmatprep.subr.bf16.mxu0 %v8441_v13  ;;  %v8490_v12 = vld [vmem:[#allocation6 + $0x668] ss:$16 sps:$4 sm:$0xff]   ;;  %v8495_v13 = vld [vmem:[#allocation6 + $0x684] ss:$16 sps:$4 sm:$0xff]  }
 0x32d   :  { %5798 = vmatprep.subr.bf16.mxu1 %v8444_v14  ;;  %v8498_v14 = vld [vmem:[#allocation6 + $0x68c] ss:$16 sps:$4 sm:$0xff]  }
 0x32f   :  { %5635 = vmatpush1.bf16.msra.mxu0 %v8439_v15  ;;  %v8493_v15 = vld [vmem:[#allocation6 + $0x680] ss:$16 sps:$4 sm:$0xff]  }
 0x330   :  { %5799 = vmatpush1.bf16.msra.mxu1 %v8442_v32  ;;  %5636 = vmatprep.subr.bf16.mxu0 %v8447_v16  ;;  %v8496_v32 = vld [vmem:[#allocation6 + $0x688] ss:$16 sps:$4 sm:$0xff]   ;;  %v8501_v16 = vld [vmem:[#allocation6 + $0x6a4] ss:$16 sps:$4 sm:$0xff]  }
 0x331   :  { %5800 = vmatprep.subr.bf16.mxu1 %v8450_v4  ;;  %v8504_v4 = vld [vmem:[#allocation6 + $0x6ac] ss:$16 sps:$4 sm:$0xff]  }
 0x333   :  { %5637 = vmatpush1.bf16.msra.mxu0 %v8445_v17  ;;  %v8499_v17 = vld [vmem:[#allocation6 + $0x6a0] ss:$16 sps:$4 sm:$0xff]  }
 0x334   :  { %5801 = vmatpush1.bf16.msra.mxu1 %v8448_v18  ;;  %5638 = vmatprep.subr.bf16.mxu0 %v8453_v44  ;;  %v8502_v18 = vld [vmem:[#allocation6 + $0x6a8] ss:$16 sps:$4 sm:$0xff]   ;;  %v8507_v44 = vld [vmem:[#allocation6 + $0x6c4] ss:$16 sps:$4 sm:$0xff]  }
 0x335   :  { %5802 = vmatprep.subr.bf16.mxu1 %v8456_v19  ;;  %v8510_v19 = vld [vmem:[#allocation6 + $0x6cc] ss:$16 sps:$4 sm:$0xff]  }
 0x337   :  { %5639 = vmatpush1.bf16.msra.mxu0 %v8451_v20  ;;  %v8505_v20 = vld [vmem:[#allocation6 + $0x6c0] ss:$16 sps:$4 sm:$0xff]  }
 0x338   :  { %5803 = vmatpush1.bf16.msra.mxu1 %v8454_v21  ;;  %5640 = vmatprep.subr.bf16.mxu0 %v8459_v22  ;;  %v8508_v21 = vld [vmem:[#allocation6 + $0x6c8] ss:$16 sps:$4 sm:$0xff]   ;;  %v8513_v22 = vld [vmem:[#allocation6 + $0x6e4] ss:$16 sps:$4 sm:$0xff]  }
 0x339   :  { %5804 = vmatprep.subr.bf16.mxu1 %v8462_v23  ;;  %v8516_v23 = vld [vmem:[#allocation6 + $0x6ec] ss:$16 sps:$4 sm:$0xff]  }
 0x33b   :  { %5641 = vmatpush1.bf16.msra.mxu0 %v8457_v24  ;;  %v8511_v24 = vld [vmem:[#allocation6 + $0x6e0] ss:$16 sps:$4 sm:$0xff]  }
 0x33c   :  { %5805 = vmatpush1.bf16.msra.mxu1 %v8460_v26  ;;  %5642 = vmatprep.subr.bf16.mxu0 %v8465_v27  ;;  %v8514_v26 = vld [vmem:[#allocation6 + $0x6e8] ss:$16 sps:$4 sm:$0xff]   ;;  %v8519_v27 = vld [vmem:[#allocation6 + $0x704] ss:$16 sps:$4 sm:$0xff]  }
 0x33d   :  { %5806 = vmatprep.subr.bf16.mxu1 %v8468_v38  ;;  %v8522_v38 = vld [vmem:[#allocation6 + $0x70c] ss:$16 sps:$4 sm:$0xff]  }
 0x33f   :  { %5643 = vmatpush1.bf16.msra.mxu0 %v8463_v28  ;;  %v8517_v28 = vld [vmem:[#allocation6 + $0x700] ss:$16 sps:$4 sm:$0xff]  }
 0x340   :  { %5807 = vmatpush1.bf16.msra.mxu1 %v8466_v29  ;;  %5653 = vmatprep.subr.bf16.mxu0 %v8471_v59  ;;  %v8520_v29 = vld [vmem:[#allocation6 + $0x708] ss:$16 sps:$4 sm:$0xff]   ;;  %v8525_v59 = vld [vmem:[#allocation6 + $0x724] ss:$16 sps:$4 sm:$0xff]  }
 0x341   :  { %5817 = vmatprep.subr.bf16.mxu1 %v8474_v30  ;;  %v8528_v30 = vld [vmem:[#allocation6 + $0x72c] ss:$16 sps:$4 sm:$0xff]  }
 0x355   :  { %v3785_v9 = vpop.f32.mrb[4].mxu0  ;;  %v9115_v47 = vpop.f32.mrb[4].mxu1 }
 0x356   :  { %v8078_v46 = vadd.f32 %v3785_v9, %v661_v35  ;;  %v3787_v48 = vpop.f32.mrb[5].mxu0  ;;  %v3951_v25 = vpop.f32.mrb[5].mxu1  ;;  %v8534_v35 = vld [vmem:[#allocation6 + $0x74c] ss:$16 sps:$4 sm:$0xff]   ;;  %v8537_v9 = vld [vmem:[#allocation6 + $0x764] ss:$16 sps:$4 sm:$0xff]  }
 0x357   :  { %v8079_v49 = vadd.f32 %v3787_v48, %v665_v40  ;;  %v3789_v50 = vpop.f32.mrb[6].mxu0  ;;  %v8081_v52 = vadd.f32 %v3951_v25, %v673_v41  ;;  %v3953_v54 = vpop.f32.mrb[6].mxu1  ;;  %v8529_v40 = vld [vmem:[#allocation6 + $0x740] ss:$16 sps:$4 sm:$0xff]   ;;  %v8532_v41 = vld [vmem:[#allocation6 + $0x748] ss:$16 sps:$4 sm:$0xff]  }
 0x358   :  { %v3960_v51 = vmax.f32 %v8078_v46, 0.0  ;;  %v3790_v55 = vpop.f32.mrb[7].mxu0  ;;  %v3954_v57 = vpop.f32.mrb[7].mxu1  ;;  %v8540_v46 = vld [vmem:[#allocation6 + $0x76c] ss:$16 sps:$4 sm:$0xff]   ;;  %v668_v54 = vsub.s32 6, %v8997_v43 }
 0x359   :  { %v3961_v56 = vmax.f32 %v8079_v49, 0.0  ;;  %v3963_v60 = vmax.f32 %v8081_v52, 0.0  ;;  %v8535_v48 = vld [vmem:[#allocation6 + $0x760] ss:$16 sps:$4 sm:$0xff]   ;;  %v8538_v49 = vld [vmem:[#allocation6 + $0x768] ss:$16 sps:$4 sm:$0xff]  }
 0x35a   :  { %v3968_v0 = vpack.c.bf16 %v3960_v51, %v3960_v51  ;;  %v8543_v25 = vld [vmem:[#allocation6 + $0x784] ss:$16 sps:$4 sm:$0xff]   ;;  %v8546_v50 = vld [vmem:[#allocation6 + $0x78c] ss:$16 sps:$4 sm:$0xff]   ;;  %v8541_v51 = vld [vmem:[#allocation6 + $0x780] ss:$16 sps:$4 sm:$0xff]  }
 0x35b   :  { %v3969_v36 = vpack.c.bf16 %v3961_v56, %v3961_v56  ;;  %v3971_v2 = vpack.c.bf16 %v3963_v60, %v3963_v60  ;;  %v8544_v52 = vld [vmem:[#allocation6 + $0x788] ss:$16 sps:$4 sm:$0xff]   ;;  %v8549_v55 = vld [vmem:[#allocation6 + $0x7a4] ss:$16 sps:$4 sm:$0xff]   ;;  %v8552_v56 = vld [vmem:[#allocation6 + $0x7ac] ss:$16 sps:$4 sm:$0xff]  }
 0x35c   :  { %v8547_v57 = vld [vmem:[#allocation6 + $0x7a0] ss:$16 sps:$4 sm:$0xff]   ;;  %v8550_v60 = vld [vmem:[#allocation6 + $0x7a8] ss:$16 sps:$4 sm:$0xff]  }
 0x35d   :  { %5644 = vmatprep.mubr.bf16.mxu0 %v3969_v36  ;;  %5808 = vmatprep.mubr.bf16.mxu1 %v3969_v36  ;;  %v8669_v36 = vld [vmem:[#allocation12] sm:$0xff] }
 0x35e   :  { %5645 = vmatmul.mubr.bf16.vlgmr.msra.gmra.mrb[8].mxu0 %v3968_v0  ;;  %5809 = vmatmul.mubr.bf16.vlgmr.msra.gmra.mrb[8].mxu1 %v3968_v0  ;;  %v8558_v0 = vld [vmem:[#allocation6 + $0x7cc] ss:$16 sps:$4 sm:$0xff]   ;;  %v8597_v43 = vld [vmem:[#allocation7] ss:$8 sps:$4 sm:$0xff]  }
 0x35f   :  { %5654 = vmatpush1.bf16.msra.mxu0 %v8469_v61  ;;  %5818 = vmatpush1.bf16.msra.mxu1 %v8472_v62  ;;  %v669_v61 = vrot.slane %v8669_v36, %v668_v54  ;;  %v8555_v62 = vld [vmem:[#allocation6 + $0x7c4] ss:$16 sps:$4 sm:$0xff]  }
 0x360   :  { %5685 = vmatprep.mubr.bf16.mxu0 %v3971_v2  ;;  %5849 = vmatprep.mubr.bf16.mxu1 %v3971_v2 }
 0x361   :  { %5655 = vmatprep.subr.bf16.mxu0 %v8477_v53  ;;  %5819 = vmatprep.subr.bf16.mxu1 %v8480_v1  ;;  %v8553_v53 = vld [vmem:[#allocation6 + $0x7c0] ss:$16 sps:$4 sm:$0xff]   ;;  %v8556_v1 = vld [vmem:[#allocation6 + $0x7c8] ss:$16 sps:$4 sm:$0xff]   ;;  %v8080_v2 = vadd.f32 %v9115_v47, %v669_v61 }
 0x362   :  { %v8567_v47 = vld [vmem:[%s9375_s4] sm:$0xff]  }
 0x363   :  { %5656 = vmatpush1.bf16.msra.mxu0 %v8475_v3  ;;  %5820 = vmatpush1.bf16.msra.mxu1 %v8478_v5  ;;  %v8561_v3 = vld [vmem:[#allocation6 + $0x7e4] ss:$16 sps:$4 sm:$0xff]   ;;  %v8564_v5 = vld [vmem:[#allocation6 + $0x7ec] ss:$16 sps:$4 sm:$0xff]  }
 0x364   :  { %5657 = vmatprep.subr.bf16.mxu0 %v8483_v6  ;;  %5821 = vmatprep.subr.bf16.mxu1 %v8486_v39  ;;  %v8559_v6 = vld [vmem:[#allocation6 + $0x7e0] ss:$16 sps:$4 sm:$0xff]   ;;  %v8562_v39 = vld [vmem:[#allocation6 + $0x7e8] ss:$16 sps:$4 sm:$0xff]  }
 0x367   :  { %5658 = vmatpush1.bf16.msra.mxu0 %v8481_v37  ;;  %5822 = vmatpush1.bf16.msra.mxu1 %v8484_v7  ;;  %v3962_v37 = vmax.f32 %v8080_v2, 0.0  ;;  %v8565_v7 = vld [vmem:[%s9375_s4 + $0x40] sm:$0xff]  }
 0x368   :  { %5659 = vmatprep.subr.bf16.mxu0 %v8489_v8  ;;  %5823 = vmatprep.subr.bf16.mxu1 %v8492_v10  ;;  %v8566_v8 = vld [vmem:[%s9375_s4 + $0xc0] sm:$0xff]  }
 0x369   :  { %v8568_v10 = vld [vmem:[%s9375_s4 + $0x80] sm:$0xff]  }
 0x36b   :  { %5660 = vmatpush1.bf16.msra.mxu0 %v8487_v11  ;;  %5824 = vmatpush1.bf16.msra.mxu1 %v8490_v12  ;;  %v3970_v11 = vpack.c.bf16 %v3962_v37, %v3962_v37  ;;  %v8569_v12 = vld [vmem:[%s9375_s4 + $0x48] sm:$0xff]   ;;  %v8600_v37 = vld [vmem:[#allocation7 + $0x10] ss:$8 sps:$4 sm:$0xff]  }
 0x36c   :  { %5661 = vmatprep.subr.bf16.mxu0 %v8495_v13  ;;  %5825 = vmatprep.subr.bf16.mxu1 %v8498_v14  ;;  %v8570_v13 = vld [vmem:[%s9375_s4 + $0xc8] sm:$0xff]  }
 0x36d   :  { %v8571_v14 = vld [vmem:[%s9375_s4 + $0x8] sm:$0xff]  }
 0x36f   :  { %5662 = vmatpush1.bf16.msra.mxu0 %v8493_v15  ;;  %5826 = vmatpush1.bf16.msra.mxu1 %v8496_v32  ;;  %v8572_v15 = vld [vmem:[%s9375_s4 + $0x88] sm:$0xff]   ;;  %v8573_v32 = vld [vmem:[%s9375_s4 + $0x50] sm:$0xff]  }
 0x370   :  { %5663 = vmatprep.subr.bf16.mxu0 %v8501_v16  ;;  %5827 = vmatprep.subr.bf16.mxu1 %v8504_v4  ;;  %v8574_v16 = vld [vmem:[%s9375_s4 + $0xd0] sm:$0xff]  }
 0x371   :  { %v8575_v4 = vld [vmem:[%s9375_s4 + $0x10] sm:$0xff]  }
 0x373   :  { %5664 = vmatpush1.bf16.msra.mxu0 %v8499_v17  ;;  %5828 = vmatpush1.bf16.msra.mxu1 %v8502_v18  ;;  %v8576_v17 = vld [vmem:[%s9375_s4 + $0x90] sm:$0xff]   ;;  %v8577_v18 = vld [vmem:[%s9375_s4 + $0x58] sm:$0xff]  }
 0x374   :  { %5665 = vmatprep.subr.bf16.mxu0 %v8507_v44  ;;  %5829 = vmatprep.subr.bf16.mxu1 %v8510_v19  ;;  %v8578_v44 = vld [vmem:[%s9375_s4 + $0xd8] sm:$0xff]  }
 0x375   :  { %v8579_v19 = vld [vmem:[%s9375_s4 + $0x18] sm:$0xff]  }
 0x377   :  { %5666 = vmatpush1.bf16.msra.mxu0 %v8505_v20  ;;  %5830 = vmatpush1.bf16.msra.mxu1 %v8508_v21  ;;  %v8580_v20 = vld [vmem:[%s9375_s4 + $0x98] sm:$0xff]   ;;  %v8581_v21 = vld [vmem:[%s9375_s4 + $0x60] sm:$0xff]  }
 0x378   :  { %5667 = vmatprep.subr.bf16.mxu0 %v8513_v22  ;;  %5831 = vmatprep.subr.bf16.mxu1 %v8516_v23  ;;  %v8582_v22 = vld [vmem:[%s9375_s4 + $0xe0] sm:$0xff]  }
 0x379   :  { %v8583_v23 = vld [vmem:[%s9375_s4 + $0x20] sm:$0xff]  }
 0x37b   :  { %5668 = vmatpush1.bf16.msra.mxu0 %v8511_v24  ;;  %5832 = vmatpush1.bf16.msra.mxu1 %v8514_v26  ;;  %v8584_v24 = vld [vmem:[%s9375_s4 + $0xa0] sm:$0xff]   ;;  %v8585_v26 = vld [vmem:[%s9375_s4 + $0x68] sm:$0xff]  }
 0x37c   :  { %5669 = vmatprep.subr.bf16.mxu0 %v8519_v27  ;;  %5833 = vmatprep.subr.bf16.mxu1 %v8522_v38  ;;  %v8586_v27 = vld [vmem:[%s9375_s4 + $0xe8] sm:$0xff]  }
 0x37d   :  { %v8587_v38 = vld [vmem:[%s9375_s4 + $0x28] sm:$0xff]  }
 0x37f   :  { %5670 = vmatpush1.bf16.msra.mxu0 %v8517_v28  ;;  %5834 = vmatpush1.bf16.msra.mxu1 %v8520_v29  ;;  %v8588_v28 = vld [vmem:[%s9375_s4 + $0xa8] sm:$0xff]   ;;  %v8589_v29 = vld [vmem:[%s9375_s4 + $0x70] sm:$0xff]  }
 0x380   :  { %5671 = vmatprep.subr.bf16.mxu0 %v8525_v59  ;;  %5835 = vmatprep.subr.bf16.mxu1 %v8528_v30  ;;  %v8590_v59 = vld [vmem:[%s9375_s4 + $0xf0] sm:$0xff]  }
 0x381   :  { %v8591_v30 = vld [vmem:[%s9375_s4 + $0x30] sm:$0xff]  }
 0x383   :  { %5672 = vmatpush1.bf16.msra.mxu0 %v8523_v31  ;;  %5836 = vmatpush1.bf16.msra.mxu1 %v8526_v33  ;;  %v8592_v31 = vld [vmem:[%s9375_s4 + $0xb0] sm:$0xff]   ;;  %v8593_v33 = vld [vmem:[%s9375_s4 + $0x78] sm:$0xff]  }
 0x384   :  { %5673 = vmatprep.subr.bf16.mxu0 %v8531_v34  ;;  %5837 = vmatprep.subr.bf16.mxu1 %v8534_v35  ;;  %v8594_v34 = vld [vmem:[%s9375_s4 + $0xf8] sm:$0xff]  }
 0x385   :  { %v8595_v35 = vld [vmem:[%s9375_s4 + $0x38] sm:$0xff]  }
 0x387   :  { %5674 = vmatpush1.bf16.msra.mxu0 %v8529_v40  ;;  %5838 = vmatpush1.bf16.msra.mxu1 %v8532_v41  ;;  %v8596_v40 = vld [vmem:[%s9375_s4 + $0xb8] sm:$0xff]   ;;  %v8599_v41 = vld [vmem:[#allocation7 + $0x4] ss:$8 sps:$4 sm:$0xff]  }
 0x388   :  { %5675 = vmatprep.subr.bf16.mxu0 %v8537_v9  ;;  %5839 = vmatprep.subr.bf16.mxu1 %v8540_v46  ;;  %v4228_v9 = vld [vmem:[#allocation12 + $0x8] sm:$0xf] }
 0x389   :  { %v4233_v46 = vrot.slane %v4228_v9, %v9094_v58 }
 0x38b   :  { %5676 = vmatpush1.bf16.msra.mxu0 %v8535_v48  ;;  %5840 = vmatpush1.bf16.msra.mxu1 %v8538_v49  ;;  %v4241_v48 = vrot.slane %v4228_v9, %v652_v63  ;;  %v4237_v49 = vrot.slane %v4228_v9, %v9084_v45 }
 0x38c   :  { %5677 = vmatprep.subr.bf16.mxu0 %v8543_v25  ;;  %5841 = vmatprep.subr.bf16.mxu1 %v8546_v50  ;;  %v4245_v25 = vrot.slane %v4228_v9, %v656_v42  ;;  %v6219_v9 = vld [vmem:[#allocation12 + $0xd] sm:$0x3] }
 0x38f   :  { %5678 = vmatpush1.bf16.msra.mxu0 %v8541_v51  ;;  %5842 = vmatpush1.bf16.msra.mxu1 %v8544_v52 }
 0x390   :  { %5679 = vmatprep.subr.bf16.mxu0 %v8549_v55  ;;  %5843 = vmatprep.subr.bf16.mxu1 %v8552_v56 }
 0x393   :  { %5680 = vmatpush1.bf16.msra.mxu0 %v8547_v57  ;;  %5844 = vmatpush1.bf16.msra.mxu1 %v8550_v60 }
 0x394   :  { %5681 = vmatprep.subr.bf16.mxu0 %v8555_v62  ;;  %5845 = vmatprep.subr.bf16.mxu1 %v8558_v0 }
 0x397   :  { %5682 = vmatpush1.bf16.msra.mxu0 %v8553_v53  ;;  %5846 = vmatpush1.bf16.msra.mxu1 %v8556_v1 }
 0x398   :  { %5683 = vmatprep.subr.bf16.mxu0 %v8561_v3  ;;  %5847 = vmatprep.subr.bf16.mxu1 %v8564_v5 }
 0x39b   :  { %5684 = vmatpush1.bf16.msra.mxu0 %v8559_v6  ;;  %5848 = vmatpush1.bf16.msra.mxu1 %v8562_v39  ;;  %v8602_v39 = vld [vmem:[#allocation7 + $0x14] ss:$8 sps:$4 sm:$0xff]  }
 0x39c   :  { %7952 = vmatprep.subr.bf16.mxu0 %v8565_v7  ;;  %7974 = vmatprep.subr.bf16.mxu1 %v8566_v8  ;;  %v8605_v7 = vld [vmem:[#allocation7 + $0x24] ss:$8 sps:$4 sm:$0xff]   ;;  %v8603_v8 = vld [vmem:[#allocation7 + $0x20] ss:$8 sps:$4 sm:$0xff]  }
 0x39e   :  { %5686 = vmatmul.mubr.bf16.vlgmr.msra.gmra.mrb[8].mxu0 %v3970_v11  ;;  %5850 = vmatmul.mubr.bf16.vlgmr.msra.gmra.mrb[8].mxu1 %v3970_v11  ;;  %v8848_v11 = vmov 0  }
 0x39f   :  { %7953 = vmatpush3.bf16.msra.mxu0 %v8567_v47  ;;  %7975 = vmatpush3.bf16.msra.mxu1 %v8568_v10  ;;  %v8608_v47 = vld [vmem:[#allocation7 + $0x34] ss:$8 sps:$4 sm:$0xff]   ;;  %v8606_v10 = vld [vmem:[#allocation7 + $0x30] ss:$8 sps:$4 sm:$0xff]  }
 0x3a0   :  { %7954 = vmatprep.subr.bf16.mxu0 %v8569_v12  ;;  %7976 = vmatprep.subr.bf16.mxu1 %v8570_v13  ;;  %v6378_v12 = vld [vmem:[#allocation2] sm:$0x3]  ;;  %v8849_v13 = vmov 1  }
 0x3a1   :  { %8178 = vset.pattern.permute.xlu0 %v8848_v11 }
 0x3a2   :  { %6382 = vperm.xlu0 %8178, %v6378_v12  }
 0x3a3   :  { %7955 = vmatpush3.bf16.msra.mxu0 %v8571_v14  ;;  %7977 = vmatpush3.bf16.msra.mxu1 %v8572_v15 }
 0x3a4   :  { %7956 = vmatprep.subr.bf16.mxu0 %v8573_v32  ;;  %7978 = vmatprep.subr.bf16.mxu1 %v8574_v16  ;;  %v7855_v32 = vld [vmem:[#allocation12 + $0xc] ss:$0 sm:$0xff] }
 0x3a6   :  { %8179 = vset.pattern.permute.xlu0 %v8849_v13 }
 0x3a7   :  { %7957 = vmatpush3.bf16.msra.mxu0 %v8575_v4  ;;  %7979 = vmatpush3.bf16.msra.mxu1 %v8576_v17 }
 0x3a8   :  { %7958 = vmatprep.subr.bf16.mxu0 %v8577_v18  ;;  %7980 = vmatprep.subr.bf16.mxu1 %v8578_v44 }
 0x3a9   :  { %6400 = vperm.xlu0 %8179, %v6378_v12  }
 0x3ab   :  { %7959 = vmatpush3.bf16.msra.mxu0 %v8579_v19  ;;  %7981 = vmatpush3.bf16.msra.mxu1 %v8580_v20 }
 0x3ac   :  { %7960 = vmatprep.subr.bf16.mxu0 %v8581_v21  ;;  %7982 = vmatprep.subr.bf16.mxu1 %v8582_v22 }
 0x3af   :  { %7961 = vmatpush3.bf16.msra.mxu0 %v8583_v23  ;;  %7983 = vmatpush3.bf16.msra.mxu1 %v8584_v24 }
 0x3b0   :  { %7962 = vmatprep.subr.bf16.mxu0 %v8585_v26  ;;  %7984 = vmatprep.subr.bf16.mxu1 %v8586_v27 }
 0x3b3   :  { %7963 = vmatpush3.bf16.msra.mxu0 %v8587_v38  ;;  %7985 = vmatpush3.bf16.msra.mxu1 %v8588_v28  ;;  %v6379_v38 = vld [vmem:[#allocation12 + $0x13] sm:$0x3]  ;;  %v6398_v28 = vld [vmem:[#allocation12 + $0x15] sm:$0x3] }
 0x3b4   :  { %7964 = vmatprep.subr.bf16.mxu0 %v8589_v29  ;;  %7986 = vmatprep.subr.bf16.mxu1 %v8590_v59  ;;  %v6389_v29 = vrot.slane %v6379_v38, %v9094_v58  ;;  %v6407_v59 = vrot.slane %v6398_v28, %v9094_v58 }
 0x3b7   :  { %7965 = vmatpush3.bf16.msra.mxu0 %v8591_v30  ;;  %7987 = vmatpush3.bf16.msra.mxu1 %v8592_v31  ;;  %v6393_v30 = vrot.slane %v6379_v38, %v9084_v45  ;;  %v6411_v31 = vrot.slane %v6398_v28, %v9084_v45  ;;  %v8620_v38 = vld [vmem:[%s9377_s6 + $0x58] sm:$0xff]   ;;  %v8621_v28 = vld [vmem:[%s9377_s6 + $0x90] sm:$0xff]  }
 0x3b8   :  { %7966 = vmatprep.subr.bf16.mxu0 %v8593_v33  ;;  %7988 = vmatprep.subr.bf16.mxu1 %v8594_v34 }
 0x3bb   :  { %7967 = vmatpush3.bf16.msra.mxu0 %v8595_v35  ;;  %7989 = vmatpush3.bf16.msra.mxu1 %v8596_v40 }
 0x3bc   :  { %6275 = vmatprep.subr.bf16.mxu0 %v8599_v41 }
 0x421   :  { %v6383_v27 = vpop.permute.xlu0 %6382 }
 0x422   :  { %v6396_v34 = vmul.f32 %v6389_v29, %v6383_v27  ;;  %v6397_v40 = vmul.f32 %v6393_v30, %v6383_v27  ;;  %v8619_v27 = vld [vmem:[%s9377_s6 + $0xd0] sm:$0xff]   ;;  %v8622_v29 = vld [vmem:[%s9377_s6 + $0x18] sm:$0xff]   ;;  %v8624_v30 = vld [vmem:[%s9377_s6 + $0x60] sm:$0xff]  }
 0x428   :  { %v6401_v33 = vpop.permute.xlu0 %6400 }
 0x429   :  { %v6414_v35 = vmul.f32 %v6407_v59, %v6401_v33  ;;  %v6415_v41 = vmul.f32 %v6411_v31, %v6401_v33  ;;  %v8623_v59 = vld [vmem:[%s9377_s6 + $0xd8] sm:$0xff]   ;;  %v8626_v33 = vld [vmem:[%s9377_s6 + $0x20] sm:$0xff]  }
 0x42a   :  { %v8625_v31 = vld [vmem:[%s9377_s6 + $0x98] sm:$0xff]  }
 0x471   :  { %v5687_v50 = vpop.f32.mrb[8].mxu0  ;;  %v5851_v51 = vpop.f32.mrb[8].mxu1 }
 0x472   :  { %v8082_v52 = vadd.f32 %v5687_v50, %v4233_v46  ;;  %v8084_v54 = vadd.f32 %v5851_v51, %v4241_v48  ;;  %v5689_v55 = vpop.f32.mrb[9].mxu0  ;;  %v5853_v56 = vpop.f32.mrb[9].mxu1  ;;  %v6418_v46 = vld [vmem:[#allocation12 + $0x17] sm:$0x3]  ;;  %v6416_v48 = vadd.f32 %v6414_v35, %v6396_v34  ;;  %v6228_v50 = vrot.slane %v6219_v9, %v9084_v45  ;;  %v8627_v34 = vld [vmem:[%s9377_s6 + $0xe0] sm:$0xff]   ;;  %v8628_v35 = vld [vmem:[%s9377_s6 + $0x68] sm:$0xff]  }
 0x473   :  { %v8083_v57 = vadd.f32 %v5689_v55, %v4237_v49  ;;  %v8085_v60 = vadd.f32 %v5853_v56, %v4245_v25  ;;  %v5691_v36 = vpop.f32.mrb[10].mxu0  ;;  %v5855_v61 = vpop.f32.mrb[10].mxu1  ;;  %v6224_v49 = vrot.slane %v6219_v9, %v9094_v58  ;;  %v6417_v25 = vadd.f32 %v6415_v41, %v6397_v40  ;;  %v8629_v40 = vld [vmem:[%s9377_s6 + $0xa0] sm:$0xff]   ;;  %v8630_v41 = vld [vmem:[%s9377_s6 + $0x28] sm:$0xff]  }
 0x474   :  { %v5858_v62 = vmax.f32 %v8082_v52, 0.0  ;;  %v5860_v0 = vmax.f32 %v8084_v54, 0.0  ;;  %v5692_v53 = vpop.f32.mrb[11].mxu0  ;;  %v5856_v1 = vpop.f32.mrb[11].mxu1  ;;  %v6423_v51 = vrot.slane %v6418_v46, %v9094_v58  ;;  %v6427_v52 = vrot.slane %v6418_v46, %v9084_v45  ;;  %v8631_v9 = vld [vmem:[%s9377_s6 + $0xe8] sm:$0xff]   ;;  %v8632_v46 = vld [vmem:[%s9377_s6 + $0x70] sm:$0xff]  }
 0x475   :  { %v5859_v63 = vmax.f32 %v8083_v57, 0.0  ;;  %v5861_v2 = vmax.f32 %v8085_v60, 0.0 }
 0x476   :  { %v5862_v42 = vpack.c.bf16 %v5858_v62, %v5858_v62  ;;  %v5864_v6 = vpack.c.bf16 %v5860_v0, %v5860_v0  ;;  %v6430_v36 = vadd.f32 %v6423_v51, %v6416_v48  ;;  %v6431_v61 = vadd.f32 %v6427_v52, %v6417_v25  ;;  %v8633_v48 = vld [vmem:[%s9377_s6 + $0xa8] sm:$0xff]   ;;  %v8635_v25 = vld [vmem:[%s9377_s6 + $0xf0] sm:$0xff]   ;;  %v8638_v52 = vld [vmem:[%s9377_s6 + $0x38] sm:$0xff]  }
 0x477   :  { %v5863_v3 = vpack.c.bf16 %v5859_v63, %v5859_v63  ;;  %v5865_v5 = vpack.c.bf16 %v5861_v2, %v5861_v2  ;;  %v8637_v51 = vld [vmem:[%s9377_s6 + $0xb0] sm:$0xff]  }
 0x478   :  { %v6434_v63 = vsel %vm6318_vm1, %v6430_v36, 0.0  ;;  %v6435_v2 = vsel %vm6318_vm1, %v6431_v61, 0.0 }
 0x479   :  { %6161 = vmatprep.mubr.bf16.mxu0 %v5863_v3  ;;  %6201 = vmatprep.mubr.bf16.mxu1 %v5865_v5  ;;  %v6436_v3 = vadd.f32 %v6435_v2, %v6434_v63 }
 0x47a   :  { %6162 = vmatmul.mubr.bf16.vlgmr.msra.gmra.mrb[12].mxu0 %v5862_v42  ;;  %6202 = vmatmul.mubr.bf16.vlgmr.msra.gmra.mrb[12].mxu1 %v5864_v6 }
 0x47b   :  { %6276 = vmatpush1.bf16.msra.mxu0 %v8597_v43  ;;  %6307 = vmatprep.mubr.bf16.mxu0 %v8848_v11 }
 0x47c   :  { %6277 = vmatprep.subr.bf16.mxu0 %v8602_v39 }
 0x47f   :  { %6278 = vmatpush1.bf16.msra.mxu0 %v8600_v37 }
 0x480   :  { %6279 = vmatprep.subr.bf16.mxu0 %v8605_v7 }
 0x483   :  { %6280 = vmatpush1.bf16.msra.mxu0 %v8603_v8 }
 0x484   :  { %6281 = vmatprep.subr.bf16.mxu0 %v8608_v47 }
 0x487   :  { %6282 = vmatpush1.bf16.msra.mxu0 %v8606_v10 }
 0x54d   :  { %v7968_v14 = vpop.f32.mrb[12].mxu0  ;;  %v7990_v15 = vpop.f32.mrb[12].mxu1 }
 0x54e   :  { %v7969_v16 = vpop.f32.mrb[13].mxu0  ;;  %v7991_v4 = vpop.f32.mrb[13].mxu1 }
 0x54f   :  { %v7970_v17 = vadd.f32 %v7969_v16, %v7968_v14  ;;  %v7992_v18 = vadd.f32 %v7991_v4, %v7990_v15  ;;  %v7971_v44 = vpop.f32.mrb[14].mxu0  ;;  %v7993_v19 = vpop.f32.mrb[14].mxu1 }
 0x550   :  { %v7972_v20 = vpop.f32.mrb[15].mxu0  ;;  %v7994_v21 = vpop.f32.mrb[15].mxu1  ;;  %v8611_v44 = vld [vmem:[%s9377_s6 + $0xc0] sm:$0xff]   ;;  %v8612_v19 = vld [vmem:[%s9377_s6 + $0x48] sm:$0xff]  }
 0x551   :  { %v6164_v22 = vadd.f32 %v7970_v17, %v7855_v32  ;;  %v8609_v17 = vld [vmem:[%s9377_s6 + $0x40] sm:$0xff]   ;;  %v8614_v21 = vld [vmem:[%s9377_s6 + $0x8] sm:$0xff]   ;;  %7996 = vmatprep.subr.bf16.mxu1 %v8611_v44 }
 0x552   :  { %8018 = vmatprep.subr.bf16.mxu0 %v8609_v17  ;;  %v8613_v20 = vld [vmem:[%s9377_s6 + $0x80] sm:$0xff]  }
 0x553   :  { %v6204_v23 = vadd.f32 %v7992_v18, %v6164_v22  ;;  %v8610_v18 = vld [vmem:[%s9377_s6] sm:$0xff]   ;;  %7997 = vmatpush3.bf16.msra.mxu1 %v8613_v20  ;;  %v8615_v22 = vld [vmem:[%s9377_s6 + $0xc8] sm:$0xff]  }
 0x554   :  { %7998 = vmatprep.subr.bf16.mxu1 %v8615_v22 }
 0x555   :  { %v6209_v24 = vmax.f32 %v6204_v23, 0.0  ;;  %v8616_v23 = vld [vmem:[%s9377_s6 + $0x50] sm:$0xff]  }
 0x557   :  { %v6210_v26 = vpack.c.bf16 %v6209_v24, %v6209_v24  ;;  %v8617_v24 = vld [vmem:[%s9377_s6 + $0x88] sm:$0xff]  }
 0x558   :  { %7999 = vmatpush3.bf16.msra.mxu1 %v8617_v24 }
 0x559   :  { %7896 = vmatmul.mubr.msk.bf16.vlgmr.msra.gmra.mrb[16].mxu0 %vm6271_vm0, %v6210_v26  ;;  %v8618_v26 = vld [vmem:[%s9377_s6 + $0x10] sm:$0xff]   ;;  %8000 = vmatprep.subr.bf16.mxu1 %v8619_v27 }
 0x55a   :  { %8019 = vmatpush3.bf16.msra.mxu0 %v8610_v18 }
 0x55b   :  { %8020 = vmatprep.subr.bf16.mxu0 %v8612_v19 }
 0x55c   :  { %8001 = vmatpush3.bf16.msra.mxu1 %v8621_v28 }
 0x55d   :  { %8002 = vmatprep.subr.bf16.mxu1 %v8623_v59 }
 0x55e   :  { %8021 = vmatpush3.bf16.msra.mxu0 %v8614_v21 }
 0x55f   :  { %8022 = vmatprep.subr.bf16.mxu0 %v8616_v23 }
 0x560   :  { %8003 = vmatpush3.bf16.msra.mxu1 %v8625_v31 }
 0x561   :  { %8004 = vmatprep.subr.bf16.mxu1 %v8627_v34 }
 0x562   :  { %8023 = vmatpush3.bf16.msra.mxu0 %v8618_v26 }
 0x563   :  { %8024 = vmatprep.subr.bf16.mxu0 %v8620_v38 }
 0x564   :  { %8005 = vmatpush3.bf16.msra.mxu1 %v8629_v40 }
 0x565   :  { %8006 = vmatprep.subr.bf16.mxu1 %v8631_v9 }
 0x566   :  { %8025 = vmatpush3.bf16.msra.mxu0 %v8622_v29 }
 0x567   :  { %8026 = vmatprep.subr.bf16.mxu0 %v8624_v30 }
 0x568   :  { %8007 = vmatpush3.bf16.msra.mxu1 %v8633_v48 }
 0x569   :  { %8008 = vmatprep.subr.bf16.mxu1 %v8635_v25 }
 0x56a   :  { %8027 = vmatpush3.bf16.msra.mxu0 %v8626_v33 }
 0x56b   :  { %8028 = vmatprep.subr.bf16.mxu0 %v8628_v35 }
 0x56c   :  { %8009 = vmatpush3.bf16.msra.mxu1 %v8637_v51 }
 0x56e   :  { %8029 = vmatpush3.bf16.msra.mxu0 %v8630_v41 }
 0x56f   :  { %8030 = vmatprep.subr.bf16.mxu0 %v8632_v46 }
 0x62c   :  { %v6309_v54 = vpop.f32.mrb[16].mxu0 }
 0x62d   :  { %v6310_v55 = vadd.f32 %v6309_v54, %v6224_v49  ;;  %v6311_v56 = vpop.f32.mrb[17].mxu0  ;;  %v8634_v49 = vld [vmem:[%s9377_s6 + $0x30] sm:$0xff]   ;;  %v8639_v54 = vld [vmem:[%s9377_s6 + $0xf8] sm:$0xff]  }
 0x62e   :  { %v6312_v57 = vadd.f32 %v6311_v56, %v6228_v50  ;;  %v6313_v60 = vpop.f32.mrb[18].mxu0  ;;  %v8636_v50 = vld [vmem:[%s9377_s6 + $0x78] sm:$0xff]   ;;  %8031 = vmatpush3.bf16.msra.mxu0 %v8634_v49  ;;  %8010 = vmatprep.subr.bf16.mxu1 %v8639_v54 }
 0x62f   :  { %v6314_v62 = vpop.f32.mrb[19].mxu0  ;;  %v6319_v0 = vsel %vm6318_vm1, %v6310_v55, 0.0  ;;  %8032 = vmatprep.subr.bf16.mxu0 %v8636_v50 }
 0x630   :  { %v6320_v53 = vsel %vm6318_vm1, %v6312_v57, 0.0 }
 0x631   :  { %v6321_v1 = vadd.f32 %v6320_v53, %v6319_v0  ;;  %v6316_v0 = vld [vmem:[#allocation12 + $0xf] sm:$0x3]  ;;  %v6317_v53 = vld [vmem:[#allocation12 + $0x11] sm:$0x3] }
 0x632   :  { %8033 = vmatpush3.bf16.msra.mxu0 %v8638_v52  ;;  %v6348_v63 = vrot.slane %v6316_v0, %v9084_v45 }
 0x633   :  { %6322 = vadd.xlane.f32.xlu1 %v6321_v1  ;;  %v6344_v1 = vrot.slane %v6316_v0, %v9094_v58 }
 0x637   :  { %6437 = vadd.xlane.f32.xlu1 %v6436_v3  ;;  %v6432_v3 = vld [vmem:[#allocation12 + $0x19] sm:$0x3] }
 0x6c0   :  { %v6323_v5 = vpop.xlane.xlu1 %6322 }
 0x6c1   :  { %v6325_v43 = vmul.f32 0.00390625, %v6323_v5 }
 0x6c3   :  { %v9234_v42 = vsub.f32 %v6310_v55, %v6325_v43  ;;  %v9236_v6 = vsub.f32 %v6312_v57, %v6325_v43  ;;  %v8640_v55 = vld [vmem:[%s9377_s6 + $0xb8] sm:$0xff]  }
 0x6c4   :  { %v6438_v39 = vpop.xlane.xlu1 %6437  ;;  %8011 = vmatpush3.bf16.msra.mxu1 %v8640_v55 }
 0x6c5   :  { %v6439_v37 = vmul.f32 0.00390625, %v6438_v39  ;;  %v6328_v7 = vmul.f32 %v9234_v42, %v9234_v42  ;;  %v6329_v8 = vmul.f32 %v9236_v6, %v9236_v6  ;;  %v6357_v39 = vrot.slane %v6317_v53, %v9094_v58 }
 0x6c7   :  { %v9242_v47 = vsub.f32 %v6430_v36, %v6439_v37  ;;  %v9244_v10 = vsub.f32 %v6431_v61, %v6439_v37  ;;  %v6330_v11 = vsel %vm6318_vm1, %v6328_v7, 0.0  ;;  %v6331_v12 = vsel %vm6318_vm1, %v6329_v8, 0.0  ;;  %v6433_v7 = vld [vmem:[#allocation12 + $0x1b] sm:$0x3] }
 0x6c8   :  { %v6332_v13 = vadd.f32 %v6331_v12, %v6330_v11  ;;  %v6361_v37 = vrot.slane %v6317_v53, %v9084_v45  ;;  %v6458_v8 = vrot.slane %v6432_v3, %v9094_v58 }
 0x6c9   :  { %v6442_v14 = vmul.f32 %v9242_v47, %v9242_v47  ;;  %v6443_v15 = vmul.f32 %v9244_v10, %v9244_v10 }
 0x6ca   :  { %6333 = vadd.xlane.f32.xlu1 %v6332_v13 }
 0x6cb   :  { %v6444_v32 = vsel %vm6318_vm1, %v6442_v14, 0.0  ;;  %v6445_v16 = vsel %vm6318_vm1, %v6443_v15, 0.0  ;;  %v6462_v14 = vrot.slane %v6432_v3, %v9084_v45  ;;  %v6471_v15 = vrot.slane %v6433_v7, %v9094_v58  ;;  %v8641_v3 = vld [vmem:[#allocation9] sm:$0xff]  }
 0x6cc   :  { %v6446_v4 = vadd.f32 %v6445_v16, %v6444_v32 }
 0x6ce   :  { %6447 = vadd.xlane.f32.xlu0 %v6446_v4  ;;  %v6475_v4 = vrot.slane %v6433_v7, %v9084_v45 }
 0x757   :  { %v6334_v56 = vpop.xlane.xlu1 %6333 }
 0x758   :  { %v6335_v57 = vmul.f32 0.00390625, %v6334_v56 }
 0x75a   :  { %v6336_v60 = vadd.f32 1e-05, %v6335_v57 }
 0x75b   :  { %v6448_v36 = vpop.xlane.xlu0 %6447 }
 0x75c   :  { %8649 = vrsqrt.f32 %v6336_v60  ;;  %v6449_v61 = vmul.f32 0.00390625, %v6448_v36  ;;  %v7933_v60 = vld [vmem:[#allocation12 + $0x1d] ss:$0 sm:$0xff] }
 0x75e   :  { %v6450_v62 = vadd.f32 1e-05, %v6449_v61 }
 0x760   :  { %8651 = vrsqrt.f32 %v6450_v62 }
 0x766   :  { %v8650_v2 = vpop.eup %8649 }
 0x767   :  { %v6338_v5 = vmul.f32 %v8650_v2, %v9234_v42  ;;  %v6339_v43 = vmul.f32 %v8650_v2, %v9236_v6 }
 0x769   :  { %v6352_v11 = vmul.f32 %v6348_v63, %v6339_v43  ;;  %v6351_v12 = vmul.f32 %v6344_v1, %v6338_v5  ;;  %v8850_v5 = vmov 0.0   ;;  %v8642_v43 = vld [vmem:[#allocation9 + $0x8] sm:$0xff]  }
 0x76a   :  { %v8652_v13 = vpop.eup %8651  ;;  %8050 = vmatprep.subr.bf16.mxu1 %v8850_v5  ;;  %8062 = vmatprep.subr.bf16.mxu0 %v8850_v5 }
 0x76b   :  { %v6452_v32 = vmul.f32 %v8652_v13, %v9242_v47  ;;  %v6453_v42 = vmul.f32 %v8652_v13, %v9244_v10  ;;  %v6365_v16 = vadd.f32 %v6361_v37, %v6352_v11  ;;  %v6364_v6 = vadd.f32 %v6357_v39, %v6351_v12  ;;  %v8643_v39 = vld [vmem:[#allocation9 + $0x10] sm:$0xff]   ;;  %v8644_v37 = vld [vmem:[#allocation9 + $0x18] sm:$0xff]  }
 0x76c   :  { %v7934_v13 = vld [vmem:[#allocation12 + $0x1e] ss:$0 sm:$0xff] }
 0x76d   :  { %v6465_v17 = vmul.f32 %v6458_v8, %v6452_v32  ;;  %v6369_v18 = vmin.f32 %v6365_v16, 0.0  ;;  %v6368_v44 = vmin.f32 %v6364_v6, 0.0  ;;  %v6466_v19 = vmul.f32 %v6462_v14, %v6453_v42 }
 0x76e   :  { %vm6367_vm2 = vcmp.gt.f32.partialorder %v6365_v16, 0.0  ;;  %vm6366_vm3 = vcmp.gt.f32.partialorder %v6364_v6, 0.0 }
 0x76f   :  { %v6372_v20 = vmul.f32 1.442695, %v6369_v18  ;;  %v6478_v21 = vadd.f32 %v6471_v15, %v6465_v17  ;;  %v6370_v22 = vmul.f32 1.442695, %v6368_v44  ;;  %v6479_v23 = vadd.f32 %v6475_v4, %v6466_v19  ;;  %v7935_v15 = vld [vmem:[#allocation12 + $0x1f] ss:$0 sm:$0xff] }
 0x770   :  { %v7937_v19 = vld [vmem:[#allocation12 + $0x20] ss:$0 sm:$0xff] }
 0x771   :  { %8653 = vpow2.f32 %v6372_v20  ;;  %v6482_v24 = vmin.f32 %v6478_v21, 0.0  ;;  %v6483_v58 = vmin.f32 %v6479_v23, 0.0  ;;  %vm6480_vm4 = vcmp.gt.f32.partialorder %v6478_v21, 0.0 }
 0x772   :  { %8655 = vpow2.f32 %v6370_v22  ;;  %vm6481_vm5 = vcmp.gt.f32.partialorder %v6479_v23, 0.0 }
 0x773   :  { %v6484_v26 = vmul.f32 1.442695, %v6482_v24  ;;  %v6486_v47 = vmul.f32 1.442695, %v6483_v58 }
 0x775   :  { %8657 = vpow2.f32 %v6484_v26 }
 0x776   :  { %8659 = vpow2.f32 %v6486_v47 }
 0x77b   :  { %v8654_v10 = vpop.eup %8653 }
 0x77c   :  { %v8656_v27 = vpop.eup %8655  ;;  %v7898_v38 = vadd.f32 -1.0, %v8654_v10 }
 0x77d   :  { %v7897_v45 = vadd.f32 -1.0, %v8656_v27 }
 0x77e   :  { %v6377_v28 = vsel %vm6367_vm2, %v6365_v16, %v7898_v38 }
 0x77f   :  { %v8658_v29 = vpop.eup %8657  ;;  %v6493_v59 = vpack.c.bf16 %v6377_v28, %v6377_v28  ;;  %v6376_v30 = vsel %vm6366_vm3, %v6364_v6, %v7897_v45  ;;  %v8645_v45 = vld [vmem:[#allocation10] sm:$0xff]   ;;  %v8646_v28 = vld [vmem:[#allocation10 + $0x8] sm:$0xff]  }
 0x780   :  { %v8660_v31 = vpop.eup %8659  ;;  %v6492_v33 = vpack.c.bf16 %v6376_v30, %v6376_v30  ;;  %v7899_v34 = vadd.f32 -1.0, %v8658_v29  ;;  %v8647_v29 = vld [vmem:[#allocation10 + $0x10] sm:$0xff]  }
 0x781   :  { %6824 = vmatprep.mubr.bf16.mxu0 %v6493_v59  ;;  %v7900_v35 = vadd.f32 -1.0, %v8660_v31  ;;  %v8648_v59 = vld [vmem:[#allocation10 + $0x18] sm:$0xff]  }
 0x782   :  { %6825 = vmatmul.mubr.bf16.vlgmr.msra.gmra.mrb[20].mxu0 %v6492_v33  ;;  %v6490_v40 = vsel %vm6480_vm4, %v6478_v21, %v7899_v34 }
 0x783   :  { %v6491_v41 = vsel %vm6481_vm5, %v6479_v23, %v7900_v35  ;;  %v6526_v9 = vpack.c.bf16 %v6490_v40, %v6490_v40  ;;  %8070 = vmatprep.mubr.msk.bf16.mxu0 %vm8851_vm7, %v8850_v5  ;;  %8063 = vmatpush3.bf16.msra.mxu0 %v8645_v45  ;;  %v7943_v35 = vld [vmem:[#allocation12 + $0x21] ss:$0 sm:$0xff] }
 0x784   :  { %v6527_v46 = vpack.c.bf16 %v6491_v41, %v6491_v41  ;;  %8064 = vmatprep.subr.bf16.mxu0 %v8850_v5  ;;  %v7944_v41 = vld [vmem:[#allocation12 + $0x22] ss:$0 sm:$0xff] }
 0x786   :  { %6688 = vmatprep.mubr.bf16.mxu1 %v6527_v46 }
 0x787   :  { %6689 = vmatmul.mubr.bf16.vlgmr.msra.gmra.mrb[16].mxu1 %v6526_v9  ;;  %8065 = vmatpush3.bf16.msra.mxu0 %v8646_v28 }
 0x788   :  { %8058 = vmatprep.mubr.msk.bf16.mxu1 %vm8851_vm7, %v8850_v5  ;;  %8051 = vmatpush3.bf16.msra.mxu1 %v8641_v3 }
 0x789   :  { %8052 = vmatprep.subr.bf16.mxu1 %v8850_v5  ;;  %8066 = vmatprep.subr.bf16.mxu0 %v8850_v5 }
 0x78b   :  { %8067 = vmatpush3.bf16.msra.mxu0 %v8647_v29 }
 0x78c   :  { %8053 = vmatpush3.bf16.msra.mxu1 %v8642_v43  ;;  %8068 = vmatprep.subr.bf16.mxu0 %v8850_v5 }
 0x78d   :  { %8054 = vmatprep.subr.bf16.mxu1 %v8850_v5 }
 0x78f   :  { %8069 = vmatpush3.bf16.msra.mxu0 %v8648_v59 }
 0x790   :  { %8055 = vmatpush3.bf16.msra.mxu1 %v8643_v39 }
 0x791   :  { %8056 = vmatprep.subr.bf16.mxu1 %v8850_v5 }
 0x794   :  { %8057 = vmatpush3.bf16.msra.mxu1 %v8644_v37 }
 0x855   :  { %v8034_v48 = vpop.f32.mrb[20].mxu0 }
 0x856   :  { %v8035_v49 = vpop.f32.mrb[21].mxu0 }
 0x857   :  { %v8036_v25 = vadd.f32 %v8035_v49, %v8034_v48  ;;  %v8037_v50 = vpop.f32.mrb[22].mxu0 }
 0x858   :  { %v8038_v51 = vpop.f32.mrb[23].mxu0 }
 0x85a   :  { %v8012_v52 = vpop.f32.mrb[16].mxu1 }
 0x85b   :  { %v8013_v54 = vpop.f32.mrb[17].mxu1 }
 0x85c   :  { %v8014_v55 = vadd.f32 %v8013_v54, %v8012_v52  ;;  %v8015_v56 = vpop.f32.mrb[18].mxu1  ;;  %v7946_v54 = vld [vmem:[#allocation12 + $0x23] ss:$0 sm:$0xff] }
 0x85d   :  { %v8016_v57 = vpop.f32.mrb[19].mxu1 }
 0x85e   :  { %v6827_v36 = vadd.f32 %v8036_v25, %v8014_v55 }
 0x860   :  { %v6839_v61 = vadd.f32 %v7933_v60, %v6827_v36 }
 0x862   :  { %v6843_v62 = vsel %vm6842_vm6, %v6839_v61, 0.0 }
 0x863   :  { %6844 = vadd.xlane.f32.xlu1 %v6843_v62 }
 0x8f0   :  { %v6845_v0 = vpop.xlane.xlu1 %6844 }
 0x8f1   :  { %v6847_v53 = vmul.f32 0.015625, %v6845_v0 }
 0x8f3   :  { %v6848_v1 = vsub.f32 %v6839_v61, %v6847_v53 }
 0x8f5   :  { %v6849_v63 = vmul.f32 %v6848_v1, %v6848_v1 }
 0x8f7   :  { %v6850_v2 = vsel %vm6842_vm6, %v6849_v63, 0.0 }
 0x8f8   :  { %6851 = vadd.xlane.f32.xlu1 %v6850_v2 }
 0x985   :  { %v6852_v7 = vpop.xlane.xlu1 %6851 }
 0x986   :  { %v6853_v8 = vmul.f32 0.015625, %v6852_v7 }
 0x988   :  { %v6854_v11 = vadd.f32 1e-05, %v6853_v8 }
 0x98a   :  { %8661 = vrsqrt.f32 %v6854_v11 }
 0x994   :  { %v8662_v12 = vpop.eup %8661 }
 0x995   :  { %v6856_v14 = vmul.f32 %v8662_v12, %v6848_v1 }
 0x997   :  { %v6863_v32 = vmul.f32 %v7934_v13, %v6856_v14 }
 0x999   :  { %v6870_v42 = vadd.f32 %v7935_v15, %v6863_v32 }
 0x99b   :  { %v6872_v16 = vmin.f32 %v6870_v42, 0.0  ;;  %vm6871_vm8 = vcmp.gt.f32.partialorder %v6870_v42, 0.0 }
 0x99d   :  { %v6873_v6 = vmul.f32 1.442695, %v6872_v16 }
 0x99f   :  { %8663 = vpow2.f32 %v6873_v6 }
 0x9a9   :  { %v8664_v4 = vpop.eup %8663 }
 0x9aa   :  { %v7936_v17 = vadd.f32 -1.0, %v8664_v4 }
 0x9ac   :  { %v6876_v18 = vsel %vm6871_vm8, %v6870_v42, %v7936_v17 }
 0x9ad   :  { %v6877_v44 = vpack.c.bf16 %v6876_v18, %v6876_v18 }
 0x9af   :  { %8059 = vmatmul.mubr.msk.bf16.vlgmr.msra.gmra.mrb[20].mxu1 %vm6271_vm0, %v6877_v44 }
 0xa82   :  { %v6954_v20 = vpop.f32.mrb[20].mxu1 }
 0xa83   :  { %v6955_v21 = vadd.f32 %v7937_v19, %v6954_v20  ;;  %v8060_v22 = vpop.f32.mrb[21].mxu1 }
 0xa84   :  { %v6957_v23 = vpop.f32.mrb[22].mxu1 }
 0xa85   :  { %v8061_v24 = vpop.f32.mrb[23].mxu1  ;;  %v6962_v58 = vsel %vm6842_vm6, %v6955_v21, 0.0 }
 0xa86   :  { %6963 = vadd.xlane.f32.xlu1 %v6962_v58 }
 0xb13   :  { %v6964_v26 = vpop.xlane.xlu1 %6963 }
 0xb14   :  { %v6965_v47 = vmul.f32 0.015625, %v6964_v26 }
 0xb16   :  { %v6966_v10 = vsub.f32 %v6955_v21, %v6965_v47 }
 0xb18   :  { %v6967_v27 = vmul.f32 %v6966_v10, %v6966_v10 }
 0xb1a   :  { %v6968_v38 = vsel %vm6842_vm6, %v6967_v27, 0.0 }
 0xb1b   :  { %6969 = vadd.xlane.f32.xlu1 %v6968_v38 }
 0xba8   :  { %v6970_v30 = vpop.xlane.xlu1 %6969 }
 0xba9   :  { %v6971_v31 = vmul.f32 0.015625, %v6970_v30 }
 0xbab   :  { %v6972_v33 = vadd.f32 1e-05, %v6971_v31 }
 0xbad   :  { %8665 = vrsqrt.f32 %v6972_v33 }
 0xbb7   :  { %v8666_v34 = vpop.eup %8665 }
 0xbb8   :  { %v6974_v40 = vmul.f32 %v8666_v34, %v6966_v10 }
 0xbba   :  { %v6981_v9 = vmul.f32 %v7943_v35, %v6974_v40 }
 0xbbc   :  { %v6988_v46 = vadd.f32 %v7944_v41, %v6981_v9 }
 0xbbe   :  { %v6990_v48 = vmin.f32 %v6988_v46, 0.0  ;;  %vm6989_vm9 = vcmp.gt.f32.partialorder %v6988_v46, 0.0 }
 0xbc0   :  { %v6991_v49 = vmul.f32 1.442695, %v6990_v48 }
 0xbc2   :  { %8667 = vpow2.f32 %v6991_v49 }
 0xbcc   :  { %v8668_v25 = vpop.eup %8667 }
 0xbcd   :  { %v7945_v50 = vadd.f32 -1.0, %v8668_v25 }
 0xbcf   :  { %v6994_v51 = vsel %vm6989_vm9, %v6988_v46, %v7945_v50 }
 0xbd0   :  { %v6995_v52 = vpack.c.bf16 %v6994_v51, %v6994_v51 }
 0xbd2   :  { %8071 = vmatmul.mubr.msk.bf16.vlgmr.msra.gmra.mrb[24].mxu0 %vm6271_vm0, %v6995_v52 }
 0xca5   :  { %v7072_v55 = vpop.f32.mrb[24].mxu0 }
 0xca6   :  { %v7073_v56 = vadd.f32 %v7946_v54, %v7072_v55  ;;  %v8072_v57 = vpop.f32.mrb[25].mxu0 }
 0xca7   :  { %v7075_v60 = vpop.f32.mrb[26].mxu0 }
 0xca8   :  { %7078 = vst [vmem:[%s9381_s10] sm:$0x3] %v7073_v56  ;;  %v8073_v36 = vpop.f32.mrb[27].mxu0 }
 0xca9   :  { %7083 = vsyncpa [#allocation3], 1 }
 0xcaa   :  { %7084 = vsyncpa [#allocation5], 1 }
 0xcab   :  { %7085 = vsyncpa [#allocation8], 1 }
 0xcac   :  { %7086 = vsyncpa [#allocation11], 1 }

</bundles_post_ra>
